<compile_context>
chip_gen: v6e
topology: v6e:2x2x1
jax: 0.10.0
libtpu: 0.0.40
codegen_flags: <defaults>
</compile_context>

<pallas_src>
import jax
import jax.numpy as jnp
from jax.experimental import pallas as pl
from jax.experimental.pallas import tpu as pltpu


def _mlp_fused_kernel(x_ref, w1_ref, s1_ref, b1_ref, w2_ref, s2_ref, b2_ref, o_ref):
    """o[:, jt] = relu2(relu2(x @ (w1*s1) + b1) @ (w2*s2)[:, jt] + b2[jt]), relu2 = relu(.)**2.

    w1/w2 arrive as int8; per-output-channel scales s1/s2 are applied in the
    f32 epilogue (scale factors out of each output column of the dot).
    """
    # ---- layer 1: full hidden activation ----
    x = x_ref[...].astype(jnp.bfloat16)            # in-kernel cast (free VPU op)
    w1 = w1_ref[...].astype(jnp.bfloat16)          # int8 -> bf16, exact for |q| <= 127
    h = jnp.dot(x, w1, preferred_element_type=jnp.float32)
    h = jnp.maximum(h * s1_ref[...] + b1_ref[...], 0.0)
    h = (h * h).astype(jnp.bfloat16)               # bf16 for the second MXU pass

    # ---- layer 2: this grid step's N tile ----
    w2 = w2_ref[...].astype(jnp.bfloat16)
    y = jnp.dot(h, w2, preferred_element_type=jnp.float32)
    y = jnp.maximum(y * s2_ref[...] + b2_ref[...], 0.0)
    o_ref[...] = (y * y).astype(o_ref.dtype)


def mlp_forward(x, params, *, tn=None):
    """Fused Pallas equivalent of MLP.forward.

    x: (M, K) float32
    params: (w1_q, s1, b1, w2_q, s2, b2) from init_params:
      w*_q : (in, out) int8  (PyTorch W.T, per-out-channel symmetric quant)
      s*   : (1, out) float32 dequant scales
      b*   : (1, out) float32 biases
    tn: N-tile width. Default = N (single grid step; best for single-TC parts
        and avoids duplicate w1 fetch). Use 512 to shard across v7x's 2 TCs.
    """
    w1_q, s1, b1, w2_q, s2, b2 = params
    M, K = x.shape
    K1, H = w1_q.shape
    H2, N = w2_q.shape
    assert K1 == K and H2 == H, "weight shapes inconsistent with input"
    if tn is None:
        tn = N
    assert N % tn == 0, f"N={N} must be divisible by tn={tn}"

    return pl.pallas_call(
        _mlp_fused_kernel,
        out_shape=jax.ShapeDtypeStruct((M, N), jnp.float32),
        grid_spec=pltpu.PrefetchScalarGridSpec(
            num_scalar_prefetch=0,
            grid=(N // tn,),
            in_specs=[
                pl.BlockSpec((M, K), lambda j: (0, 0)),    # x: resident (fetched once)
                pl.BlockSpec((K, H), lambda j: (0, 0)),    # w1 int8: whole matrix, resident
                pl.BlockSpec((1, H), lambda j: (0, 0)),    # s1: resident
                pl.BlockSpec((1, H), lambda j: (0, 0)),    # b1: resident
                pl.BlockSpec((H, tn), lambda j: (0, j)),   # w2 int8: streamed N tile
                pl.BlockSpec((1, tn), lambda j: (0, j)),   # s2: streamed N tile
                pl.BlockSpec((1, tn), lambda j: (0, j)),   # b2: streamed N tile
            ],
            out_specs=pl.BlockSpec((M, tn), lambda j: (0, j)),
        ),
        compiler_params=pltpu.CompilerParams(
            # Harmless at grid=(1,); lets tn=512 shard across v7x's two TCs.
            dimension_semantics=("parallel",),
            vmem_limit_bytes=32 * 1024 * 1024,  # headroom above v5e's 16 MiB scoped default
        ),
    )(x, w1_q, s1, b1, w2_q, s2, b2)


def _quantize_per_out_channel(w_t):
    """Symmetric int8 quantization per output channel of a (in, out) matrix."""
    absmax = jnp.max(jnp.abs(w_t), axis=0, keepdims=True)          # (1, out)
    scale = jnp.maximum(absmax, 1e-8) / 127.0
    q = jnp.clip(jnp.round(w_t / scale), -127, 127).astype(jnp.int8)
    return q, scale.astype(jnp.float32)


def init_params(key, in_features=1024, out_features=1024):
    """Deterministic nn.Linear-style init (uniform +-1/sqrt(fan_in)), then
    int8 per-channel weight quantization; biases pre-reshaped to (1, out)."""
    k1, k2, k3, k4 = jax.random.split(key, 4)
    bound = 1.0 / jnp.sqrt(in_features)
    w1 = jax.random.uniform(k1, (out_features, in_features), jnp.float32, -bound, bound)
    b1 = jax.random.uniform(k2, (out_features,), jnp.float32, -bound, bound)
    w2 = jax.random.uniform(k3, (out_features, out_features), jnp.float32, -bound, bound)
    b2 = jax.random.uniform(k4, (out_features,), jnp.float32, -bound, bound)
    # kernel consumes W.T (in, out); quantize + hoist bias reshapes here so the
    # per-call wrapper does no extra XLA work.
    w1_q, s1 = _quantize_per_out_channel(w1.T)
    w2_q, s2 = _quantize_per_out_channel(w2.T)
    return (w1_q, s1, b1.reshape(1, -1), w2_q, s2, b2.reshape(1, -1))


def ref_forward(x, params):
    """Plain-JAX reference following the identical dtype/quantization path."""
    w1_q, s1, b1, w2_q, s2, b2 = params
    h = jnp.dot(x.astype(jnp.bfloat16), w1_q.astype(jnp.bfloat16),
                preferred_element_type=jnp.float32)
    h = jnp.maximum(h * s1 + b1, 0.0)
    h = h * h
    y = jnp.dot(h.astype(jnp.bfloat16), w2_q.astype(jnp.bfloat16),
                preferred_element_type=jnp.float32)
    y = jnp.maximum(y * s2 + b2, 0.0)
    return y * y


if __name__ == "__main__":
    key = jax.random.PRNGKey(0)
    pkey, xkey = jax.random.split(key)
    params = init_params(pkey)

    batch = 8  # MLP fixes the feature dim at 1024; small batch
    x = jax.random.normal(xkey, (batch, 1024), jnp.float32)

    out = mlp_forward(x, params)
    jax.block_until_ready(out)

    ref = ref_forward(x, params)
    assert out.shape == (batch, 1024)
    assert jnp.allclose(out, ref, rtol=1e-2, atol=1e-2), (
        f"max abs err {jnp.max(jnp.abs(out - ref))}"
    )

    print("KERNEL_OK")
</pallas_src>

<mosaic_0001>
module attributes {stable_mosaic.version = 11 : i64} {
  func.func @_mlp_fused_kernel(%arg0: i32, %arg1: memref<8x1024xf32, #tpu.memory_space<vmem>>, %arg2: memref<1024x1024xi8, #tpu.memory_space<vmem>>, %arg3: memref<1x1024xf32, #tpu.memory_space<vmem>>, %arg4: memref<1x1024xf32, #tpu.memory_space<vmem>>, %arg5: memref<1024x1024xi8, #tpu.memory_space<vmem>>, %arg6: memref<1x1024xf32, #tpu.memory_space<vmem>>, %arg7: memref<1x1024xf32, #tpu.memory_space<vmem>>, %arg8: memref<8x1024xf32, #tpu.memory_space<vmem>>) attributes {dimension_semantics = [#tpu.dimension_semantics<parallel>], iteration_bounds = array<i64: 1>, scalar_prefetch = 0 : i64, scratch_operands = 0 : i64, tpu.core_type = #tpu.core_type<tc>, window_params = [{pipeline_mode = #tpu.pipeline_mode<synchronous>, transform_indices = @transform_0, window_bounds = array<i64: 8, 1024>}, {pipeline_mode = #tpu.pipeline_mode<synchronous>, transform_indices = @transform_1, window_bounds = array<i64: 1024, 1024>}, {pipeline_mode = #tpu.pipeline_mode<synchronous>, transform_indices = @transform_2, window_bounds = array<i64: 1, 1024>}, {pipeline_mode = #tpu.pipeline_mode<synchronous>, transform_indices = @transform_3, window_bounds = array<i64: 1, 1024>}, {transform_indices = @transform_4, window_bounds = array<i64: 1024, 1024>}, {transform_indices = @transform_5, window_bounds = array<i64: 1, 1024>}, {transform_indices = @transform_6, window_bounds = array<i64: 1, 1024>}, {transform_indices = @transform_7, window_bounds = array<i64: 8, 1024>}]} {
    %c0 = arith.constant 0 : index
    %c0_0 = arith.constant 0 : index
    %0 = vector.load %arg1[%c0, %c0_0] : memref<8x1024xf32, #tpu.memory_space<vmem>>, vector<8x1024xf32>
    %1 = arith.truncf %0 : vector<8x1024xf32> to vector<8x1024xbf16>
    %c0_1 = arith.constant 0 : index
    %c0_2 = arith.constant 0 : index
    %2 = vector.load %arg2[%c0_1, %c0_2] : memref<1024x1024xi8, #tpu.memory_space<vmem>>, vector<1024x1024xi8>
    %3 = arith.sitofp %2 : vector<1024x1024xi8> to vector<1024x1024xbf16>
    %cst = arith.constant dense<0.000000e+00> : vector<8x1024xf32>
    %4 = tpu.matmul %1, %3, %cst {dimension_numbers = #tpu.dot_dimension_numbers<[1], [0], [0], [1], [0, 0, 1, 1], [], []>} : vector<8x1024xbf16>, vector<1024x1024xbf16>, vector<8x1024xf32> -> vector<8x1024xf32>
    %c0_3 = arith.constant 0 : index
    %c0_4 = arith.constant 0 : index
    %5 = vector.load %arg3[%c0_3, %c0_4] : memref<1x1024xf32, #tpu.memory_space<vmem>>, vector<1x1024xf32>
    %6 = vector.broadcast %5 : vector<1x1024xf32> to vector<8x1024xf32>
    %7 = arith.mulf %4, %6 : vector<8x1024xf32>
    %c0_5 = arith.constant 0 : index
    %c0_6 = arith.constant 0 : index
    %8 = vector.load %arg4[%c0_5, %c0_6] : memref<1x1024xf32, #tpu.memory_space<vmem>>, vector<1x1024xf32>
    %9 = vector.broadcast %8 : vector<1x1024xf32> to vector<8x1024xf32>
    %10 = arith.addf %7, %9 : vector<8x1024xf32>
    %cst_7 = arith.constant 0.000000e+00 : f32
    %11 = vector.broadcast %cst_7 : f32 to vector<8x1024xf32>
    %12 = arith.maximumf %10, %11 : vector<8x1024xf32>
    %13 = arith.mulf %12, %12 : vector<8x1024xf32>
    %14 = arith.truncf %13 : vector<8x1024xf32> to vector<8x1024xbf16>
    %c0_8 = arith.constant 0 : index
    %c0_9 = arith.constant 0 : index
    %15 = vector.load %arg5[%c0_8, %c0_9] : memref<1024x1024xi8, #tpu.memory_space<vmem>>, vector<1024x1024xi8>
    %16 = arith.sitofp %15 : vector<1024x1024xi8> to vector<1024x1024xbf16>
    %cst_10 = arith.constant dense<0.000000e+00> : vector<8x1024xf32>
    %17 = tpu.matmul %14, %16, %cst_10 {dimension_numbers = #tpu.dot_dimension_numbers<[1], [0], [0], [1], [0, 0, 1, 1], [], []>} : vector<8x1024xbf16>, vector<1024x1024xbf16>, vector<8x1024xf32> -> vector<8x1024xf32>
    %c0_11 = arith.constant 0 : index
    %c0_12 = arith.constant 0 : index
    %18 = vector.load %arg6[%c0_11, %c0_12] : memref<1x1024xf32, #tpu.memory_space<vmem>>, vector<1x1024xf32>
    %19 = vector.broadcast %18 : vector<1x1024xf32> to vector<8x1024xf32>
    %20 = arith.mulf %17, %19 : vector<8x1024xf32>
    %c0_13 = arith.constant 0 : index
    %c0_14 = arith.constant 0 : index
    %21 = vector.load %arg7[%c0_13, %c0_14] : memref<1x1024xf32, #tpu.memory_space<vmem>>, vector<1x1024xf32>
    %22 = vector.broadcast %21 : vector<1x1024xf32> to vector<8x1024xf32>
    %23 = arith.addf %20, %22 : vector<8x1024xf32>
    %cst_15 = arith.constant 0.000000e+00 : f32
    %24 = vector.broadcast %cst_15 : f32 to vector<8x1024xf32>
    %25 = arith.maximumf %23, %24 : vector<8x1024xf32>
    %26 = arith.mulf %25, %25 : vector<8x1024xf32>
    %c0_16 = arith.constant 0 : index
    %c0_17 = arith.constant 0 : index
    %27 = vector.load %arg8[%c0_16, %c0_17] : memref<8x1024xf32, #tpu.memory_space<vmem>>, vector<8x1024xf32>
    tpu.vector_store %arg8[%c0_16, %c0_17], %26 {strides = array<i32>} : memref<8x1024xf32, #tpu.memory_space<vmem>>, vector<8x1024xf32>,
    return
  }
  func.func @transform_0(%arg0: i32) -> (i32, i32) {
    %c0_i32 = arith.constant 0 : i32
    %c0_i32_0 = arith.constant 0 : i32
    %c0_i32_1 = arith.constant 0 : i32
    return %c0_i32, %c0_i32_0 : i32, i32
  }
  func.func @transform_1(%arg0: i32) -> (i32, i32) {
    %c0_i32 = arith.constant 0 : i32
    %c0_i32_0 = arith.constant 0 : i32
    %c0_i32_1 = arith.constant 0 : i32
    return %c0_i32, %c0_i32_0 : i32, i32
  }
  func.func @transform_2(%arg0: i32) -> (i32, i32) {
    %c0_i32 = arith.constant 0 : i32
    %c0_i32_0 = arith.constant 0 : i32
    %c0_i32_1 = arith.constant 0 : i32
    return %c0_i32, %c0_i32_0 : i32, i32
  }
  func.func @transform_3(%arg0: i32) -> (i32, i32) {
    %c0_i32 = arith.constant 0 : i32
    %c0_i32_0 = arith.constant 0 : i32
    %c0_i32_1 = arith.constant 0 : i32
    return %c0_i32, %c0_i32_0 : i32, i32
  }
  func.func @transform_4(%arg0: i32) -> (i32, i32) {
    %c0_i32 = arith.constant 0 : i32
    %c0_i32_0 = arith.constant 0 : i32
    return %c0_i32, %arg0 : i32, i32
  }
  func.func @transform_5(%arg0: i32) -> (i32, i32) {
    %c0_i32 = arith.constant 0 : i32
    %c0_i32_0 = arith.constant 0 : i32
    return %c0_i32, %arg0 : i32, i32
  }
  func.func @transform_6(%arg0: i32) -> (i32, i32) {
    %c0_i32 = arith.constant 0 : i32
    %c0_i32_0 = arith.constant 0 : i32
    return %c0_i32, %arg0 : i32, i32
  }
  func.func @transform_7(%arg0: i32) -> (i32, i32) {
    %c0_i32 = arith.constant 0 : i32
    %c0_i32_0 = arith.constant 0 : i32
    return %c0_i32, %arg0 : i32, i32
  }
}

</mosaic_0001>

<bundles_post_ra>
// kernel: tpu_custom_call.1
= control target key start
LH: loop header
LB: loop body
LE: loop exit
PB: predicated region body
PF: predicated region fallthrough
CT: control target
= control target key end

     0   :  { %12 = vsyncpa [#allocation3], 0  ;;  %s3752_s0 = inlined_call_operand.hbm [shape: f32[8,1024], index: 0, kind: input, shape index: {}]   ;;  %s3753_s1 = inlined_call_operand.hbm [shape: s8[1024,1024], index: 1, kind: input, shape index: {}]   ;;  %s3754_s2 = inlined_call_operand.hbm [shape: f32[1,1024], index: 2, kind: input, shape index: {}]   ;;  %s3755_s3 = inlined_call_operand.hbm [shape: f32[1,1024], index: 3, kind: input, shape index: {}]   ;;  %s3756_s4 = inlined_call_operand.hbm [shape: s8[1024,1024], index: 4, kind: input, shape index: {}]   ;;  %s3757_s5 = inlined_call_operand.vmem [shape: f32[1,1024], index: 5, kind: input, shape index: {}]   ;;  %s3758_s6 = inlined_call_operand.hbm [shape: f32[1,1024], index: 6, kind: input, shape index: {}]   ;;  %s3759_s7 = inlined_call_operand.hbm [shape: f32[8,1024], index: 7, kind: output, shape index: {}]  }
   0x1   :  { %13 = vsyncpa [#allocation6], 0 }
   0x2   :  { %14 = vsyncpa [#allocation9], 0 }
   0x3   :  { %15 = vsyncpa [#allocation12], 0 }
   0x4   :  { %16 = vsyncpa [#allocation4], 0  ;;  %s3392_s24 = smov [#allocation5]  }
   0x5   :  { %s32_s25 = sshll.u32 %s3392_s24, 4  ;;  %s33_s25 = int_to_ptr.vmem [resolvable:$true] %s32_s25 }
   0x6   :  { %s3250_s26 = scalar_lea.vmem %s33_s25, 32768  ;;  %p3255_p1 = scmp.lt.s32.totalorder %s33_s25, %s33_s25 }
   0x7   :  { %p3251_p0 = scmp.ne.s32.totalorder %s33_s25, %s3250_s26  ;;  %p3256_p2 = scmp.lt.s32.totalorder %s3250_s26, %s3250_s26 }
   0x9   :  { %p3257_p3 = por %p3256_p2, %p3255_p1 }
   0xb   :  { %p3258_p4 = pnand %p3257_p3, %p3251_p0 }
   0xd   :  { %3261 = shalt.err (!%p3258_p4)
}
   0xe   :  { %s3393_s27 = smov 1024   ;;  %s3394_s28 = smov 64  }
   0xf   :  { %38 = dma.hbm_to_vmem [thread:$0]  %s3753_s1, 32768, %s33_s25, [#allocation6], %s3393_s27, %s3393_s27, %s3394_s28  }
  0x10   :  { %s3395_s8 = smov [#allocation8]   ;;  %s3396_s10 = smov [#allocation2]  }
  0x11   :  { %s55_s9 = sshll.u32 %s3395_s8, 4  ;;  %s23_s11 = sshll.u32 %s3396_s10, 4  ;;  %s56_s9 = int_to_ptr.vmem [resolvable:$true] %s55_s9  ;;  %s24_s11 = int_to_ptr.vmem [resolvable:$true] %s23_s11 }
  0x12   :  { %s3270_s12 = scalar_lea.vmem %s56_s9, 128  ;;  %p3275_p6 = scmp.lt.s32.totalorder %s56_s9, %s56_s9 }
  0x13   :  { %p3271_p5 = scmp.ne.s32.totalorder %s56_s9, %s3270_s12  ;;  %p3276_p7 = scmp.lt.s32.totalorder %s3270_s12, %s3270_s12 }
  0x15   :  { %p3277_p8 = por %p3276_p7, %p3275_p6 }
  0x17   :  { %p3278_p9 = pnand %p3277_p8, %p3271_p5 }
  0x19   :  { %3281 = shalt.err (!%p3278_p9)
}
  0x1a   :  { %58 = dma.hbm_to_vmem [thread:$0]  %s3755_s3, 128, %s56_s9, [#allocation9]  }
  0x1b   :  { %s3290_s15 = scalar_lea.vmem %s24_s11, 1024  ;;  %p3295_p11 = scmp.lt.s32.totalorder %s24_s11, %s24_s11 }
  0x1c   :  { %p3291_p10 = scmp.ne.s32.totalorder %s24_s11, %s3290_s15  ;;  %p3296_p12 = scmp.lt.s32.totalorder %s3290_s15, %s3290_s15 }
  0x1e   :  { %p3297_p13 = por %p3296_p12, %p3295_p11 }
  0x20   :  { %p3298_p0 = pnand %p3297_p13, %p3291_p10 }
  0x22   :  { %3301 = shalt.err (!%p3298_p0)
}
  0x23   :  { %26 = dma.hbm_to_vmem [thread:$0]  %s3752_s0, 1024, %s24_s11, [#allocation3]  }
  0x24   :  { %s3397_s17 = smov [#allocation7]   ;;  %s3398_s19 = smov [#allocation10]  }
  0x25   :  { %s45_s18 = sshll.u32 %s3397_s17, 4  ;;  %s64_s20 = sshll.u32 %s3398_s19, 4  ;;  %s46_s18 = int_to_ptr.vmem [resolvable:$true] %s45_s18  ;;  %s65_s20 = int_to_ptr.vmem [resolvable:$true] %s64_s20 }
  0x26   :  { %s3310_s21 = scalar_lea.vmem %s46_s18, 128  ;;  %p3315_p2 = scmp.lt.s32.totalorder %s46_s18, %s46_s18 }
  0x27   :  { %p3311_p1 = scmp.ne.s32.totalorder %s46_s18, %s3310_s21  ;;  %p3316_p3 = scmp.lt.s32.totalorder %s3310_s21, %s3310_s21 }
  0x29   :  { %p3317_p4 = por %p3316_p3, %p3315_p2 }
  0x2b   :  { %p3318_p5 = pnand %p3317_p4, %p3311_p1 }
  0x2d   :  { %3321 = shalt.err (!%p3318_p5)
}
  0x2e   :  { %48 = dma.hbm_to_vmem [thread:$0]  %s3754_s2, 128, %s46_s18, [#allocation6]  }
  0x2f   :  { %s3330_s23 = scalar_lea.vmem %s65_s20, 32768  ;;  %p3335_p7 = scmp.lt.s32.totalorder %s65_s20, %s65_s20 }
  0x30   :  { %p3331_p6 = scmp.ne.s32.totalorder %s65_s20, %s3330_s23  ;;  %p3336_p8 = scmp.lt.s32.totalorder %s3330_s23, %s3330_s23 }
  0x32   :  { %p3337_p9 = por %p3336_p8, %p3335_p7 }
  0x34   :  { %p3338_p10 = pnand %p3337_p9, %p3331_p6 }
  0x36   :  { %3341 = shalt.err (!%p3338_p10)
}
  0x37   :  { %70 = dma.hbm_to_vmem [thread:$0]  %s3756_s4, 32768, %s65_s20, [#allocation9], %s3393_s27, %s3393_s27, %s3394_s28  }
  0x38   :  { %s3399_s25 = smov [#allocation11]  }
  0x39   :  { %s79_s26 = sshll.u32 %s3399_s25, 4  ;;  %s80_s26 = int_to_ptr.vmem [resolvable:$true] %s79_s26 }
  0x3a   :  { %s3350_s29 = scalar_lea.vmem %s80_s26, 128  ;;  %p3355_p12 = scmp.lt.s32.totalorder %s80_s26, %s80_s26 }
  0x3b   :  { %p3351_p11 = scmp.ne.s32.totalorder %s80_s26, %s3350_s29  ;;  %p3356_p13 = scmp.lt.s32.totalorder %s3350_s29, %s3350_s29 }
  0x3d   :  { %p3357_p0 = por %p3356_p13, %p3355_p12 }
  0x3f   :  { %p3358_p1 = pnand %p3357_p0, %p3351_p11 }
  0x41   :  { %3361 = shalt.err (!%p3358_p1)
}
  0x42   :  { %82 = dma.hbm_to_vmem [thread:$0]  %s3758_s6, 128, %s80_s26, [#allocation12]  }
  0x43   :  { %3382 = dma.done.wait [#allocation3], 1024  }
  0x44   :  { %3383 = vsyncadd [#allocation3], 4294966272 }
  0x45   :  { %3384 = dma.done.wait [#allocation6], 32896  }
  0x46   :  { %3385 = vsyncadd [#allocation6], 4294934400 }
  0x47   :  { %3386 = dma.done.wait [#allocation9], 32896  }
  0x48   :  { %3387 = vsyncadd [#allocation9], 4294934400 }
  0x49   :  { %3388 = dma.done.wait [#allocation12], 128  }
  0x4a   :  { %3389 = vsyncadd [#allocation12], 4294967168  ;;  %v142_v0 = vld [vmem:[#allocation5 + $0xc8] sm:$0xff]  ;;  %v141_v2 = vld [vmem:[#allocation5 + $0xc0] sm:$0xff] }
  0x4b   :  { %v206_v1 = vld [vmem:[#allocation5 + $0x2c8] sm:$0xff]  ;;  %v422_v3 = vunpack.c.l.s8.bf16 %v142_v0  ;;  %v430_v4 = vunpack.c.h.s8.bf16 %v142_v0  ;;  %v205_v7 = vld [vmem:[#allocation5 + $0x2c0] sm:$0xff]  ;;  %v429_v8 = vunpack.c.h.s8.bf16 %v141_v2  ;;  %v421_v12 = vunpack.c.l.s8.bf16 %v141_v2  ;;  %v104_v31 = vld [vmem:[#allocation2 + $0x18] sm:$0xff] }
  0x4c   :  { %v550_v5 = vunpack.c.l.s8.bf16 %v206_v1  ;;  %v558_v6 = vunpack.c.h.s8.bf16 %v206_v1  ;;  %v557_v9 = vunpack.c.h.s8.bf16 %v205_v7  ;;  %v134_v10 = vld [vmem:[#allocation5 + $0x88] sm:$0xff]  ;;  %v549_v13 = vunpack.c.l.s8.bf16 %v205_v7  ;;  %v133_v16 = vld [vmem:[#allocation5 + $0x80] sm:$0xff] }
  0x4d   :  { %v198_v11 = vld [vmem:[#allocation5 + $0x288] sm:$0xff]  ;;  %885 = vmatprep.subr.bf16.mxu0 %v430_v4  ;;  %v414_v14 = vunpack.c.h.s8.bf16 %v134_v10  ;;  %v197_v17 = vld [vmem:[#allocation5 + $0x280] sm:$0xff]  ;;  %v413_v18 = vunpack.c.h.s8.bf16 %v133_v16  ;;  %v406_v20 = vunpack.c.l.s8.bf16 %v134_v10  ;;  %v405_v24 = vunpack.c.l.s8.bf16 %v133_v16 }
  0x4e   :  { %926 = vmatprep.subr.bf16.mxu1 %v558_v6  ;;  %886 = vmatpush1.bf16.msra.mxu0 %v429_v8  ;;  %v542_v15 = vunpack.c.h.s8.bf16 %v198_v11  ;;  %v541_v19 = vunpack.c.h.s8.bf16 %v197_v17  ;;  %v534_v21 = vunpack.c.l.s8.bf16 %v198_v11  ;;  %v126_v22 = vld [vmem:[#allocation5 + $0x48] sm:$0xff]  ;;  %v533_v25 = vunpack.c.l.s8.bf16 %v197_v17  ;;  %v125_v28 = vld [vmem:[#allocation5 + $0x40] sm:$0xff] }
  0x4f   :  { %927 = vmatpush1.bf16.msra.mxu1 %v557_v9  ;;  %887 = vmatprep.subr.bf16.mxu0 %v422_v3  ;;  %v190_v23 = vld [vmem:[#allocation5 + $0x248] sm:$0xff]  ;;  %v398_v26 = vunpack.c.h.s8.bf16 %v126_v22  ;;  %v189_v29 = vld [vmem:[#allocation5 + $0x240] sm:$0xff]  ;;  %v397_v32 = vunpack.c.h.s8.bf16 %v125_v28  ;;  %v390_v34 = vunpack.c.l.s8.bf16 %v126_v22  ;;  %v3467_v37 = vpack.c.bf16 %v104_v31, %v104_v31 }
  0x50   :  { %928 = vmatprep.subr.bf16.mxu1 %v550_v5  ;;  %v526_v27 = vunpack.c.h.s8.bf16 %v190_v23  ;;  %v102_v30 = vld [vmem:[#allocation2 + $0x8] sm:$0xff]  ;;  %v525_v33 = vunpack.c.h.s8.bf16 %v189_v29  ;;  %v518_v35 = vunpack.c.l.s8.bf16 %v190_v23  ;;  %v389_v40 = vunpack.c.l.s8.bf16 %v125_v28  ;;  %v117_v44 = vld [vmem:[#allocation5] sm:$0xff] }
  0x51   :  { %v3465_v36 = vpack.c.bf16 %v102_v30, %v102_v30  ;;  %v118_v38 = vld [vmem:[#allocation5 + $0x8] sm:$0xff]  ;;  %958 = vmatprep.mubr.bf16.mxu1 %v3467_v37  ;;  %v517_v41 = vunpack.c.l.s8.bf16 %v189_v29  ;;  %v181_v45 = vld [vmem:[#allocation5 + $0x200] sm:$0xff]  ;;  %v381_v46 = vunpack.c.h.s8.bf16 %v117_v44  ;;  %v373_v52 = vunpack.c.l.s8.bf16 %v117_v44 }
  0x52   :  { %888 = vmatpush1.bf16.msra.mxu0 %v421_v12  ;;  %v182_v39 = vld [vmem:[#allocation5 + $0x208] sm:$0xff]  ;;  %v382_v42 = vunpack.c.h.s8.bf16 %v118_v38  ;;  %v509_v47 = vunpack.c.h.s8.bf16 %v181_v45  ;;  %v374_v48 = vunpack.c.l.s8.bf16 %v118_v38  ;;  %v501_v53 = vunpack.c.l.s8.bf16 %v181_v45  ;;  %v173_v56 = vld [vmem:[#allocation5 + $0x1c0] sm:$0xff] }
  0x53   :  { %929 = vmatpush1.bf16.msra.mxu1 %v549_v13  ;;  %889 = vmatprep.subr.bf16.mxu0 %v414_v14  ;;  %v510_v43 = vunpack.c.h.s8.bf16 %v182_v39  ;;  %v502_v49 = vunpack.c.l.s8.bf16 %v182_v39  ;;  %v174_v50 = vld [vmem:[#allocation5 + $0x1c8] sm:$0xff]  ;;  %v237_v57 = vld [vmem:[#allocation5 + $0x3c0] sm:$0xff]  ;;  %v493_v58 = vunpack.c.h.s8.bf16 %v173_v56  ;;  %v485_v0 = vunpack.c.l.s8.bf16 %v173_v56 }
  0x54   :  { %930 = vmatprep.subr.bf16.mxu1 %v542_v15  ;;  %917 = vmatprep.mubr.bf16.mxu0 %v3465_v36  ;;  %v238_v51 = vld [vmem:[#allocation5 + $0x3c8] sm:$0xff]  ;;  %v494_v54 = vunpack.c.h.s8.bf16 %v174_v50  ;;  %v621_v59 = vunpack.c.h.s8.bf16 %v237_v57  ;;  %v486_v60 = vunpack.c.l.s8.bf16 %v174_v50  ;;  %v613_v1 = vunpack.c.l.s8.bf16 %v237_v57  ;;  %v165_v4 = vld [vmem:[#allocation5 + $0x180] sm:$0xff] }
  0x55   :  { %v622_v55 = vunpack.c.h.s8.bf16 %v238_v51  ;;  %v614_v61 = vunpack.c.l.s8.bf16 %v238_v51  ;;  %v166_v62 = vld [vmem:[#allocation5 + $0x188] sm:$0xff]  ;;  %v229_v5 = vld [vmem:[#allocation5 + $0x380] sm:$0xff]  ;;  %v477_v6 = vunpack.c.h.s8.bf16 %v165_v4  ;;  %v469_v12 = vunpack.c.l.s8.bf16 %v165_v4 }
  0x56   :  { %890 = vmatpush1.bf16.msra.mxu0 %v413_v18  ;;  %v230_v63 = vld [vmem:[#allocation5 + $0x388] sm:$0xff]  ;;  %v478_v2 = vunpack.c.h.s8.bf16 %v166_v62  ;;  %v605_v7 = vunpack.c.h.s8.bf16 %v229_v5  ;;  %v470_v8 = vunpack.c.l.s8.bf16 %v166_v62  ;;  %v597_v13 = vunpack.c.l.s8.bf16 %v229_v5  ;;  %v157_v16 = vld [vmem:[#allocation5 + $0x140] sm:$0xff] }
  0x57   :  { %931 = vmatpush1.bf16.msra.mxu1 %v541_v19  ;;  %891 = vmatprep.subr.bf16.mxu0 %v406_v20  ;;  %v606_v3 = vunpack.c.h.s8.bf16 %v230_v63  ;;  %v598_v9 = vunpack.c.l.s8.bf16 %v230_v63  ;;  %v158_v10 = vld [vmem:[#allocation5 + $0x148] sm:$0xff]  ;;  %v221_v17 = vld [vmem:[#allocation5 + $0x340] sm:$0xff]  ;;  %v461_v18 = vunpack.c.h.s8.bf16 %v157_v16 }
  0x58   :  { %932 = vmatprep.subr.bf16.mxu1 %v534_v21  ;;  %v222_v11 = vld [vmem:[#allocation5 + $0x348] sm:$0xff]  ;;  %v462_v14 = vunpack.c.h.s8.bf16 %v158_v10  ;;  %v589_v19 = vunpack.c.h.s8.bf16 %v221_v17  ;;  %v454_v20 = vunpack.c.l.s8.bf16 %v158_v10  ;;  %v149_v28 = vld [vmem:[#allocation5 + $0x100] sm:$0xff] }
  0x59   :  { %v590_v15 = vunpack.c.h.s8.bf16 %v222_v11  ;;  %v582_v21 = vunpack.c.l.s8.bf16 %v222_v11  ;;  %v150_v22 = vld [vmem:[#allocation5 + $0x108] sm:$0xff]  ;;  %v213_v29 = vld [vmem:[#allocation5 + $0x300] sm:$0xff]  ;;  %v445_v30 = vunpack.c.h.s8.bf16 %v149_v28  ;;  %v437_v38 = vunpack.c.l.s8.bf16 %v149_v28 }
  0x5a   :  { %892 = vmatpush1.bf16.msra.mxu0 %v405_v24  ;;  %v214_v23 = vld [vmem:[#allocation5 + $0x308] sm:$0xff]  ;;  %v453_v24 = vunpack.c.l.s8.bf16 %v157_v16  ;;  %v573_v31 = vunpack.c.h.s8.bf16 %v213_v29  ;;  %v565_v39 = vunpack.c.l.s8.bf16 %v213_v29  ;;  %v269_v44 = vld [vmem:[#allocation5 + $0x4c0] sm:$0xff] }
  0x5b   :  { %933 = vmatpush1.bf16.msra.mxu1 %v533_v25  ;;  %893 = vmatprep.subr.bf16.mxu0 %v398_v26  ;;  %v581_v25 = vunpack.c.l.s8.bf16 %v221_v17  ;;  %v446_v26 = vunpack.c.h.s8.bf16 %v150_v22  ;;  %v333_v45 = vld [vmem:[#allocation5 + $0x6c0] sm:$0xff]  ;;  %v685_v50 = vunpack.c.h.s8.bf16 %v269_v44  ;;  %v254_v4 = vld [vmem:[#allocation5 + $0x448] sm:$0xff] }
  0x5c   :  { %934 = vmatprep.subr.bf16.mxu1 %v526_v27  ;;  %v574_v27 = vunpack.c.h.s8.bf16 %v214_v23  ;;  %v813_v51 = vunpack.c.h.s8.bf16 %v333_v45  ;;  %v261_v62 = vld [vmem:[#allocation5 + $0x480] sm:$0xff]  ;;  %v318_v5 = vld [vmem:[#allocation5 + $0x648] sm:$0xff] }
  0x5d   :  { %v325_v63 = vld [vmem:[#allocation5 + $0x680] sm:$0xff]  ;;  %v246_v16 = vld [vmem:[#allocation5 + $0x408] sm:$0xff] }
  0x5e   :  { %894 = vmatpush1.bf16.msra.mxu0 %v397_v32  ;;  %v438_v32 = vunpack.c.l.s8.bf16 %v150_v22  ;;  %v253_v10 = vld [vmem:[#allocation5 + $0x440] sm:$0xff]  ;;  %v310_v17 = vld [vmem:[#allocation5 + $0x608] sm:$0xff] }
  0x5f   :  { %935 = vmatpush1.bf16.msra.mxu1 %v525_v33  ;;  %895 = vmatprep.subr.bf16.mxu0 %v390_v34  ;;  %v566_v33 = vunpack.c.l.s8.bf16 %v214_v23  ;;  %v270_v34 = vld [vmem:[#allocation5 + $0x4c8] sm:$0xff]  ;;  %v317_v11 = vld [vmem:[#allocation5 + $0x640] sm:$0xff] }
  0x60   :  { %936 = vmatprep.subr.bf16.mxu1 %v518_v35  ;;  %v334_v35 = vld [vmem:[#allocation5 + $0x6c8] sm:$0xff]  ;;  %v245_v22 = vld [vmem:[#allocation5 + $0x400] sm:$0xff] }
  0x61   :  { %v309_v23 = vld [vmem:[#allocation5 + $0x600] sm:$0xff]  ;;  %v302_v28 = vld [vmem:[#allocation5 + $0x5c8] sm:$0xff] }
  0x62   :  { %896 = vmatpush1.bf16.msra.mxu0 %v389_v40  ;;  %v101_v40 = vld [vmem:[#allocation2] sm:$0xff]  ;;  %v366_v29 = vld [vmem:[#allocation5 + $0x7c8] sm:$0xff] }
  0x63   :  { %937 = vmatpush1.bf16.msra.mxu1 %v517_v41  ;;  %897 = vmatprep.subr.bf16.mxu0 %v382_v42  ;;  %v103_v41 = vld [vmem:[#allocation2 + $0x10] sm:$0xff]  ;;  %v686_v42 = vunpack.c.h.s8.bf16 %v270_v34 }
  0x64   :  { %938 = vmatprep.subr.bf16.mxu1 %v510_v43  ;;  %v814_v43 = vunpack.c.h.s8.bf16 %v334_v35 }
  0x66   :  { %898 = vmatpush1.bf16.msra.mxu0 %v381_v46  ;;  %v3471_v46 = vpack.c.bf16 %v101_v40, %v101_v40  ;;  %v742_v40 = vunpack.c.l.s8.bf16 %v302_v28 }
  0x67   :  { %939 = vmatpush1.bf16.msra.mxu1 %v509_v47  ;;  %899 = vmatprep.subr.bf16.mxu0 %v374_v48  ;;  %v3473_v47 = vpack.c.bf16 %v103_v41, %v103_v41  ;;  %v106_v48 = vld [vmem:[#allocation2 + $0x28] sm:$0xff]  ;;  %v870_v41 = vunpack.c.l.s8.bf16 %v366_v29 }
  0x68   :  { %940 = vmatprep.subr.bf16.mxu1 %v502_v49  ;;  %v108_v49 = vld [vmem:[#allocation2 + $0x38] sm:$0xff]  ;;  %v3475_v56 = vpack.c.bf16 %v106_v48, %v106_v48 }
  0x69   :  { %v3477_v57 = vpack.c.bf16 %v108_v49, %v108_v49 }
  0x6a   :  { %900 = vmatpush1.bf16.msra.mxu0 %v373_v52  ;;  %v678_v52 = vunpack.c.l.s8.bf16 %v270_v34  ;;  %v301_v34 = vld [vmem:[#allocation5 + $0x5c0] sm:$0xff] }
  0x6b   :  { %941 = vmatpush1.bf16.msra.mxu1 %v501_v53  ;;  %901 = vmatprep.subr.bf16.mxu0 %v494_v54  ;;  %v806_v53 = vunpack.c.l.s8.bf16 %v334_v35  ;;  %v262_v54 = vld [vmem:[#allocation5 + $0x488] sm:$0xff]  ;;  %v365_v35 = vld [vmem:[#allocation5 + $0x7c0] sm:$0xff] }
  0x6c   :  { %942 = vmatprep.subr.bf16.mxu1 %v622_v55  ;;  %v326_v55 = vld [vmem:[#allocation5 + $0x688] sm:$0xff] }
  0x6e   :  { %902 = vmatpush2.bf16.msra.mxu0 %v493_v58  ;;  %v677_v58 = vunpack.c.l.s8.bf16 %v269_v44  ;;  %v741_v44 = vunpack.c.l.s8.bf16 %v301_v34 }
  0x6f   :  { %943 = vmatpush2.bf16.msra.mxu1 %v621_v59  ;;  %903 = vmatprep.subr.bf16.mxu0 %v486_v60  ;;  %v805_v59 = vunpack.c.l.s8.bf16 %v333_v45  ;;  %v670_v60 = vunpack.c.h.s8.bf16 %v262_v54  ;;  %v869_v45 = vunpack.c.l.s8.bf16 %v365_v35 }
  0x70   :  { %944 = vmatprep.subr.bf16.mxu1 %v614_v61  ;;  %v798_v61 = vunpack.c.h.s8.bf16 %v326_v55 }
  0x72   :  { %904 = vmatpush2.bf16.msra.mxu0 %v485_v0  ;;  %v669_v0 = vunpack.c.h.s8.bf16 %v261_v62 }
  0x73   :  { %945 = vmatpush2.bf16.msra.mxu1 %v613_v1  ;;  %905 = vmatprep.subr.bf16.mxu0 %v478_v2  ;;  %v797_v1 = vunpack.c.h.s8.bf16 %v325_v63  ;;  %v662_v2 = vunpack.c.l.s8.bf16 %v262_v54 }
  0x74   :  { %946 = vmatprep.subr.bf16.mxu1 %v606_v3  ;;  %v790_v3 = vunpack.c.l.s8.bf16 %v326_v55 }
  0x76   :  { %906 = vmatpush2.bf16.msra.mxu0 %v477_v6  ;;  %v661_v6 = vunpack.c.l.s8.bf16 %v261_v62 }
  0x77   :  { %947 = vmatpush2.bf16.msra.mxu1 %v605_v7  ;;  %907 = vmatprep.subr.bf16.mxu0 %v470_v8  ;;  %v789_v7 = vunpack.c.l.s8.bf16 %v325_v63  ;;  %v654_v8 = vunpack.c.h.s8.bf16 %v254_v4 }
  0x78   :  { %948 = vmatprep.subr.bf16.mxu1 %v598_v9  ;;  %v782_v9 = vunpack.c.h.s8.bf16 %v318_v5 }
  0x7a   :  { %908 = vmatpush2.bf16.msra.mxu0 %v469_v12  ;;  %v653_v12 = vunpack.c.h.s8.bf16 %v253_v10 }
  0x7b   :  { %949 = vmatpush2.bf16.msra.mxu1 %v597_v13  ;;  %909 = vmatprep.subr.bf16.mxu0 %v462_v14  ;;  %v781_v13 = vunpack.c.h.s8.bf16 %v317_v11  ;;  %v646_v14 = vunpack.c.l.s8.bf16 %v254_v4 }
  0x7c   :  { %950 = vmatprep.subr.bf16.mxu1 %v590_v15  ;;  %v774_v15 = vunpack.c.l.s8.bf16 %v318_v5 }
  0x7e   :  { %910 = vmatpush2.bf16.msra.mxu0 %v461_v18  ;;  %v645_v18 = vunpack.c.l.s8.bf16 %v253_v10 }
  0x7f   :  { %951 = vmatpush2.bf16.msra.mxu1 %v589_v19  ;;  %911 = vmatprep.subr.bf16.mxu0 %v454_v20  ;;  %v773_v19 = vunpack.c.l.s8.bf16 %v317_v11  ;;  %v638_v20 = vunpack.c.h.s8.bf16 %v246_v16 }
  0x80   :  { %952 = vmatprep.subr.bf16.mxu1 %v582_v21  ;;  %v766_v21 = vunpack.c.h.s8.bf16 %v310_v17 }
  0x82   :  { %912 = vmatpush2.bf16.msra.mxu0 %v453_v24  ;;  %v637_v24 = vunpack.c.h.s8.bf16 %v245_v22 }
  0x83   :  { %953 = vmatpush2.bf16.msra.mxu1 %v581_v25  ;;  %913 = vmatprep.subr.bf16.mxu0 %v446_v26  ;;  %v765_v25 = vunpack.c.h.s8.bf16 %v309_v23  ;;  %v630_v26 = vunpack.c.l.s8.bf16 %v246_v16 }
  0x84   :  { %954 = vmatprep.subr.bf16.mxu1 %v574_v27  ;;  %v758_v27 = vunpack.c.l.s8.bf16 %v310_v17 }
  0x86   :  { %914 = vmatpush2.bf16.msra.mxu0 %v445_v30  ;;  %v629_v30 = vunpack.c.l.s8.bf16 %v245_v22  ;;  %v105_v22 = vld [vmem:[#allocation2 + $0x20] sm:$0xff] }
  0x87   :  { %955 = vmatpush2.bf16.msra.mxu1 %v573_v31  ;;  %915 = vmatprep.subr.bf16.mxu0 %v438_v32  ;;  %v757_v31 = vunpack.c.l.s8.bf16 %v309_v23  ;;  %v750_v32 = vunpack.c.h.s8.bf16 %v302_v28  ;;  %v107_v23 = vld [vmem:[#allocation2 + $0x30] sm:$0xff]  ;;  %v3483_v28 = vpack.c.bf16 %v105_v22, %v105_v22 }
  0x88   :  { %956 = vmatprep.subr.bf16.mxu1 %v566_v33  ;;  %v878_v33 = vunpack.c.h.s8.bf16 %v366_v29  ;;  %v3485_v29 = vpack.c.bf16 %v107_v23, %v107_v23 }
  0x8a   :  { %916 = vmatpush2.bf16.msra.mxu0 %v437_v38  ;;  %v749_v38 = vunpack.c.h.s8.bf16 %v301_v34  ;;  %v136_v34 = vld [vmem:[#allocation5 + $0x98] sm:$0xff] }
  0x8b   :  { %957 = vmatpush2.bf16.msra.mxu1 %v565_v39  ;;  %967 = vmatprep.subr.bf16.mxu0 %v686_v42  ;;  %v877_v39 = vunpack.c.h.s8.bf16 %v365_v35  ;;  %v294_v42 = vld [vmem:[#allocation5 + $0x588] sm:$0xff]  ;;  %v200_v35 = vld [vmem:[#allocation5 + $0x298] sm:$0xff] }
  0x8c   :  { %1008 = vmatprep.subr.bf16.mxu1 %v814_v43  ;;  %v358_v43 = vld [vmem:[#allocation5 + $0x788] sm:$0xff]  ;;  %v734_v48 = vunpack.c.h.s8.bf16 %v294_v42  ;;  %v726_v54 = vunpack.c.l.s8.bf16 %v294_v42  ;;  %v135_v42 = vld [vmem:[#allocation5 + $0x90] sm:$0xff] }
  0x8d   :  { %918 = vmatmul.mubr.bf16.vlgmr.msra.gmra.mxu0 %v3471_v46  ;;  %v862_v49 = vunpack.c.h.s8.bf16 %v358_v43  ;;  %v854_v55 = vunpack.c.l.s8.bf16 %v358_v43  ;;  %v199_v43 = vld [vmem:[#allocation5 + $0x290] sm:$0xff] }
  0x8e   :  { %959 = vmatmul.mubr.bf16.vlgmr.msra.gmra.mxu1 %v3473_v47  ;;  %968 = vmatpush1.bf16.msra.mxu0 %v685_v50  ;;  %v293_v50 = vld [vmem:[#allocation5 + $0x580] sm:$0xff] }
  0x8f   :  { %1009 = vmatpush1.bf16.msra.mxu1 %v813_v51  ;;  %969 = vmatprep.subr.bf16.mxu0 %v678_v52  ;;  %v357_v51 = vld [vmem:[#allocation5 + $0x780] sm:$0xff]  ;;  %v733_v52 = vunpack.c.h.s8.bf16 %v293_v50 }
  0x90   :  { %1010 = vmatprep.subr.bf16.mxu1 %v806_v53  ;;  %999 = vmatprep.mubr.bf16.mxu0 %v3475_v56  ;;  %v861_v53 = vunpack.c.h.s8.bf16 %v357_v51 }
  0x91   :  { %1040 = vmatprep.mubr.bf16.mxu1 %v3477_v57 }
  0x92   :  { %970 = vmatpush1.bf16.msra.mxu0 %v677_v58  ;;  %v286_v58 = vld [vmem:[#allocation5 + $0x548] sm:$0xff] }
  0x93   :  { %1011 = vmatpush1.bf16.msra.mxu1 %v805_v59  ;;  %971 = vmatprep.subr.bf16.mxu0 %v670_v60  ;;  %v350_v59 = vld [vmem:[#allocation5 + $0x748] sm:$0xff]  ;;  %v725_v60 = vunpack.c.l.s8.bf16 %v293_v50  ;;  %v718_v62 = vunpack.c.h.s8.bf16 %v286_v58  ;;  %v710_v4 = vunpack.c.l.s8.bf16 %v286_v58  ;;  %v128_v50 = vld [vmem:[#allocation5 + $0x58] sm:$0xff]  ;;  %v127_v58 = vld [vmem:[#allocation5 + $0x50] sm:$0xff] }
  0x94   :  { %1012 = vmatprep.subr.bf16.mxu1 %v798_v61  ;;  %v853_v61 = vunpack.c.l.s8.bf16 %v357_v51  ;;  %v846_v63 = vunpack.c.h.s8.bf16 %v350_v59  ;;  %v838_v5 = vunpack.c.l.s8.bf16 %v350_v59  ;;  %v192_v51 = vld [vmem:[#allocation5 + $0x258] sm:$0xff]  ;;  %v191_v59 = vld [vmem:[#allocation5 + $0x250] sm:$0xff] }
  0x96   :  { %972 = vmatpush1.bf16.msra.mxu0 %v669_v0  ;;  %v285_v0 = vld [vmem:[#allocation5 + $0x540] sm:$0xff] }
  0x97   :  { %1013 = vmatpush1.bf16.msra.mxu1 %v797_v1  ;;  %973 = vmatprep.subr.bf16.mxu0 %v662_v2  ;;  %v349_v1 = vld [vmem:[#allocation5 + $0x740] sm:$0xff]  ;;  %v717_v2 = vunpack.c.h.s8.bf16 %v285_v0 }
  0x98   :  { %1014 = vmatprep.subr.bf16.mxu1 %v790_v3  ;;  %v845_v3 = vunpack.c.h.s8.bf16 %v349_v1 }
  0x9a   :  { %974 = vmatpush1.bf16.msra.mxu0 %v661_v6  ;;  %v278_v6 = vld [vmem:[#allocation5 + $0x508] sm:$0xff] }
  0x9b   :  { %1015 = vmatpush1.bf16.msra.mxu1 %v789_v7  ;;  %975 = vmatprep.subr.bf16.mxu0 %v654_v8  ;;  %v342_v7 = vld [vmem:[#allocation5 + $0x708] sm:$0xff]  ;;  %v709_v8 = vunpack.c.l.s8.bf16 %v285_v0  ;;  %v702_v10 = vunpack.c.h.s8.bf16 %v278_v6  ;;  %v694_v16 = vunpack.c.l.s8.bf16 %v278_v6  ;;  %v120_v0 = vld [vmem:[#allocation5 + $0x18] sm:$0xff]  ;;  %v119_v6 = vld [vmem:[#allocation5 + $0x10] sm:$0xff] }
  0x9c   :  { %1016 = vmatprep.subr.bf16.mxu1 %v782_v9  ;;  %v837_v9 = vunpack.c.l.s8.bf16 %v349_v1  ;;  %v830_v11 = vunpack.c.h.s8.bf16 %v342_v7  ;;  %v822_v17 = vunpack.c.l.s8.bf16 %v342_v7  ;;  %v184_v1 = vld [vmem:[#allocation5 + $0x218] sm:$0xff]  ;;  %v183_v7 = vld [vmem:[#allocation5 + $0x210] sm:$0xff] }
  0x9e   :  { %976 = vmatpush1.bf16.msra.mxu0 %v653_v12  ;;  %v277_v12 = vld [vmem:[#allocation5 + $0x500] sm:$0xff] }
  0x9f   :  { %1017 = vmatpush1.bf16.msra.mxu1 %v781_v13  ;;  %977 = vmatprep.subr.bf16.mxu0 %v646_v14  ;;  %v341_v13 = vld [vmem:[#allocation5 + $0x700] sm:$0xff]  ;;  %v701_v14 = vunpack.c.h.s8.bf16 %v277_v12 }
  0xa0   :  { %1018 = vmatprep.subr.bf16.mxu1 %v774_v15  ;;  %v829_v15 = vunpack.c.h.s8.bf16 %v341_v13 }
  0xa2   :  { %978 = vmatpush1.bf16.msra.mxu0 %v645_v18  ;;  %v144_v18 = vld [vmem:[#allocation5 + $0xd8] sm:$0xff] }
  0xa3   :  { %1019 = vmatpush1.bf16.msra.mxu1 %v773_v19  ;;  %979 = vmatprep.subr.bf16.mxu0 %v638_v20  ;;  %v208_v19 = vld [vmem:[#allocation5 + $0x2d8] sm:$0xff]  ;;  %v693_v20 = vunpack.c.l.s8.bf16 %v277_v12 }
  0xa4   :  { %1020 = vmatprep.subr.bf16.mxu1 %v766_v21  ;;  %v821_v21 = vunpack.c.l.s8.bf16 %v341_v13  ;;  %v176_v12 = vld [vmem:[#allocation5 + $0x1d8] sm:$0xff] }
  0xa5   :  { %v240_v13 = vld [vmem:[#allocation5 + $0x3d8] sm:$0xff]  ;;  %v488_v22 = vunpack.c.l.s8.bf16 %v176_v12 }
  0xa6   :  { %980 = vmatpush1.bf16.msra.mxu0 %v637_v24  ;;  %v432_v24 = vunpack.c.h.s8.bf16 %v144_v18  ;;  %v616_v23 = vunpack.c.l.s8.bf16 %v240_v13 }
  0xa7   :  { %1021 = vmatpush1.bf16.msra.mxu1 %v765_v25  ;;  %981 = vmatprep.subr.bf16.mxu0 %v630_v26  ;;  %v560_v25 = vunpack.c.h.s8.bf16 %v208_v19  ;;  %v143_v26 = vld [vmem:[#allocation5 + $0xd0] sm:$0xff] }
  0xa8   :  { %1022 = vmatprep.subr.bf16.mxu1 %v758_v27  ;;  %v207_v27 = vld [vmem:[#allocation5 + $0x2d0] sm:$0xff] }
  0xaa   :  { %982 = vmatpush1.bf16.msra.mxu0 %v629_v30  ;;  %v431_v30 = vunpack.c.h.s8.bf16 %v143_v26 }
  0xab   :  { %1023 = vmatpush1.bf16.msra.mxu1 %v757_v31  ;;  %983 = vmatprep.subr.bf16.mxu0 %v750_v32  ;;  %v559_v31 = vunpack.c.h.s8.bf16 %v207_v27  ;;  %v424_v32 = vunpack.c.l.s8.bf16 %v144_v18  ;;  %v175_v18 = vld [vmem:[#allocation5 + $0x1d0] sm:$0xff] }
  0xac   :  { %1024 = vmatprep.subr.bf16.mxu1 %v878_v33  ;;  %v552_v33 = vunpack.c.l.s8.bf16 %v208_v19  ;;  %v239_v19 = vld [vmem:[#allocation5 + $0x3d0] sm:$0xff] }
  0xae   :  { %984 = vmatpush2.bf16.msra.mxu0 %v749_v38  ;;  %v423_v38 = vunpack.c.l.s8.bf16 %v143_v26  ;;  %v487_v26 = vunpack.c.l.s8.bf16 %v175_v18 }
  0xaf   :  { %1025 = vmatpush2.bf16.msra.mxu1 %v877_v39  ;;  %985 = vmatprep.subr.bf16.mxu0 %v742_v40  ;;  %v551_v39 = vunpack.c.l.s8.bf16 %v207_v27  ;;  %v416_v40 = vunpack.c.h.s8.bf16 %v136_v34  ;;  %v615_v27 = vunpack.c.l.s8.bf16 %v239_v19 }
  0xb0   :  { %1026 = vmatprep.subr.bf16.mxu1 %v870_v41  ;;  %v544_v41 = vunpack.c.h.s8.bf16 %v200_v35 }
  0xb2   :  { %986 = vmatpush2.bf16.msra.mxu0 %v741_v44  ;;  %v415_v44 = vunpack.c.h.s8.bf16 %v135_v42 }
  0xb3   :  { %1027 = vmatpush2.bf16.msra.mxu1 %v869_v45  ;;  %987 = vmatprep.subr.bf16.mxu0 %v734_v48  ;;  %v543_v45 = vunpack.c.h.s8.bf16 %v199_v43  ;;  %v408_v48 = vunpack.c.l.s8.bf16 %v136_v34 }
  0xb4   :  { %1028 = vmatprep.subr.bf16.mxu1 %v862_v49  ;;  %v536_v49 = vunpack.c.l.s8.bf16 %v200_v35 }
  0xb6   :  { %988 = vmatpush2.bf16.msra.mxu0 %v733_v52  ;;  %v407_v52 = vunpack.c.l.s8.bf16 %v135_v42 }
  0xb7   :  { %1029 = vmatpush2.bf16.msra.mxu1 %v861_v53  ;;  %989 = vmatprep.subr.bf16.mxu0 %v726_v54  ;;  %v535_v53 = vunpack.c.l.s8.bf16 %v199_v43  ;;  %v400_v54 = vunpack.c.h.s8.bf16 %v128_v50 }
  0xb8   :  { %1030 = vmatprep.subr.bf16.mxu1 %v854_v55  ;;  %v528_v55 = vunpack.c.h.s8.bf16 %v192_v51 }
  0xba   :  { %990 = vmatpush2.bf16.msra.mxu0 %v725_v60  ;;  %v399_v60 = vunpack.c.h.s8.bf16 %v127_v58 }
  0xbb   :  { %1031 = vmatpush2.bf16.msra.mxu1 %v853_v61  ;;  %991 = vmatprep.subr.bf16.mxu0 %v718_v62  ;;  %v527_v61 = vunpack.c.h.s8.bf16 %v191_v59  ;;  %v392_v62 = vunpack.c.l.s8.bf16 %v128_v50 }
  0xbc   :  { %1032 = vmatprep.subr.bf16.mxu1 %v846_v63  ;;  %v520_v63 = vunpack.c.l.s8.bf16 %v192_v51 }
  0xbe   :  { %992 = vmatpush2.bf16.msra.mxu0 %v717_v2  ;;  %v391_v2 = vunpack.c.l.s8.bf16 %v127_v58 }
  0xbf   :  { %1033 = vmatpush2.bf16.msra.mxu1 %v845_v3  ;;  %993 = vmatprep.subr.bf16.mxu0 %v710_v4  ;;  %v519_v3 = vunpack.c.l.s8.bf16 %v191_v59  ;;  %v384_v4 = vunpack.c.h.s8.bf16 %v120_v0 }
  0xc0   :  { %1034 = vmatprep.subr.bf16.mxu1 %v838_v5  ;;  %v512_v5 = vunpack.c.h.s8.bf16 %v184_v1 }
  0xc2   :  { %994 = vmatpush2.bf16.msra.mxu0 %v709_v8  ;;  %v383_v8 = vunpack.c.h.s8.bf16 %v119_v6 }
  0xc3   :  { %1035 = vmatpush2.bf16.msra.mxu1 %v837_v9  ;;  %995 = vmatprep.subr.bf16.mxu0 %v702_v10  ;;  %v511_v9 = vunpack.c.h.s8.bf16 %v183_v7  ;;  %v376_v10 = vunpack.c.l.s8.bf16 %v120_v0 }
  0xc4   :  { %1036 = vmatprep.subr.bf16.mxu1 %v830_v11  ;;  %v504_v11 = vunpack.c.l.s8.bf16 %v184_v1 }
  0xc6   :  { %996 = vmatpush2.bf16.msra.mxu0 %v701_v14  ;;  %v375_v14 = vunpack.c.l.s8.bf16 %v119_v6 }
  0xc7   :  { %1037 = vmatpush2.bf16.msra.mxu1 %v829_v15  ;;  %997 = vmatprep.subr.bf16.mxu0 %v694_v16  ;;  %v503_v15 = vunpack.c.l.s8.bf16 %v183_v7  ;;  %v496_v16 = vunpack.c.h.s8.bf16 %v176_v12 }
  0xc8   :  { %1038 = vmatprep.subr.bf16.mxu1 %v822_v17  ;;  %v624_v17 = vunpack.c.h.s8.bf16 %v240_v13 }
  0xca   :  { %998 = vmatpush2.bf16.msra.mxu0 %v693_v20  ;;  %v495_v20 = vunpack.c.h.s8.bf16 %v175_v18 }
  0xcb   :  { %1039 = vmatpush2.bf16.msra.mxu1 %v821_v21  ;;  %1049 = vmatprep.subr.bf16.mxu0 %v432_v24  ;;  %v623_v21 = vunpack.c.h.s8.bf16 %v239_v19  ;;  %v168_v24 = vld [vmem:[#allocation5 + $0x198] sm:$0xff] }
  0xcc   :  { %1090 = vmatprep.subr.bf16.mxu1 %v560_v25  ;;  %v232_v25 = vld [vmem:[#allocation5 + $0x398] sm:$0xff] }
  0xcd   :  { %1000 = vmatmul.mubr.bf16.vlgmr.msra.gmra.mxu0 %v3483_v28 }
  0xce   :  { %1041 = vmatmul.mubr.bf16.vlgmr.msra.gmra.mxu1 %v3485_v29  ;;  %1050 = vmatpush1.bf16.msra.mxu0 %v431_v30  ;;  %v480_v30 = vunpack.c.h.s8.bf16 %v168_v24 }
  0xcf   :  { %1091 = vmatpush1.bf16.msra.mxu1 %v559_v31  ;;  %1051 = vmatprep.subr.bf16.mxu0 %v424_v32  ;;  %v608_v31 = vunpack.c.h.s8.bf16 %v232_v25  ;;  %v167_v32 = vld [vmem:[#allocation5 + $0x190] sm:$0xff] }
  0xd0   :  { %1092 = vmatprep.subr.bf16.mxu1 %v552_v33  ;;  %1081 = vmatprep.mubr.bf16.mxu0 %v3465_v36  ;;  %v231_v33 = vld [vmem:[#allocation5 + $0x390] sm:$0xff]  ;;  %v479_v34 = vunpack.c.h.s8.bf16 %v167_v32  ;;  %v471_v42 = vunpack.c.l.s8.bf16 %v167_v32 }
  0xd1   :  { %1122 = vmatprep.mubr.bf16.mxu1 %v3467_v37  ;;  %v607_v35 = vunpack.c.h.s8.bf16 %v231_v33  ;;  %v599_v43 = vunpack.c.l.s8.bf16 %v231_v33 }
  0xd2   :  { %1052 = vmatpush1.bf16.msra.mxu0 %v423_v38  ;;  %v472_v38 = vunpack.c.l.s8.bf16 %v168_v24 }
  0xd3   :  { %1093 = vmatpush1.bf16.msra.mxu1 %v551_v39  ;;  %1053 = vmatprep.subr.bf16.mxu0 %v416_v40  ;;  %v600_v39 = vunpack.c.l.s8.bf16 %v232_v25  ;;  %v160_v40 = vld [vmem:[#allocation5 + $0x158] sm:$0xff] }
  0xd4   :  { %1094 = vmatprep.subr.bf16.mxu1 %v544_v41  ;;  %v224_v41 = vld [vmem:[#allocation5 + $0x358] sm:$0xff] }
  0xd6   :  { %1054 = vmatpush1.bf16.msra.mxu0 %v415_v44  ;;  %v464_v44 = vunpack.c.h.s8.bf16 %v160_v40 }
  0xd7   :  { %1095 = vmatpush1.bf16.msra.mxu1 %v543_v45  ;;  %1055 = vmatprep.subr.bf16.mxu0 %v408_v48  ;;  %v592_v45 = vunpack.c.h.s8.bf16 %v224_v41  ;;  %v159_v48 = vld [vmem:[#allocation5 + $0x150] sm:$0xff] }
  0xd8   :  { %1096 = vmatprep.subr.bf16.mxu1 %v536_v49  ;;  %v223_v49 = vld [vmem:[#allocation5 + $0x350] sm:$0xff]  ;;  %v463_v50 = vunpack.c.h.s8.bf16 %v159_v48  ;;  %v455_v58 = vunpack.c.l.s8.bf16 %v159_v48 }
  0xd9   :  { %v591_v51 = vunpack.c.h.s8.bf16 %v223_v49  ;;  %v583_v59 = vunpack.c.l.s8.bf16 %v223_v49 }
  0xda   :  { %1056 = vmatpush1.bf16.msra.mxu0 %v407_v52  ;;  %v456_v52 = vunpack.c.l.s8.bf16 %v160_v40 }
  0xdb   :  { %1097 = vmatpush1.bf16.msra.mxu1 %v535_v53  ;;  %1057 = vmatprep.subr.bf16.mxu0 %v400_v54  ;;  %v584_v53 = vunpack.c.l.s8.bf16 %v224_v41  ;;  %v152_v54 = vld [vmem:[#allocation5 + $0x118] sm:$0xff] }
  0xdc   :  { %1098 = vmatprep.subr.bf16.mxu1 %v528_v55  ;;  %v216_v55 = vld [vmem:[#allocation5 + $0x318] sm:$0xff] }
  0xde   :  { %1058 = vmatpush1.bf16.msra.mxu0 %v399_v60  ;;  %v448_v60 = vunpack.c.h.s8.bf16 %v152_v54 }
  0xdf   :  { %1099 = vmatpush1.bf16.msra.mxu1 %v527_v61  ;;  %1059 = vmatprep.subr.bf16.mxu0 %v392_v62  ;;  %v576_v61 = vunpack.c.h.s8.bf16 %v216_v55  ;;  %v151_v62 = vld [vmem:[#allocation5 + $0x110] sm:$0xff] }
  0xe0   :  { %1100 = vmatprep.subr.bf16.mxu1 %v520_v63  ;;  %v215_v63 = vld [vmem:[#allocation5 + $0x310] sm:$0xff]  ;;  %v447_v0 = vunpack.c.h.s8.bf16 %v151_v62  ;;  %v439_v6 = vunpack.c.l.s8.bf16 %v151_v62 }
  0xe1   :  { %v575_v1 = vunpack.c.h.s8.bf16 %v215_v63  ;;  %v567_v7 = vunpack.c.l.s8.bf16 %v215_v63 }
  0xe2   :  { %1060 = vmatpush1.bf16.msra.mxu0 %v391_v2  ;;  %v440_v2 = vunpack.c.l.s8.bf16 %v152_v54 }
  0xe3   :  { %1101 = vmatpush1.bf16.msra.mxu1 %v519_v3  ;;  %1061 = vmatprep.subr.bf16.mxu0 %v384_v4  ;;  %v568_v3 = vunpack.c.l.s8.bf16 %v216_v55  ;;  %v272_v4 = vld [vmem:[#allocation5 + $0x4d8] sm:$0xff] }
  0xe4   :  { %1102 = vmatprep.subr.bf16.mxu1 %v512_v5  ;;  %v336_v5 = vld [vmem:[#allocation5 + $0x6d8] sm:$0xff] }
  0xe6   :  { %1062 = vmatpush1.bf16.msra.mxu0 %v383_v8  ;;  %v688_v8 = vunpack.c.h.s8.bf16 %v272_v4 }
  0xe7   :  { %1103 = vmatpush1.bf16.msra.mxu1 %v511_v9  ;;  %1063 = vmatprep.subr.bf16.mxu0 %v376_v10  ;;  %v816_v9 = vunpack.c.h.s8.bf16 %v336_v5  ;;  %v271_v10 = vld [vmem:[#allocation5 + $0x4d0] sm:$0xff] }
  0xe8   :  { %1104 = vmatprep.subr.bf16.mxu1 %v504_v11  ;;  %v335_v11 = vld [vmem:[#allocation5 + $0x6d0] sm:$0xff]  ;;  %v687_v12 = vunpack.c.h.s8.bf16 %v271_v10  ;;  %v679_v18 = vunpack.c.l.s8.bf16 %v271_v10 }
  0xe9   :  { %v815_v13 = vunpack.c.h.s8.bf16 %v335_v11  ;;  %v807_v19 = vunpack.c.l.s8.bf16 %v335_v11 }
  0xea   :  { %1064 = vmatpush1.bf16.msra.mxu0 %v375_v14  ;;  %v680_v14 = vunpack.c.l.s8.bf16 %v272_v4 }
  0xeb   :  { %1105 = vmatpush1.bf16.msra.mxu1 %v503_v15  ;;  %1065 = vmatprep.subr.bf16.mxu0 %v496_v16  ;;  %v808_v15 = vunpack.c.l.s8.bf16 %v336_v5  ;;  %v264_v16 = vld [vmem:[#allocation5 + $0x498] sm:$0xff] }
  0xec   :  { %1106 = vmatprep.subr.bf16.mxu1 %v624_v17  ;;  %v328_v17 = vld [vmem:[#allocation5 + $0x698] sm:$0xff] }
  0xee   :  { %1066 = vmatpush2.bf16.msra.mxu0 %v495_v20  ;;  %v672_v20 = vunpack.c.h.s8.bf16 %v264_v16 }
  0xef   :  { %1107 = vmatpush2.bf16.msra.mxu1 %v623_v21  ;;  %1067 = vmatprep.subr.bf16.mxu0 %v488_v22  ;;  %v800_v21 = vunpack.c.h.s8.bf16 %v328_v17  ;;  %v263_v22 = vld [vmem:[#allocation5 + $0x490] sm:$0xff] }
  0xf0   :  { %1108 = vmatprep.subr.bf16.mxu1 %v616_v23  ;;  %v327_v23 = vld [vmem:[#allocation5 + $0x690] sm:$0xff]  ;;  %v671_v24 = vunpack.c.h.s8.bf16 %v263_v22  ;;  %v663_v32 = vunpack.c.l.s8.bf16 %v263_v22 }
  0xf1   :  { %v799_v25 = vunpack.c.h.s8.bf16 %v327_v23  ;;  %v791_v33 = vunpack.c.l.s8.bf16 %v327_v23 }
  0xf2   :  { %1068 = vmatpush2.bf16.msra.mxu0 %v487_v26  ;;  %v664_v26 = vunpack.c.l.s8.bf16 %v264_v16 }
  0xf3   :  { %1109 = vmatpush2.bf16.msra.mxu1 %v615_v27  ;;  %1069 = vmatprep.subr.bf16.mxu0 %v480_v30  ;;  %v792_v27 = vunpack.c.l.s8.bf16 %v328_v17  ;;  %v256_v30 = vld [vmem:[#allocation5 + $0x458] sm:$0xff] }
  0xf4   :  { %1110 = vmatprep.subr.bf16.mxu1 %v608_v31  ;;  %v320_v31 = vld [vmem:[#allocation5 + $0x658] sm:$0xff] }
  0xf6   :  { %1070 = vmatpush2.bf16.msra.mxu0 %v479_v34  ;;  %v656_v34 = vunpack.c.h.s8.bf16 %v256_v30 }
  0xf7   :  { %1111 = vmatpush2.bf16.msra.mxu1 %v607_v35  ;;  %1071 = vmatprep.subr.bf16.mxu0 %v472_v38  ;;  %v784_v35 = vunpack.c.h.s8.bf16 %v320_v31  ;;  %v255_v38 = vld [vmem:[#allocation5 + $0x450] sm:$0xff] }
  0xf8   :  { %1112 = vmatprep.subr.bf16.mxu1 %v600_v39  ;;  %v319_v39 = vld [vmem:[#allocation5 + $0x650] sm:$0xff]  ;;  %v655_v40 = vunpack.c.h.s8.bf16 %v255_v38  ;;  %v647_v48 = vunpack.c.l.s8.bf16 %v255_v38 }
  0xf9   :  { %v783_v41 = vunpack.c.h.s8.bf16 %v319_v39  ;;  %v775_v49 = vunpack.c.l.s8.bf16 %v319_v39 }
  0xfa   :  { %1072 = vmatpush2.bf16.msra.mxu0 %v471_v42  ;;  %v648_v42 = vunpack.c.l.s8.bf16 %v256_v30 }
  0xfb   :  { %1113 = vmatpush2.bf16.msra.mxu1 %v599_v43  ;;  %1073 = vmatprep.subr.bf16.mxu0 %v464_v44  ;;  %v776_v43 = vunpack.c.l.s8.bf16 %v320_v31  ;;  %v248_v44 = vld [vmem:[#allocation5 + $0x418] sm:$0xff] }
  0xfc   :  { %1114 = vmatprep.subr.bf16.mxu1 %v592_v45  ;;  %v312_v45 = vld [vmem:[#allocation5 + $0x618] sm:$0xff] }
  0xfe   :  { %1074 = vmatpush2.bf16.msra.mxu0 %v463_v50  ;;  %v640_v50 = vunpack.c.h.s8.bf16 %v248_v44 }
  0xff   :  { %1115 = vmatpush2.bf16.msra.mxu1 %v591_v51  ;;  %1075 = vmatprep.subr.bf16.mxu0 %v456_v52  ;;  %v768_v51 = vunpack.c.h.s8.bf16 %v312_v45  ;;  %v247_v52 = vld [vmem:[#allocation5 + $0x410] sm:$0xff] }
 0x100   :  { %1116 = vmatprep.subr.bf16.mxu1 %v584_v53  ;;  %v311_v53 = vld [vmem:[#allocation5 + $0x610] sm:$0xff]  ;;  %v639_v54 = vunpack.c.h.s8.bf16 %v247_v52  ;;  %v631_v62 = vunpack.c.l.s8.bf16 %v247_v52 }
 0x101   :  { %v767_v55 = vunpack.c.h.s8.bf16 %v311_v53  ;;  %v759_v63 = vunpack.c.l.s8.bf16 %v311_v53 }
 0x102   :  { %1076 = vmatpush2.bf16.msra.mxu0 %v455_v58  ;;  %v632_v58 = vunpack.c.l.s8.bf16 %v248_v44 }
 0x103   :  { %1117 = vmatpush2.bf16.msra.mxu1 %v583_v59  ;;  %1077 = vmatprep.subr.bf16.mxu0 %v448_v60  ;;  %v760_v59 = vunpack.c.l.s8.bf16 %v312_v45  ;;  %v304_v60 = vld [vmem:[#allocation5 + $0x5d8] sm:$0xff] }
 0x104   :  { %1118 = vmatprep.subr.bf16.mxu1 %v576_v61  ;;  %v368_v61 = vld [vmem:[#allocation5 + $0x7d8] sm:$0xff] }
 0x106   :  { %1078 = vmatpush2.bf16.msra.mxu0 %v447_v0  ;;  %v752_v0 = vunpack.c.h.s8.bf16 %v304_v60 }
 0x107   :  { %1119 = vmatpush2.bf16.msra.mxu1 %v575_v1  ;;  %1079 = vmatprep.subr.bf16.mxu0 %v440_v2  ;;  %v880_v1 = vunpack.c.h.s8.bf16 %v368_v61  ;;  %v303_v2 = vld [vmem:[#allocation5 + $0x5d0] sm:$0xff] }
 0x108   :  { %1120 = vmatprep.subr.bf16.mxu1 %v568_v3  ;;  %v367_v3 = vld [vmem:[#allocation5 + $0x7d0] sm:$0xff]  ;;  %v751_v4 = vunpack.c.h.s8.bf16 %v303_v2  ;;  %v743_v10 = vunpack.c.l.s8.bf16 %v303_v2 }
 0x109   :  { %v879_v5 = vunpack.c.h.s8.bf16 %v367_v3  ;;  %v871_v11 = vunpack.c.l.s8.bf16 %v367_v3 }
 0x10a   :  { %1080 = vmatpush2.bf16.msra.mxu0 %v439_v6  ;;  %v744_v6 = vunpack.c.l.s8.bf16 %v304_v60 }
 0x10b   :  { %1121 = vmatpush2.bf16.msra.mxu1 %v567_v7  ;;  %1131 = vmatprep.subr.bf16.mxu0 %v688_v8  ;;  %v872_v7 = vunpack.c.l.s8.bf16 %v368_v61  ;;  %v296_v8 = vld [vmem:[#allocation5 + $0x598] sm:$0xff] }
 0x10c   :  { %1172 = vmatprep.subr.bf16.mxu1 %v816_v9  ;;  %v360_v9 = vld [vmem:[#allocation5 + $0x798] sm:$0xff] }
 0x10d   :  { %1082 = vmatmul.mubr.bf16.vlgmr.msra.gmra.mxu0 %v3471_v46 }
 0x10e   :  { %1123 = vmatmul.mubr.bf16.vlgmr.msra.gmra.mxu1 %v3473_v47  ;;  %1132 = vmatpush1.bf16.msra.mxu0 %v687_v12  ;;  %v736_v12 = vunpack.c.h.s8.bf16 %v296_v8 }
 0x10f   :  { %1173 = vmatpush1.bf16.msra.mxu1 %v815_v13  ;;  %1133 = vmatprep.subr.bf16.mxu0 %v680_v14  ;;  %v864_v13 = vunpack.c.h.s8.bf16 %v360_v9  ;;  %v295_v14 = vld [vmem:[#allocation5 + $0x590] sm:$0xff] }
 0x110   :  { %1174 = vmatprep.subr.bf16.mxu1 %v808_v15  ;;  %1163 = vmatprep.mubr.bf16.mxu0 %v3475_v56  ;;  %v359_v15 = vld [vmem:[#allocation5 + $0x790] sm:$0xff]  ;;  %v735_v16 = vunpack.c.h.s8.bf16 %v295_v14  ;;  %v727_v22 = vunpack.c.l.s8.bf16 %v295_v14 }
 0x111   :  { %1204 = vmatprep.mubr.bf16.mxu1 %v3477_v57  ;;  %v863_v17 = vunpack.c.h.s8.bf16 %v359_v15  ;;  %v855_v23 = vunpack.c.l.s8.bf16 %v359_v15 }
 0x112   :  { %1134 = vmatpush1.bf16.msra.mxu0 %v679_v18  ;;  %v728_v18 = vunpack.c.l.s8.bf16 %v296_v8 }
 0x113   :  { %1175 = vmatpush1.bf16.msra.mxu1 %v807_v19  ;;  %1135 = vmatprep.subr.bf16.mxu0 %v672_v20  ;;  %v856_v19 = vunpack.c.l.s8.bf16 %v360_v9  ;;  %v288_v20 = vld [vmem:[#allocation5 + $0x558] sm:$0xff] }
 0x114   :  { %1176 = vmatprep.subr.bf16.mxu1 %v800_v21  ;;  %v352_v21 = vld [vmem:[#allocation5 + $0x758] sm:$0xff] }
 0x116   :  { %1136 = vmatpush1.bf16.msra.mxu0 %v671_v24  ;;  %v720_v24 = vunpack.c.h.s8.bf16 %v288_v20 }
 0x117   :  { %1177 = vmatpush1.bf16.msra.mxu1 %v799_v25  ;;  %1137 = vmatprep.subr.bf16.mxu0 %v664_v26  ;;  %v848_v25 = vunpack.c.h.s8.bf16 %v352_v21  ;;  %v287_v26 = vld [vmem:[#allocation5 + $0x550] sm:$0xff] }
 0x118   :  { %1178 = vmatprep.subr.bf16.mxu1 %v792_v27  ;;  %v351_v27 = vld [vmem:[#allocation5 + $0x750] sm:$0xff]  ;;  %v719_v30 = vunpack.c.h.s8.bf16 %v287_v26  ;;  %v711_v38 = vunpack.c.l.s8.bf16 %v287_v26 }
 0x119   :  { %v847_v31 = vunpack.c.h.s8.bf16 %v351_v27  ;;  %v839_v39 = vunpack.c.l.s8.bf16 %v351_v27 }
 0x11a   :  { %1138 = vmatpush1.bf16.msra.mxu0 %v663_v32  ;;  %v712_v32 = vunpack.c.l.s8.bf16 %v288_v20 }
 0x11b   :  { %1179 = vmatpush1.bf16.msra.mxu1 %v791_v33  ;;  %1139 = vmatprep.subr.bf16.mxu0 %v656_v34  ;;  %v840_v33 = vunpack.c.l.s8.bf16 %v352_v21  ;;  %v280_v34 = vld [vmem:[#allocation5 + $0x518] sm:$0xff] }
 0x11c   :  { %1180 = vmatprep.subr.bf16.mxu1 %v784_v35  ;;  %v344_v35 = vld [vmem:[#allocation5 + $0x718] sm:$0xff] }
 0x11e   :  { %1140 = vmatpush1.bf16.msra.mxu0 %v655_v40  ;;  %v704_v40 = vunpack.c.h.s8.bf16 %v280_v34 }
 0x11f   :  { %1181 = vmatpush1.bf16.msra.mxu1 %v783_v41  ;;  %1141 = vmatprep.subr.bf16.mxu0 %v648_v42  ;;  %v832_v41 = vunpack.c.h.s8.bf16 %v344_v35  ;;  %v279_v42 = vld [vmem:[#allocation5 + $0x510] sm:$0xff] }
 0x120   :  { %1182 = vmatprep.subr.bf16.mxu1 %v776_v43  ;;  %v343_v43 = vld [vmem:[#allocation5 + $0x710] sm:$0xff]  ;;  %v703_v44 = vunpack.c.h.s8.bf16 %v279_v42  ;;  %v695_v52 = vunpack.c.l.s8.bf16 %v279_v42 }
 0x121   :  { %v831_v45 = vunpack.c.h.s8.bf16 %v343_v43  ;;  %v823_v53 = vunpack.c.l.s8.bf16 %v343_v43 }
 0x122   :  { %1142 = vmatpush1.bf16.msra.mxu0 %v647_v48  ;;  %v696_v48 = vunpack.c.l.s8.bf16 %v280_v34 }
 0x123   :  { %1183 = vmatpush1.bf16.msra.mxu1 %v775_v49  ;;  %1143 = vmatprep.subr.bf16.mxu0 %v640_v50  ;;  %v824_v49 = vunpack.c.l.s8.bf16 %v344_v35  ;;  %v146_v50 = vld [vmem:[#allocation5 + $0xe8] sm:$0xff] }
 0x124   :  { %1184 = vmatprep.subr.bf16.mxu1 %v768_v51  ;;  %v210_v51 = vld [vmem:[#allocation5 + $0x2e8] sm:$0xff] }
 0x126   :  { %1144 = vmatpush1.bf16.msra.mxu0 %v639_v54  ;;  %v434_v54 = vunpack.c.h.s8.bf16 %v146_v50 }
 0x127   :  { %1185 = vmatpush1.bf16.msra.mxu1 %v767_v55  ;;  %1145 = vmatprep.subr.bf16.mxu0 %v632_v58  ;;  %v562_v55 = vunpack.c.h.s8.bf16 %v210_v51  ;;  %v145_v58 = vld [vmem:[#allocation5 + $0xe0] sm:$0xff] }
 0x128   :  { %1186 = vmatprep.subr.bf16.mxu1 %v760_v59  ;;  %v209_v59 = vld [vmem:[#allocation5 + $0x2e0] sm:$0xff]  ;;  %v433_v60 = vunpack.c.h.s8.bf16 %v145_v58 }
 0x129   :  { %v561_v61 = vunpack.c.h.s8.bf16 %v209_v59 }
 0x12a   :  { %1146 = vmatpush1.bf16.msra.mxu0 %v631_v62  ;;  %v426_v62 = vunpack.c.l.s8.bf16 %v146_v50 }
 0x12b   :  { %1187 = vmatpush1.bf16.msra.mxu1 %v759_v63  ;;  %1147 = vmatprep.subr.bf16.mxu0 %v752_v0  ;;  %v554_v63 = vunpack.c.l.s8.bf16 %v210_v51  ;;  %v138_v0 = vld [vmem:[#allocation5 + $0xa8] sm:$0xff] }
 0x12c   :  { %1188 = vmatprep.subr.bf16.mxu1 %v880_v1  ;;  %v202_v1 = vld [vmem:[#allocation5 + $0x2a8] sm:$0xff]  ;;  %v418_v9 = vunpack.c.h.s8.bf16 %v138_v0  ;;  %v410_v20 = vunpack.c.l.s8.bf16 %v138_v0 }
 0x12d   :  { %v538_v21 = vunpack.c.l.s8.bf16 %v202_v1 }
 0x12e   :  { %1148 = vmatpush2.bf16.msra.mxu0 %v751_v4 }
 0x12f   :  { %1189 = vmatpush2.bf16.msra.mxu1 %v879_v5  ;;  %1149 = vmatprep.subr.bf16.mxu0 %v744_v6  ;;  %v425_v5 = vunpack.c.l.s8.bf16 %v145_v58  ;;  %v553_v6 = vunpack.c.l.s8.bf16 %v209_v59 }
 0x130   :  { %1190 = vmatprep.subr.bf16.mxu1 %v872_v7 }
 0x132   :  { %1150 = vmatpush2.bf16.msra.mxu0 %v743_v10  ;;  %v546_v10 = vunpack.c.h.s8.bf16 %v202_v1 }
 0x133   :  { %1191 = vmatpush2.bf16.msra.mxu1 %v871_v11  ;;  %1151 = vmatprep.subr.bf16.mxu0 %v736_v12  ;;  %v137_v11 = vld [vmem:[#allocation5 + $0xa0] sm:$0xff] }
 0x134   :  { %1192 = vmatprep.subr.bf16.mxu1 %v864_v13  ;;  %v201_v12 = vld [vmem:[#allocation5 + $0x2a0] sm:$0xff] }
 0x136   :  { %1152 = vmatpush2.bf16.msra.mxu0 %v735_v16  ;;  %v417_v16 = vunpack.c.h.s8.bf16 %v137_v11 }
 0x137   :  { %1193 = vmatpush2.bf16.msra.mxu1 %v863_v17  ;;  %1153 = vmatprep.subr.bf16.mxu0 %v728_v18  ;;  %v545_v17 = vunpack.c.h.s8.bf16 %v201_v12 }
 0x138   :  { %1194 = vmatprep.subr.bf16.mxu1 %v856_v19 }
 0x13a   :  { %1154 = vmatpush2.bf16.msra.mxu0 %v727_v22  ;;  %v130_v22 = vld [vmem:[#allocation5 + $0x68] sm:$0xff] }
 0x13b   :  { %1195 = vmatpush2.bf16.msra.mxu1 %v855_v23  ;;  %1155 = vmatprep.subr.bf16.mxu0 %v720_v24  ;;  %v194_v23 = vld [vmem:[#allocation5 + $0x268] sm:$0xff]  ;;  %v409_v24 = vunpack.c.l.s8.bf16 %v137_v11  ;;  %v402_v26 = vunpack.c.h.s8.bf16 %v130_v22  ;;  %v394_v34 = vunpack.c.l.s8.bf16 %v130_v22  ;;  %v161_v22 = vld [vmem:[#allocation5 + $0x160] sm:$0xff] }
 0x13c   :  { %1196 = vmatprep.subr.bf16.mxu1 %v848_v25  ;;  %v537_v25 = vunpack.c.l.s8.bf16 %v201_v12  ;;  %v530_v27 = vunpack.c.h.s8.bf16 %v194_v23  ;;  %v522_v35 = vunpack.c.l.s8.bf16 %v194_v23  ;;  %v225_v23 = vld [vmem:[#allocation5 + $0x360] sm:$0xff] }
 0x13e   :  { %1156 = vmatpush2.bf16.msra.mxu0 %v719_v30  ;;  %v129_v30 = vld [vmem:[#allocation5 + $0x60] sm:$0xff] }
 0x13f   :  { %1197 = vmatpush2.bf16.msra.mxu1 %v847_v31  ;;  %1157 = vmatprep.subr.bf16.mxu0 %v712_v32  ;;  %v193_v31 = vld [vmem:[#allocation5 + $0x260] sm:$0xff]  ;;  %v401_v32 = vunpack.c.h.s8.bf16 %v129_v30 }
 0x140   :  { %1198 = vmatprep.subr.bf16.mxu1 %v840_v33  ;;  %v529_v33 = vunpack.c.h.s8.bf16 %v193_v31 }
 0x142   :  { %1158 = vmatpush2.bf16.msra.mxu0 %v711_v38  ;;  %v122_v38 = vld [vmem:[#allocation5 + $0x28] sm:$0xff] }
 0x143   :  { %1199 = vmatpush2.bf16.msra.mxu1 %v839_v39  ;;  %1159 = vmatprep.subr.bf16.mxu0 %v704_v40  ;;  %v186_v39 = vld [vmem:[#allocation5 + $0x228] sm:$0xff]  ;;  %v393_v40 = vunpack.c.l.s8.bf16 %v129_v30  ;;  %v386_v42 = vunpack.c.h.s8.bf16 %v122_v38  ;;  %v378_v50 = vunpack.c.l.s8.bf16 %v122_v38  ;;  %v153_v38 = vld [vmem:[#allocation5 + $0x120] sm:$0xff] }
 0x144   :  { %1200 = vmatprep.subr.bf16.mxu1 %v832_v41  ;;  %v521_v41 = vunpack.c.l.s8.bf16 %v193_v31  ;;  %v514_v43 = vunpack.c.h.s8.bf16 %v186_v39  ;;  %v506_v51 = vunpack.c.l.s8.bf16 %v186_v39  ;;  %v154_v30 = vld [vmem:[#allocation5 + $0x128] sm:$0xff]  ;;  %v217_v39 = vld [vmem:[#allocation5 + $0x320] sm:$0xff] }
 0x145   :  { %v218_v31 = vld [vmem:[#allocation5 + $0x328] sm:$0xff] }
 0x146   :  { %1160 = vmatpush2.bf16.msra.mxu0 %v703_v44  ;;  %v121_v44 = vld [vmem:[#allocation5 + $0x20] sm:$0xff] }
 0x147   :  { %1201 = vmatpush2.bf16.msra.mxu1 %v831_v45  ;;  %1161 = vmatprep.subr.bf16.mxu0 %v696_v48  ;;  %v185_v45 = vld [vmem:[#allocation5 + $0x220] sm:$0xff]  ;;  %v385_v48 = vunpack.c.h.s8.bf16 %v121_v44 }
 0x148   :  { %1202 = vmatprep.subr.bf16.mxu1 %v824_v49  ;;  %v513_v49 = vunpack.c.h.s8.bf16 %v185_v45 }
 0x14a   :  { %1162 = vmatpush2.bf16.msra.mxu0 %v695_v52  ;;  %v178_v52 = vld [vmem:[#allocation5 + $0x1e8] sm:$0xff] }
 0x14b   :  { %1203 = vmatpush2.bf16.msra.mxu1 %v823_v53  ;;  %1213 = vmatprep.subr.bf16.mxu0 %v434_v54  ;;  %v242_v53 = vld [vmem:[#allocation5 + $0x3e8] sm:$0xff]  ;;  %v377_v54 = vunpack.c.l.s8.bf16 %v121_v44  ;;  %v498_v58 = vunpack.c.h.s8.bf16 %v178_v52  ;;  %v490_v0 = vunpack.c.l.s8.bf16 %v178_v52  ;;  %v273_v52 = vld [vmem:[#allocation5 + $0x4e0] sm:$0xff] }
 0x14c   :  { %1254 = vmatprep.subr.bf16.mxu1 %v562_v55  ;;  %v505_v55 = vunpack.c.l.s8.bf16 %v185_v45  ;;  %v626_v59 = vunpack.c.h.s8.bf16 %v242_v53  ;;  %v618_v1 = vunpack.c.l.s8.bf16 %v242_v53  ;;  %v274_v44 = vld [vmem:[#allocation5 + $0x4e8] sm:$0xff]  ;;  %v337_v53 = vld [vmem:[#allocation5 + $0x6e0] sm:$0xff] }
 0x14d   :  { %v919_v2 = vpop.f32.mrf.mxu0  ;;  %1164 = vmatmul.mubr.bf16.vlgmr.msra.gmra.mxu0 %v3483_v28  ;;  %v338_v45 = vld [vmem:[#allocation5 + $0x6e8] sm:$0xff] }
 0x14e   :  { %v960_v3 = vpop.f32.mrf.mxu1  ;;  %1205 = vmatmul.mubr.bf16.vlgmr.msra.gmra.mxu1 %v3485_v29  ;;  %1214 = vmatpush1.bf16.msra.mxu0 %v433_v60  ;;  %v177_v60 = vld [vmem:[#allocation5 + $0x1e0] sm:$0xff] }
 0x14f   :  { %v3497_v4 = vadd.f32 %v960_v3, %v919_v2  ;;  %1255 = vmatpush1.bf16.msra.mxu1 %v561_v61  ;;  %v921_v7 = vpop.f32.mrf.mxu0  ;;  %1215 = vmatprep.subr.bf16.mxu0 %v426_v62  ;;  %v241_v61 = vld [vmem:[#allocation5 + $0x3e0] sm:$0xff]  ;;  %v497_v62 = vunpack.c.h.s8.bf16 %v177_v60  ;;  %v170_v2 = vld [vmem:[#allocation5 + $0x1a8] sm:$0xff] }
 0x150   :  { %v962_v8 = vpop.f32.mrf.mxu1  ;;  %1256 = vmatprep.subr.bf16.mxu1 %v554_v63  ;;  %1245 = vmatprep.mubr.bf16.mxu0 %v3465_v36  ;;  %v625_v63 = vunpack.c.h.s8.bf16 %v241_v61  ;;  %v234_v3 = vld [vmem:[#allocation5 + $0x3a8] sm:$0xff] }
 0x151   :  { %v3499_v13 = vadd.f32 %v962_v8, %v921_v7  ;;  %1286 = vmatprep.mubr.bf16.mxu1 %v3467_v37  ;;  %v923_v14 = vpop.f32.mrf.mxu0  ;;  %v482_v7 = vunpack.c.h.s8.bf16 %v170_v2  ;;  %v610_v8 = vunpack.c.h.s8.bf16 %v234_v3 }
 0x152   :  { %v964_v15 = vpop.f32.mrf.mxu1  ;;  %1216 = vmatpush1.bf16.msra.mxu0 %v425_v5  ;;  %v489_v5 = vunpack.c.l.s8.bf16 %v177_v60  ;;  %v474_v14 = vunpack.c.l.s8.bf16 %v170_v2  ;;  %v266_v60 = vld [vmem:[#allocation5 + $0x4a8] sm:$0xff]  ;;  %v809_v2 = vunpack.c.l.s8.bf16 %v337_v53 }
 0x153   :  { %1257 = vmatpush1.bf16.msra.mxu1 %v553_v6  ;;  %v924_v18 = vpop.f32.mrf.mxu0  ;;  %1217 = vmatprep.subr.bf16.mxu0 %v418_v9  ;;  %v617_v6 = vunpack.c.l.s8.bf16 %v241_v61  ;;  %v169_v9 = vld [vmem:[#allocation5 + $0x1a0] sm:$0xff]  ;;  %v602_v15 = vunpack.c.l.s8.bf16 %v234_v3  ;;  %v330_v61 = vld [vmem:[#allocation5 + $0x6a8] sm:$0xff] }
 0x154   :  { %v965_v19 = vpop.f32.mrf.mxu1  ;;  %1258 = vmatprep.subr.bf16.mxu1 %v546_v10  ;;  %v233_v10 = vld [vmem:[#allocation5 + $0x3a0] sm:$0xff]  ;;  %v481_v11 = vunpack.c.h.s8.bf16 %v169_v9  ;;  %v473_v18 = vunpack.c.l.s8.bf16 %v169_v9 }
 0x155   :  { %v609_v12 = vunpack.c.h.s8.bf16 %v233_v10  ;;  %v601_v19 = vunpack.c.l.s8.bf16 %v233_v10  ;;  %v329_v9 = vld [vmem:[#allocation5 + $0x6a0] sm:$0xff] }
 0x156   :  { %1218 = vmatpush1.bf16.msra.mxu0 %v417_v16  ;;  %v162_v16 = vld [vmem:[#allocation5 + $0x168] sm:$0xff] }
 0x157   :  { %1259 = vmatpush1.bf16.msra.mxu1 %v545_v17  ;;  %1219 = vmatprep.subr.bf16.mxu0 %v410_v20  ;;  %v226_v17 = vld [vmem:[#allocation5 + $0x368] sm:$0xff]  ;;  %v466_v20 = vunpack.c.h.s8.bf16 %v162_v16 }
 0x158   :  { %1260 = vmatprep.subr.bf16.mxu1 %v538_v21  ;;  %v594_v21 = vunpack.c.h.s8.bf16 %v226_v17 }
 0x15a   :  { %1220 = vmatpush1.bf16.msra.mxu0 %v409_v24  ;;  %v465_v24 = vunpack.c.h.s8.bf16 %v161_v22 }
 0x15b   :  { %1261 = vmatpush1.bf16.msra.mxu1 %v537_v25  ;;  %1221 = vmatprep.subr.bf16.mxu0 %v402_v26  ;;  %v593_v25 = vunpack.c.h.s8.bf16 %v225_v23  ;;  %v458_v26 = vunpack.c.l.s8.bf16 %v162_v16  ;;  %v801_v16 = vunpack.c.h.s8.bf16 %v329_v9 }
 0x15c   :  { %1262 = vmatprep.subr.bf16.mxu1 %v530_v27  ;;  %v586_v27 = vunpack.c.l.s8.bf16 %v226_v17 }
 0x15e   :  { %1222 = vmatpush1.bf16.msra.mxu0 %v401_v32  ;;  %v457_v32 = vunpack.c.l.s8.bf16 %v161_v22 }
 0x15f   :  { %1263 = vmatpush1.bf16.msra.mxu1 %v529_v33  ;;  %1223 = vmatprep.subr.bf16.mxu0 %v394_v34  ;;  %v585_v33 = vunpack.c.l.s8.bf16 %v225_v23  ;;  %v450_v34 = vunpack.c.h.s8.bf16 %v154_v30  ;;  %v793_v23 = vunpack.c.l.s8.bf16 %v329_v9 }
 0x160   :  { %1264 = vmatprep.subr.bf16.mxu1 %v522_v35  ;;  %v578_v35 = vunpack.c.h.s8.bf16 %v218_v31 }
 0x162   :  { %1224 = vmatpush1.bf16.msra.mxu0 %v393_v40  ;;  %v449_v40 = vunpack.c.h.s8.bf16 %v153_v38 }
 0x163   :  { %1265 = vmatpush1.bf16.msra.mxu1 %v521_v41  ;;  %1225 = vmatprep.subr.bf16.mxu0 %v386_v42  ;;  %v577_v41 = vunpack.c.h.s8.bf16 %v217_v39  ;;  %v442_v42 = vunpack.c.l.s8.bf16 %v154_v30 }
 0x164   :  { %1266 = vmatprep.subr.bf16.mxu1 %v514_v43  ;;  %v570_v43 = vunpack.c.l.s8.bf16 %v218_v31 }
 0x166   :  { %1226 = vmatpush1.bf16.msra.mxu0 %v385_v48  ;;  %v441_v48 = vunpack.c.l.s8.bf16 %v153_v38 }
 0x167   :  { %1267 = vmatpush1.bf16.msra.mxu1 %v513_v49  ;;  %1227 = vmatprep.subr.bf16.mxu0 %v378_v50  ;;  %v569_v49 = vunpack.c.l.s8.bf16 %v217_v39  ;;  %v690_v50 = vunpack.c.h.s8.bf16 %v274_v44 }
 0x168   :  { %1268 = vmatprep.subr.bf16.mxu1 %v506_v51  ;;  %v818_v51 = vunpack.c.h.s8.bf16 %v338_v45 }
 0x16a   :  { %1228 = vmatpush1.bf16.msra.mxu0 %v377_v54  ;;  %v689_v54 = vunpack.c.h.s8.bf16 %v273_v52 }
 0x16b   :  { %1269 = vmatpush1.bf16.msra.mxu1 %v505_v55  ;;  %1229 = vmatprep.subr.bf16.mxu0 %v498_v58  ;;  %v817_v55 = vunpack.c.h.s8.bf16 %v337_v53  ;;  %v682_v58 = vunpack.c.l.s8.bf16 %v274_v44 }
 0x16c   :  { %1270 = vmatprep.subr.bf16.mxu1 %v626_v59  ;;  %v810_v59 = vunpack.c.l.s8.bf16 %v338_v45 }
 0x16e   :  { %1230 = vmatpush2.bf16.msra.mxu0 %v497_v62 }
 0x16f   :  { %1271 = vmatpush2.bf16.msra.mxu1 %v625_v63  ;;  %1231 = vmatprep.subr.bf16.mxu0 %v490_v0 }
 0x170   :  { %1272 = vmatprep.subr.bf16.mxu1 %v618_v1  ;;  %v681_v1 = vunpack.c.l.s8.bf16 %v273_v52 }
 0x172   :  { %1232 = vmatpush2.bf16.msra.mxu0 %v489_v5 }
 0x173   :  { %1273 = vmatpush2.bf16.msra.mxu1 %v617_v6  ;;  %1233 = vmatprep.subr.bf16.mxu0 %v482_v7  ;;  %v674_v6 = vunpack.c.h.s8.bf16 %v266_v60  ;;  %v802_v7 = vunpack.c.h.s8.bf16 %v330_v61 }
 0x174   :  { %1274 = vmatprep.subr.bf16.mxu1 %v610_v8  ;;  %v265_v8 = vld [vmem:[#allocation5 + $0x4a0] sm:$0xff] }
 0x175   :  { %v665_v22 = vunpack.c.l.s8.bf16 %v265_v8 }
 0x176   :  { %1234 = vmatpush2.bf16.msra.mxu0 %v481_v11 }
 0x177   :  { %1275 = vmatpush2.bf16.msra.mxu1 %v609_v12  ;;  %1235 = vmatprep.subr.bf16.mxu0 %v474_v14 }
 0x178   :  { %1276 = vmatprep.subr.bf16.mxu1 %v602_v15  ;;  %v673_v15 = vunpack.c.h.s8.bf16 %v265_v8  ;;  %v361_v8 = vld [vmem:[#allocation5 + $0x7a0] sm:$0xff] }
 0x17a   :  { %1236 = vmatpush2.bf16.msra.mxu0 %v473_v18 }
 0x17b   :  { %1277 = vmatpush2.bf16.msra.mxu1 %v601_v19  ;;  %1237 = vmatprep.subr.bf16.mxu0 %v466_v20  ;;  %v666_v19 = vunpack.c.l.s8.bf16 %v266_v60  ;;  %v794_v20 = vunpack.c.l.s8.bf16 %v330_v61 }
 0x17c   :  { %1278 = vmatprep.subr.bf16.mxu1 %v594_v21  ;;  %v258_v21 = vld [vmem:[#allocation5 + $0x468] sm:$0xff] }
 0x17e   :  { %1238 = vmatpush2.bf16.msra.mxu0 %v465_v24  ;;  %v658_v24 = vunpack.c.h.s8.bf16 %v258_v21 }
 0x17f   :  { %1279 = vmatpush2.bf16.msra.mxu1 %v593_v25  ;;  %1239 = vmatprep.subr.bf16.mxu0 %v458_v26  ;;  %v257_v26 = vld [vmem:[#allocation5 + $0x460] sm:$0xff] }
 0x180   :  { %1280 = vmatprep.subr.bf16.mxu1 %v586_v27  ;;  %v321_v27 = vld [vmem:[#allocation5 + $0x660] sm:$0xff]  ;;  %v657_v30 = vunpack.c.h.s8.bf16 %v257_v26  ;;  %v649_v38 = vunpack.c.l.s8.bf16 %v257_v26  ;;  %v282_v26 = vld [vmem:[#allocation5 + $0x528] sm:$0xff] }
 0x181   :  { %v785_v31 = vunpack.c.h.s8.bf16 %v321_v27  ;;  %v777_v39 = vunpack.c.l.s8.bf16 %v321_v27  ;;  %v346_v27 = vld [vmem:[#allocation5 + $0x728] sm:$0xff] }
 0x182   :  { %1240 = vmatpush2.bf16.msra.mxu0 %v457_v32  ;;  %v650_v32 = vunpack.c.l.s8.bf16 %v258_v21  ;;  %v289_v21 = vld [vmem:[#allocation5 + $0x560] sm:$0xff] }
 0x183   :  { %1281 = vmatpush2.bf16.msra.mxu1 %v585_v33  ;;  %1241 = vmatprep.subr.bf16.mxu0 %v450_v34  ;;  %v250_v34 = vld [vmem:[#allocation5 + $0x428] sm:$0xff] }
 0x184   :  { %1282 = vmatprep.subr.bf16.mxu1 %v578_v35  ;;  %v314_v35 = vld [vmem:[#allocation5 + $0x628] sm:$0xff] }
 0x186   :  { %1242 = vmatpush2.bf16.msra.mxu0 %v449_v40  ;;  %v642_v40 = vunpack.c.h.s8.bf16 %v250_v34 }
 0x187   :  { %1283 = vmatpush2.bf16.msra.mxu1 %v577_v41  ;;  %1243 = vmatprep.subr.bf16.mxu0 %v442_v42  ;;  %v770_v41 = vunpack.c.h.s8.bf16 %v314_v35  ;;  %v249_v42 = vld [vmem:[#allocation5 + $0x420] sm:$0xff] }
 0x188   :  { %1284 = vmatprep.subr.bf16.mxu1 %v570_v43  ;;  %v313_v43 = vld [vmem:[#allocation5 + $0x620] sm:$0xff]  ;;  %v641_v44 = vunpack.c.h.s8.bf16 %v249_v42  ;;  %v633_v52 = vunpack.c.l.s8.bf16 %v249_v42  ;;  %v148_v42 = vld [vmem:[#allocation5 + $0xf8] sm:$0xff] }
 0x189   :  { %v769_v45 = vunpack.c.h.s8.bf16 %v313_v43  ;;  %v761_v53 = vunpack.c.l.s8.bf16 %v313_v43  ;;  %v212_v43 = vld [vmem:[#allocation5 + $0x2f8] sm:$0xff] }
 0x18a   :  { %1244 = vmatpush2.bf16.msra.mxu0 %v441_v48  ;;  %v634_v48 = vunpack.c.l.s8.bf16 %v250_v34  ;;  %v281_v34 = vld [vmem:[#allocation5 + $0x520] sm:$0xff] }
 0x18b   :  { %1285 = vmatpush2.bf16.msra.mxu1 %v569_v49  ;;  %1295 = vmatprep.subr.bf16.mxu0 %v690_v50  ;;  %v762_v49 = vunpack.c.l.s8.bf16 %v314_v35  ;;  %v306_v50 = vld [vmem:[#allocation5 + $0x5e8] sm:$0xff]  ;;  %v345_v35 = vld [vmem:[#allocation5 + $0x720] sm:$0xff] }
 0x18c   :  { %1336 = vmatprep.subr.bf16.mxu1 %v818_v51  ;;  %v370_v51 = vld [vmem:[#allocation5 + $0x7e8] sm:$0xff] }
 0x18d   :  { %v1001_v62 = vpop.f32.mrf.mxu0  ;;  %1246 = vmatmul.mubr.bf16.vlgmr.msra.gmra.mxu0 %v3471_v46 }
 0x18e   :  { %v1042_v63 = vpop.f32.mrf.mxu1  ;;  %1287 = vmatmul.mubr.bf16.vlgmr.msra.gmra.mxu1 %v3473_v47  ;;  %v1002_v0 = vadd.f32 %v1001_v62, %v3497_v4  ;;  %1296 = vmatpush1.bf16.msra.mxu0 %v689_v54  ;;  %v754_v54 = vunpack.c.h.s8.bf16 %v306_v50  ;;  %v746_v62 = vunpack.c.l.s8.bf16 %v306_v50  ;;  %v147_v50 = vld [vmem:[#allocation5 + $0xf0] sm:$0xff] }
 0x18f   :  { %1337 = vmatpush1.bf16.msra.mxu1 %v817_v55  ;;  %v1003_v3 = vpop.f32.mrf.mxu0  ;;  %1297 = vmatprep.subr.bf16.mxu0 %v682_v58  ;;  %v882_v55 = vunpack.c.h.s8.bf16 %v370_v51  ;;  %v305_v58 = vld [vmem:[#allocation5 + $0x5e0] sm:$0xff] }
 0x190   :  { %v1044_v5 = vpop.f32.mrf.mxu1  ;;  %1338 = vmatprep.subr.bf16.mxu1 %v810_v59  ;;  %v3506_v10 = vadd.f32 %v1042_v63, %v1002_v0  ;;  %v1004_v11 = vadd.f32 %v1003_v3, %v3499_v13  ;;  %1327 = vmatprep.mubr.bf16.mxu0 %v3475_v56  ;;  %v322_v13 = vld [vmem:[#allocation5 + $0x668] sm:$0xff]  ;;  %v369_v59 = vld [vmem:[#allocation5 + $0x7e0] sm:$0xff]  ;;  %v753_v60 = vunpack.c.h.s8.bf16 %v305_v58  ;;  %v874_v63 = vunpack.c.l.s8.bf16 %v370_v51  ;;  %v211_v51 = vld [vmem:[#allocation5 + $0x2f0] sm:$0xff] }
 0x191   :  { %1368 = vmatprep.mubr.bf16.mxu1 %v3477_v57  ;;  %v1005_v4 = vpop.f32.mrf.mxu0  ;;  %v786_v25 = vunpack.c.h.s8.bf16 %v322_v13  ;;  %v778_v33 = vunpack.c.l.s8.bf16 %v322_v13  ;;  %v881_v61 = vunpack.c.h.s8.bf16 %v369_v59  ;;  %v298_v0 = vld [vmem:[#allocation5 + $0x5a8] sm:$0xff]  ;;  %v873_v3 = vunpack.c.l.s8.bf16 %v369_v59  ;;  %v353_v13 = vld [vmem:[#allocation5 + $0x760] sm:$0xff]  ;;  %v204_v59 = vld [vmem:[#allocation5 + $0x2b8] sm:$0xff] }
 0x192   :  { %v1046_v12 = vpop.f32.mrf.mxu1  ;;  %v3511_v14 = vadd.f32 %v1044_v5, %v1004_v11  ;;  %1298 = vmatpush1.bf16.msra.mxu0 %v681_v1  ;;  %v362_v1 = vld [vmem:[#allocation5 + $0x7a8] sm:$0xff]  ;;  %v738_v5 = vunpack.c.h.s8.bf16 %v298_v0  ;;  %v865_v11 = vunpack.c.h.s8.bf16 %v361_v8  ;;  %v730_v4 = vunpack.c.l.s8.bf16 %v298_v0 }
 0x193   :  { %1339 = vmatpush1.bf16.msra.mxu1 %v809_v2  ;;  %v1006_v17 = vpop.f32.mrf.mxu0  ;;  %1299 = vmatprep.subr.bf16.mxu0 %v674_v6  ;;  %v745_v2 = vunpack.c.l.s8.bf16 %v305_v58  ;;  %v866_v6 = vunpack.c.h.s8.bf16 %v362_v1  ;;  %v858_v12 = vunpack.c.l.s8.bf16 %v362_v1  ;;  %v140_v58 = vld [vmem:[#allocation5 + $0xb8] sm:$0xff]  ;;  %v555_v0 = vunpack.c.l.s8.bf16 %v211_v51 }
 0x194   :  { %v1047_v18 = vpop.f32.mrf.mxu1  ;;  %1340 = vmatprep.subr.bf16.mxu1 %v802_v7  ;;  %v297_v7 = vld [vmem:[#allocation5 + $0x5a0] sm:$0xff] }
 0x195   :  { %v737_v9 = vunpack.c.h.s8.bf16 %v297_v7  ;;  %v729_v17 = vunpack.c.l.s8.bf16 %v297_v7  ;;  %v857_v18 = vunpack.c.l.s8.bf16 %v361_v8  ;;  %v203_v7 = vld [vmem:[#allocation5 + $0x2b0] sm:$0xff] }
 0x196   :  { %1300 = vmatpush1.bf16.msra.mxu0 %v673_v15  ;;  %v290_v15 = vld [vmem:[#allocation5 + $0x568] sm:$0xff] }
 0x197   :  { %1341 = vmatpush1.bf16.msra.mxu1 %v801_v16  ;;  %1301 = vmatprep.subr.bf16.mxu0 %v666_v19  ;;  %v354_v16 = vld [vmem:[#allocation5 + $0x768] sm:$0xff]  ;;  %v722_v19 = vunpack.c.h.s8.bf16 %v290_v15 }
 0x198   :  { %1342 = vmatprep.subr.bf16.mxu1 %v794_v20  ;;  %v850_v20 = vunpack.c.h.s8.bf16 %v354_v16 }
 0x19a   :  { %1302 = vmatpush1.bf16.msra.mxu0 %v665_v22  ;;  %v721_v22 = vunpack.c.h.s8.bf16 %v289_v21 }
 0x19b   :  { %1343 = vmatpush1.bf16.msra.mxu1 %v793_v23  ;;  %1303 = vmatprep.subr.bf16.mxu0 %v658_v24  ;;  %v849_v23 = vunpack.c.h.s8.bf16 %v353_v13  ;;  %v714_v24 = vunpack.c.l.s8.bf16 %v290_v15 }
 0x19c   :  { %1344 = vmatprep.subr.bf16.mxu1 %v786_v25  ;;  %v842_v25 = vunpack.c.l.s8.bf16 %v354_v16 }
 0x19e   :  { %1304 = vmatpush1.bf16.msra.mxu0 %v657_v30  ;;  %v713_v30 = vunpack.c.l.s8.bf16 %v289_v21 }
 0x19f   :  { %1345 = vmatpush1.bf16.msra.mxu1 %v785_v31  ;;  %1305 = vmatprep.subr.bf16.mxu0 %v650_v32  ;;  %v841_v31 = vunpack.c.l.s8.bf16 %v353_v13  ;;  %v706_v32 = vunpack.c.h.s8.bf16 %v282_v26 }
 0x1a0   :  { %1346 = vmatprep.subr.bf16.mxu1 %v778_v33  ;;  %v834_v33 = vunpack.c.h.s8.bf16 %v346_v27 }
 0x1a2   :  { %1306 = vmatpush1.bf16.msra.mxu0 %v649_v38  ;;  %v705_v38 = vunpack.c.h.s8.bf16 %v281_v34 }
 0x1a3   :  { %1347 = vmatpush1.bf16.msra.mxu1 %v777_v39  ;;  %1307 = vmatprep.subr.bf16.mxu0 %v642_v40  ;;  %v833_v39 = vunpack.c.h.s8.bf16 %v345_v35  ;;  %v698_v40 = vunpack.c.l.s8.bf16 %v282_v26 }
 0x1a4   :  { %1348 = vmatprep.subr.bf16.mxu1 %v770_v41  ;;  %v826_v41 = vunpack.c.l.s8.bf16 %v346_v27 }
 0x1a6   :  { %1308 = vmatpush1.bf16.msra.mxu0 %v641_v44  ;;  %v697_v44 = vunpack.c.l.s8.bf16 %v281_v34 }
 0x1a7   :  { %1349 = vmatpush1.bf16.msra.mxu1 %v769_v45  ;;  %1309 = vmatprep.subr.bf16.mxu0 %v634_v48  ;;  %v825_v45 = vunpack.c.l.s8.bf16 %v345_v35  ;;  %v436_v48 = vunpack.c.h.s8.bf16 %v148_v42 }
 0x1a8   :  { %1350 = vmatprep.subr.bf16.mxu1 %v762_v49  ;;  %v564_v49 = vunpack.c.h.s8.bf16 %v212_v43 }
 0x1aa   :  { %1310 = vmatpush1.bf16.msra.mxu0 %v633_v52  ;;  %v435_v52 = vunpack.c.h.s8.bf16 %v147_v50 }
 0x1ab   :  { %1351 = vmatpush1.bf16.msra.mxu1 %v761_v53  ;;  %1311 = vmatprep.subr.bf16.mxu0 %v754_v54  ;;  %v563_v53 = vunpack.c.h.s8.bf16 %v211_v51  ;;  %v428_v54 = vunpack.c.l.s8.bf16 %v148_v42 }
 0x1ac   :  { %1352 = vmatprep.subr.bf16.mxu1 %v882_v55  ;;  %v556_v55 = vunpack.c.l.s8.bf16 %v212_v43 }
 0x1ae   :  { %1312 = vmatpush2.bf16.msra.mxu0 %v753_v60 }
 0x1af   :  { %1353 = vmatpush2.bf16.msra.mxu1 %v881_v61  ;;  %1313 = vmatprep.subr.bf16.mxu0 %v746_v62 }
 0x1b0   :  { %1354 = vmatprep.subr.bf16.mxu1 %v874_v63  ;;  %v427_v63 = vunpack.c.l.s8.bf16 %v147_v50 }
 0x1b2   :  { %1314 = vmatpush2.bf16.msra.mxu0 %v745_v2 }
 0x1b3   :  { %1355 = vmatpush2.bf16.msra.mxu1 %v873_v3  ;;  %1315 = vmatprep.subr.bf16.mxu0 %v738_v5  ;;  %v420_v3 = vunpack.c.h.s8.bf16 %v140_v58  ;;  %v548_v5 = vunpack.c.h.s8.bf16 %v204_v59 }
 0x1b4   :  { %1356 = vmatprep.subr.bf16.mxu1 %v866_v6  ;;  %v139_v6 = vld [vmem:[#allocation5 + $0xb0] sm:$0xff] }
 0x1b5   :  { %v411_v21 = vunpack.c.l.s8.bf16 %v139_v6 }
 0x1b6   :  { %1316 = vmatpush2.bf16.msra.mxu0 %v737_v9 }
 0x1b7   :  { %1357 = vmatpush2.bf16.msra.mxu1 %v865_v11  ;;  %1317 = vmatprep.subr.bf16.mxu0 %v730_v4  ;;  %v419_v4 = vunpack.c.h.s8.bf16 %v139_v6 }
 0x1b8   :  { %1358 = vmatprep.subr.bf16.mxu1 %v858_v12  ;;  %v547_v12 = vunpack.c.h.s8.bf16 %v203_v7 }
 0x1ba   :  { %1318 = vmatpush2.bf16.msra.mxu0 %v729_v17  ;;  %v412_v17 = vunpack.c.l.s8.bf16 %v140_v58 }
 0x1bb   :  { %1359 = vmatpush2.bf16.msra.mxu1 %v857_v18  ;;  %1319 = vmatprep.subr.bf16.mxu0 %v722_v19  ;;  %v540_v18 = vunpack.c.l.s8.bf16 %v204_v59  ;;  %v132_v19 = vld [vmem:[#allocation5 + $0x78] sm:$0xff] }
 0x1bc   :  { %1360 = vmatprep.subr.bf16.mxu1 %v850_v20  ;;  %v196_v20 = vld [vmem:[#allocation5 + $0x278] sm:$0xff]  ;;  %v396_v26 = vunpack.c.l.s8.bf16 %v132_v19 }
 0x1bd   :  { %v532_v13 = vunpack.c.h.s8.bf16 %v196_v20  ;;  %v524_v27 = vunpack.c.l.s8.bf16 %v196_v20  ;;  %v227_v20 = vld [vmem:[#allocation5 + $0x370] sm:$0xff] }
 0x1be   :  { %1320 = vmatpush2.bf16.msra.mxu0 %v721_v22  ;;  %v131_v22 = vld [vmem:[#allocation5 + $0x70] sm:$0xff] }
 0x1bf   :  { %1361 = vmatpush2.bf16.msra.mxu1 %v849_v23  ;;  %1321 = vmatprep.subr.bf16.mxu0 %v714_v24  ;;  %v195_v23 = vld [vmem:[#allocation5 + $0x270] sm:$0xff]  ;;  %v403_v24 = vunpack.c.h.s8.bf16 %v131_v22 }
 0x1c0   :  { %1362 = vmatprep.subr.bf16.mxu1 %v842_v25  ;;  %v531_v25 = vunpack.c.h.s8.bf16 %v195_v23 }
 0x1c2   :  { %1322 = vmatpush2.bf16.msra.mxu0 %v713_v30  ;;  %v124_v30 = vld [vmem:[#allocation5 + $0x38] sm:$0xff] }
 0x1c3   :  { %1363 = vmatpush2.bf16.msra.mxu1 %v841_v31  ;;  %1323 = vmatprep.subr.bf16.mxu0 %v706_v32  ;;  %v188_v31 = vld [vmem:[#allocation5 + $0x238] sm:$0xff]  ;;  %v395_v32 = vunpack.c.l.s8.bf16 %v131_v22  ;;  %v388_v34 = vunpack.c.h.s8.bf16 %v124_v30  ;;  %v380_v42 = vunpack.c.l.s8.bf16 %v124_v30  ;;  %v155_v30 = vld [vmem:[#allocation5 + $0x130] sm:$0xff] }
 0x1c4   :  { %1364 = vmatprep.subr.bf16.mxu1 %v834_v33  ;;  %v523_v33 = vunpack.c.l.s8.bf16 %v195_v23  ;;  %v516_v35 = vunpack.c.h.s8.bf16 %v188_v31  ;;  %v508_v43 = vunpack.c.l.s8.bf16 %v188_v31  ;;  %v156_v22 = vld [vmem:[#allocation5 + $0x138] sm:$0xff]  ;;  %v219_v31 = vld [vmem:[#allocation5 + $0x330] sm:$0xff] }
 0x1c5   :  { %v220_v23 = vld [vmem:[#allocation5 + $0x338] sm:$0xff] }
 0x1c6   :  { %1324 = vmatpush2.bf16.msra.mxu0 %v705_v38  ;;  %v123_v38 = vld [vmem:[#allocation5 + $0x30] sm:$0xff] }
 0x1c7   :  { %1365 = vmatpush2.bf16.msra.mxu1 %v833_v39  ;;  %1325 = vmatprep.subr.bf16.mxu0 %v698_v40  ;;  %v187_v39 = vld [vmem:[#allocation5 + $0x230] sm:$0xff]  ;;  %v387_v40 = vunpack.c.h.s8.bf16 %v123_v38 }
 0x1c8   :  { %1366 = vmatprep.subr.bf16.mxu1 %v826_v41  ;;  %v515_v41 = vunpack.c.h.s8.bf16 %v187_v39 }
 0x1ca   :  { %1326 = vmatpush2.bf16.msra.mxu0 %v697_v44  ;;  %v180_v44 = vld [vmem:[#allocation5 + $0x1f8] sm:$0xff] }
 0x1cb   :  { %1367 = vmatpush2.bf16.msra.mxu1 %v825_v45  ;;  %1377 = vmatprep.subr.bf16.mxu0 %v436_v48  ;;  %v244_v45 = vld [vmem:[#allocation5 + $0x3f8] sm:$0xff]  ;;  %v379_v48 = vunpack.c.l.s8.bf16 %v123_v38  ;;  %v500_v50 = vunpack.c.h.s8.bf16 %v180_v44  ;;  %v492_v58 = vunpack.c.l.s8.bf16 %v180_v44  ;;  %v275_v44 = vld [vmem:[#allocation5 + $0x4f0] sm:$0xff] }
 0x1cc   :  { %1418 = vmatprep.subr.bf16.mxu1 %v564_v49  ;;  %v507_v49 = vunpack.c.l.s8.bf16 %v187_v39  ;;  %v628_v51 = vunpack.c.h.s8.bf16 %v244_v45  ;;  %v620_v59 = vunpack.c.l.s8.bf16 %v244_v45  ;;  %v276_v38 = vld [vmem:[#allocation5 + $0x4f8] sm:$0xff]  ;;  %v339_v45 = vld [vmem:[#allocation5 + $0x6f0] sm:$0xff] }
 0x1cd   :  { %v1083_v60 = vpop.f32.mrf.mxu0  ;;  %1328 = vmatmul.mubr.bf16.vlgmr.msra.gmra.mxu0 %v3483_v28  ;;  %v340_v39 = vld [vmem:[#allocation5 + $0x6f8] sm:$0xff] }
 0x1ce   :  { %v1124_v61 = vpop.f32.mrf.mxu1  ;;  %1369 = vmatmul.mubr.bf16.vlgmr.msra.gmra.mxu1 %v3485_v29  ;;  %1378 = vmatpush1.bf16.msra.mxu0 %v435_v52  ;;  %v179_v52 = vld [vmem:[#allocation5 + $0x1f0] sm:$0xff] }
 0x1cf   :  { %v3515_v62 = vadd.f32 %v1124_v61, %v1083_v60  ;;  %1419 = vmatpush1.bf16.msra.mxu1 %v563_v53  ;;  %v1085_v1 = vpop.f32.mrf.mxu0  ;;  %1379 = vmatprep.subr.bf16.mxu0 %v428_v54  ;;  %v243_v53 = vld [vmem:[#allocation5 + $0x3f0] sm:$0xff]  ;;  %v499_v54 = vunpack.c.h.s8.bf16 %v179_v52  ;;  %v172_v60 = vld [vmem:[#allocation5 + $0x1b8] sm:$0xff] }
 0x1d0   :  { %v1126_v2 = vpop.f32.mrf.mxu1  ;;  %1420 = vmatprep.subr.bf16.mxu1 %v556_v55  ;;  %1409 = vmatprep.mubr.bf16.mxu0 %v3465_v36  ;;  %v539_v36 = vunpack.c.l.s8.bf16 %v203_v7  ;;  %v627_v55 = vunpack.c.h.s8.bf16 %v243_v53  ;;  %v236_v61 = vld [vmem:[#allocation5 + $0x3b8] sm:$0xff] }
 0x1d1   :  { %v3517_v8 = vadd.f32 %v1126_v2, %v1085_v1  ;;  %1450 = vmatprep.mubr.bf16.mxu1 %v3467_v37  ;;  %v1087_v9 = vpop.f32.mrf.mxu0  ;;  %v404_v37 = vunpack.c.h.s8.bf16 %v132_v19  ;;  %v484_v1 = vunpack.c.h.s8.bf16 %v172_v60  ;;  %v612_v2 = vunpack.c.h.s8.bf16 %v236_v61  ;;  %v163_v19 = vld [vmem:[#allocation5 + $0x170] sm:$0xff] }
 0x1d2   :  { %v1128_v11 = vpop.f32.mrf.mxu1  ;;  %1380 = vmatpush1.bf16.msra.mxu0 %v427_v63  ;;  %v491_v63 = vunpack.c.l.s8.bf16 %v179_v52  ;;  %v476_v9 = vunpack.c.l.s8.bf16 %v172_v60  ;;  %v268_v52 = vld [vmem:[#allocation5 + $0x4b8] sm:$0xff]  ;;  %v811_v60 = vunpack.c.l.s8.bf16 %v339_v45 }
 0x1d3   :  { %1421 = vmatpush1.bf16.msra.mxu1 %v555_v0  ;;  %v1088_v15 = vpop.f32.mrf.mxu0  ;;  %1381 = vmatprep.subr.bf16.mxu0 %v420_v3  ;;  %v619_v0 = vunpack.c.l.s8.bf16 %v243_v53  ;;  %v171_v3 = vld [vmem:[#allocation5 + $0x1b0] sm:$0xff]  ;;  %v604_v11 = vunpack.c.l.s8.bf16 %v236_v61  ;;  %v332_v53 = vld [vmem:[#allocation5 + $0x6b8] sm:$0xff] }
 0x1d4   :  { %v1129_v16 = vpop.f32.mrf.mxu1  ;;  %1422 = vmatprep.subr.bf16.mxu1 %v548_v5  ;;  %v235_v5 = vld [vmem:[#allocation5 + $0x3b0] sm:$0xff]  ;;  %v483_v6 = vunpack.c.h.s8.bf16 %v171_v3  ;;  %v475_v15 = vunpack.c.l.s8.bf16 %v171_v3 }
 0x1d5   :  { %v611_v7 = vunpack.c.h.s8.bf16 %v235_v5  ;;  %v603_v16 = vunpack.c.l.s8.bf16 %v235_v5  ;;  %v331_v3 = vld [vmem:[#allocation5 + $0x6b0] sm:$0xff] }
 0x1d6   :  { %1382 = vmatpush1.bf16.msra.mxu0 %v419_v4  ;;  %v164_v4 = vld [vmem:[#allocation5 + $0x178] sm:$0xff] }
 0x1d7   :  { %1423 = vmatpush1.bf16.msra.mxu1 %v547_v12  ;;  %1383 = vmatprep.subr.bf16.mxu0 %v412_v17  ;;  %v228_v12 = vld [vmem:[#allocation5 + $0x378] sm:$0xff]  ;;  %v468_v17 = vunpack.c.h.s8.bf16 %v164_v4 }
 0x1d8   :  { %1424 = vmatprep.subr.bf16.mxu1 %v540_v18  ;;  %v596_v18 = vunpack.c.h.s8.bf16 %v228_v12 }
 0x1da   :  { %1384 = vmatpush1.bf16.msra.mxu0 %v411_v21  ;;  %v467_v21 = vunpack.c.h.s8.bf16 %v163_v19 }
 0x1db   :  { %1425 = vmatpush1.bf16.msra.mxu1 %v539_v36  ;;  %1385 = vmatprep.subr.bf16.mxu0 %v404_v37  ;;  %v595_v36 = vunpack.c.h.s8.bf16 %v227_v20  ;;  %v460_v37 = vunpack.c.l.s8.bf16 %v164_v4  ;;  %v796_v4 = vunpack.c.l.s8.bf16 %v332_v53 }
 0x1dc   :  { %1426 = vmatprep.subr.bf16.mxu1 %v532_v13  ;;  %v588_v13 = vunpack.c.l.s8.bf16 %v228_v12  ;;  %v260_v12 = vld [vmem:[#allocation5 + $0x478] sm:$0xff] }
 0x1de   :  { %1386 = vmatpush1.bf16.msra.mxu0 %v403_v24  ;;  %v459_v24 = vunpack.c.l.s8.bf16 %v163_v19  ;;  %v323_v19 = vld [vmem:[#allocation5 + $0x670] sm:$0xff] }
 0x1df   :  { %1427 = vmatpush1.bf16.msra.mxu1 %v531_v25  ;;  %1387 = vmatprep.subr.bf16.mxu0 %v396_v26  ;;  %v587_v25 = vunpack.c.l.s8.bf16 %v227_v20  ;;  %v452_v26 = vunpack.c.h.s8.bf16 %v156_v22 }
 0x1e0   :  { %1428 = vmatprep.subr.bf16.mxu1 %v524_v27  ;;  %v580_v27 = vunpack.c.h.s8.bf16 %v220_v23 }
 0x1e2   :  { %1388 = vmatpush1.bf16.msra.mxu0 %v395_v32  ;;  %v451_v32 = vunpack.c.h.s8.bf16 %v155_v30 }
 0x1e3   :  { %1429 = vmatpush1.bf16.msra.mxu1 %v523_v33  ;;  %1389 = vmatprep.subr.bf16.mxu0 %v388_v34  ;;  %v579_v33 = vunpack.c.h.s8.bf16 %v219_v31  ;;  %v444_v34 = vunpack.c.l.s8.bf16 %v156_v22  ;;  %v316_v22 = vld [vmem:[#allocation5 + $0x638] sm:$0xff] }
 0x1e4   :  { %1430 = vmatprep.subr.bf16.mxu1 %v516_v35  ;;  %v572_v35 = vunpack.c.l.s8.bf16 %v220_v23 }
 0x1e6   :  { %1390 = vmatpush1.bf16.msra.mxu0 %v387_v40  ;;  %v443_v40 = vunpack.c.l.s8.bf16 %v155_v30  ;;  %v315_v30 = vld [vmem:[#allocation5 + $0x630] sm:$0xff] }
 0x1e7   :  { %1431 = vmatpush1.bf16.msra.mxu1 %v515_v41  ;;  %1391 = vmatprep.subr.bf16.mxu0 %v380_v42  ;;  %v571_v41 = vunpack.c.l.s8.bf16 %v219_v31  ;;  %v692_v42 = vunpack.c.h.s8.bf16 %v276_v38 }
 0x1e8   :  { %1432 = vmatprep.subr.bf16.mxu1 %v508_v43  ;;  %v820_v43 = vunpack.c.h.s8.bf16 %v340_v39 }
 0x1ea   :  { %1392 = vmatpush1.bf16.msra.mxu0 %v379_v48  ;;  %v691_v48 = vunpack.c.h.s8.bf16 %v275_v44 }
 0x1eb   :  { %1433 = vmatpush1.bf16.msra.mxu1 %v507_v49  ;;  %1393 = vmatprep.subr.bf16.mxu0 %v500_v50  ;;  %v819_v49 = vunpack.c.h.s8.bf16 %v339_v45  ;;  %v684_v50 = vunpack.c.l.s8.bf16 %v276_v38  ;;  %v372_v38 = vld [vmem:[#allocation5 + $0x7f8] sm:$0xff] }
 0x1ec   :  { %1434 = vmatprep.subr.bf16.mxu1 %v628_v51  ;;  %v812_v51 = vunpack.c.l.s8.bf16 %v340_v39 }
 0x1ee   :  { %1394 = vmatpush2.bf16.msra.mxu0 %v499_v54 }
 0x1ef   :  { %1435 = vmatpush2.bf16.msra.mxu1 %v627_v55  ;;  %1395 = vmatprep.subr.bf16.mxu0 %v492_v58 }
 0x1f0   :  { %1436 = vmatprep.subr.bf16.mxu1 %v620_v59  ;;  %v683_v59 = vunpack.c.l.s8.bf16 %v275_v44  ;;  %v371_v44 = vld [vmem:[#allocation5 + $0x7f0] sm:$0xff] }
 0x1f2   :  { %1396 = vmatpush2.bf16.msra.mxu0 %v491_v63 }
 0x1f3   :  { %1437 = vmatpush2.bf16.msra.mxu1 %v619_v0  ;;  %1397 = vmatprep.subr.bf16.mxu0 %v484_v1  ;;  %v676_v0 = vunpack.c.h.s8.bf16 %v268_v52  ;;  %v804_v1 = vunpack.c.h.s8.bf16 %v332_v53  ;;  %v1543_v53 = vlaneseq }
 0x1f4   :  { %1438 = vmatprep.subr.bf16.mxu1 %v612_v2  ;;  %v267_v2 = vld [vmem:[#allocation5 + $0x4b0] sm:$0xff] }
 0x1f6   :  { %1398 = vmatpush2.bf16.msra.mxu0 %v483_v6  ;;  %v803_v6 = vunpack.c.h.s8.bf16 %v331_v3 }
 0x1f7   :  { %1439 = vmatpush2.bf16.msra.mxu1 %v611_v7  ;;  %1399 = vmatprep.subr.bf16.mxu0 %v476_v9 }
 0x1f8   :  { %1440 = vmatprep.subr.bf16.mxu1 %v604_v11  ;;  %v668_v11 = vunpack.c.l.s8.bf16 %v268_v52  ;;  %v364_v52 = vld [vmem:[#allocation5 + $0x7b8] sm:$0xff] }
 0x1fa   :  { %1400 = vmatpush2.bf16.msra.mxu0 %v475_v15  ;;  %v324_v15 = vld [vmem:[#allocation5 + $0x678] sm:$0xff] }
 0x1fb   :  { %1441 = vmatpush2.bf16.msra.mxu1 %v603_v16  ;;  %1401 = vmatprep.subr.bf16.mxu0 %v468_v17  ;;  %v667_v16 = vunpack.c.l.s8.bf16 %v267_v2  ;;  %v788_v17 = vunpack.c.h.s8.bf16 %v324_v15 }
 0x1fc   :  { %1442 = vmatprep.subr.bf16.mxu1 %v596_v18  ;;  %v259_v18 = vld [vmem:[#allocation5 + $0x470] sm:$0xff] }
 0x1fd   :  { %v659_v20 = vunpack.c.h.s8.bf16 %v259_v18  ;;  %v651_v23 = vunpack.c.l.s8.bf16 %v259_v18 }
 0x1fe   :  { %1402 = vmatpush2.bf16.msra.mxu0 %v467_v21  ;;  %v787_v21 = vunpack.c.h.s8.bf16 %v323_v19 }
 0x1ff   :  { %1443 = vmatpush2.bf16.msra.mxu1 %v595_v36  ;;  %1403 = vmatprep.subr.bf16.mxu0 %v460_v37  ;;  %v652_v36 = vunpack.c.l.s8.bf16 %v260_v12  ;;  %v780_v37 = vunpack.c.l.s8.bf16 %v324_v15  ;;  %v3542_v15 = vld [vmem:[#allocation7] sm:$0xff] }
 0x200   :  { %1444 = vmatprep.subr.bf16.mxu1 %v588_v13  ;;  %v252_v13 = vld [vmem:[#allocation5 + $0x438] sm:$0xff] }
 0x202   :  { %1404 = vmatpush2.bf16.msra.mxu0 %v459_v24  ;;  %v779_v24 = vunpack.c.l.s8.bf16 %v323_v19 }
 0x203   :  { %1445 = vmatpush2.bf16.msra.mxu1 %v587_v25  ;;  %1405 = vmatprep.subr.bf16.mxu0 %v452_v26  ;;  %v644_v25 = vunpack.c.h.s8.bf16 %v252_v13  ;;  %v772_v26 = vunpack.c.h.s8.bf16 %v316_v22 }
 0x204   :  { %1446 = vmatprep.subr.bf16.mxu1 %v580_v27  ;;  %v251_v27 = vld [vmem:[#allocation5 + $0x430] sm:$0xff] }
 0x205   :  { %v643_v31 = vunpack.c.h.s8.bf16 %v251_v27  ;;  %v635_v39 = vunpack.c.l.s8.bf16 %v251_v27 }
 0x206   :  { %1406 = vmatpush2.bf16.msra.mxu0 %v451_v32  ;;  %v771_v32 = vunpack.c.h.s8.bf16 %v315_v30 }
 0x207   :  { %1447 = vmatpush2.bf16.msra.mxu1 %v579_v33  ;;  %1407 = vmatprep.subr.bf16.mxu0 %v444_v34  ;;  %v636_v33 = vunpack.c.l.s8.bf16 %v252_v13  ;;  %v764_v34 = vunpack.c.l.s8.bf16 %v316_v22 }
 0x208   :  { %1448 = vmatprep.subr.bf16.mxu1 %v572_v35  ;;  %v308_v35 = vld [vmem:[#allocation5 + $0x5f8] sm:$0xff] }
 0x20a   :  { %1408 = vmatpush2.bf16.msra.mxu0 %v443_v40  ;;  %v763_v40 = vunpack.c.l.s8.bf16 %v315_v30 }
 0x20b   :  { %1449 = vmatpush2.bf16.msra.mxu1 %v571_v41  ;;  %1459 = vmatprep.subr.bf16.mxu0 %v692_v42  ;;  %v756_v41 = vunpack.c.h.s8.bf16 %v308_v35  ;;  %v884_v42 = vunpack.c.h.s8.bf16 %v372_v38 }
 0x20c   :  { %1500 = vmatprep.subr.bf16.mxu1 %v820_v43  ;;  %v307_v43 = vld [vmem:[#allocation5 + $0x5f0] sm:$0xff] }
 0x20d   :  { %v1165_v54 = vpop.f32.mrf.mxu0  ;;  %1410 = vmatmul.mubr.bf16.vlgmr.msra.gmra.mxu0 %v3471_v46  ;;  %v755_v45 = vunpack.c.h.s8.bf16 %v307_v43 }
 0x20e   :  { %v1206_v55 = vpop.f32.mrf.mxu1  ;;  %1451 = vmatmul.mubr.bf16.vlgmr.msra.gmra.mxu1 %v3473_v47  ;;  %v1166_v58 = vadd.f32 %v1165_v54, %v3515_v62  ;;  %1460 = vmatpush1.bf16.msra.mxu0 %v691_v48  ;;  %v675_v62 = vunpack.c.h.s8.bf16 %v267_v2  ;;  %v883_v48 = vunpack.c.h.s8.bf16 %v371_v44  ;;  %v747_v54 = vunpack.c.l.s8.bf16 %v307_v43  ;;  %v1754_v43 = vld [vmem:[#allocation10 + $0x2c8] sm:$0xff] }
 0x20f   :  { %1501 = vmatpush1.bf16.msra.mxu1 %v819_v49  ;;  %v3524_v61 = vpop.f32.mrf.mxu0  ;;  %1461 = vmatprep.subr.bf16.mxu0 %v684_v50  ;;  %v748_v49 = vunpack.c.l.s8.bf16 %v308_v35  ;;  %v876_v50 = vunpack.c.l.s8.bf16 %v372_v38 }
 0x210   :  { %v3526_v63 = vpop.f32.mrf.mxu1  ;;  %1502 = vmatprep.subr.bf16.mxu1 %v812_v51  ;;  %v3528_v5 = vadd.f32 %v1206_v55, %v1166_v58  ;;  %1491 = vmatprep.mubr.bf16.mxu0 %v3475_v56  ;;  %v795_v56 = vunpack.c.l.s8.bf16 %v331_v3  ;;  %v300_v51 = vld [vmem:[#allocation5 + $0x5b8] sm:$0xff]  ;;  %v875_v55 = vunpack.c.l.s8.bf16 %v371_v44 }
 0x211   :  { %1532 = vmatprep.mubr.bf16.mxu1 %v3477_v57  ;;  %v1169_v46 = vpop.f32.mrf.mxu0  ;;  %v660_v57 = vunpack.c.h.s8.bf16 %v260_v12  ;;  %v740_v58 = vunpack.c.h.s8.bf16 %v300_v51 }
 0x212   :  { %v1210_v47 = vpop.f32.mrf.mxu1  ;;  %1462 = vmatpush1.bf16.msra.mxu0 %v683_v59  ;;  %v868_v59 = vunpack.c.h.s8.bf16 %v364_v52  ;;  %v732_v46 = vunpack.c.l.s8.bf16 %v300_v51  ;;  %v1689_v51 = vld [vmem:[#allocation10 + $0xc0] sm:$0xff] }
 0x213   :  { %1503 = vmatpush1.bf16.msra.mxu1 %v811_v60  ;;  %v1170_v7 = vpop.f32.mrf.mxu0  ;;  %1463 = vmatprep.subr.bf16.mxu0 %v676_v0  ;;  %v299_v60 = vld [vmem:[#allocation5 + $0x5b0] sm:$0xff]  ;;  %v860_v47 = vunpack.c.l.s8.bf16 %v364_v52 }
 0x214   :  { %v1211_v9 = vpop.f32.mrf.mxu1  ;;  %1504 = vmatprep.subr.bf16.mxu1 %v804_v1  ;;  %v363_v0 = vld [vmem:[#allocation5 + $0x7b0] sm:$0xff]  ;;  %v3532_v1 = vshrl.u32 %v1543_v53, 7  ;;  %v739_v2 = vunpack.c.h.s8.bf16 %v299_v60  ;;  %v356_v7 = vld [vmem:[#allocation5 + $0x778] sm:$0xff] }
 0x215   :  { %v867_v3 = vunpack.c.h.s8.bf16 %v363_v0  ;;  %v1168_v9 = vadd.f32 %v3524_v61, %v3517_v8  ;;  %v859_v12 = vunpack.c.l.s8.bf16 %v363_v0  ;;  %v1753_v53 = vld [vmem:[#allocation10 + $0x2c0] sm:$0xff]  ;;  %v2098_v0 = vunpack.c.l.s8.bf16 %v1754_v43 }
 0x216   :  { %1464 = vmatpush1.bf16.msra.mxu0 %v675_v62  ;;  %v3535_v62 = vsub.s32 1, %v3532_v1 }
 0x217   :  { %1505 = vmatpush1.bf16.msra.mxu1 %v803_v6  ;;  %1465 = vmatprep.subr.bf16.mxu0 %v668_v11  ;;  %v292_v6 = vld [vmem:[#allocation5 + $0x578] sm:$0xff]  ;;  %v3540_v11 = vsub.s32 3, %v3532_v1  ;;  %v1209_v8 = vadd.f32 %v3526_v63, %v1168_v9  ;;  %v1969_v9 = vunpack.c.l.s8.bf16 %v1689_v51 }
 0x218   :  { %1506 = vmatprep.subr.bf16.mxu1 %v796_v4  ;;  %v731_v4 = vunpack.c.l.s8.bf16 %v299_v60  ;;  %v1550_v18 = vrot.slane %v3542_v15, %v3535_v62  ;;  %v348_v63 = vld [vmem:[#allocation5 + $0x738] sm:$0xff] }
 0x219   :  { %v1558_v61 = vrot.slane %v3542_v15, %v3540_v11 }
 0x21a   :  { %1466 = vmatpush1.bf16.msra.mxu0 %v667_v16  ;;  %v724_v16 = vunpack.c.h.s8.bf16 %v292_v6  ;;  %v1584_v13 = vmul.f32 %v1550_v18, %v3511_v14 }
 0x21b   :  { %1507 = vmatpush1.bf16.msra.mxu1 %v795_v56  ;;  %1467 = vmatprep.subr.bf16.mxu0 %v660_v57  ;;  %v852_v56 = vunpack.c.h.s8.bf16 %v356_v7  ;;  %v291_v57 = vld [vmem:[#allocation5 + $0x570] sm:$0xff] }
 0x21c   :  { %1508 = vmatprep.subr.bf16.mxu1 %v788_v17  ;;  %v355_v17 = vld [vmem:[#allocation5 + $0x770] sm:$0xff]  ;;  %v723_v19 = vunpack.c.h.s8.bf16 %v291_v57 }
 0x21d   :  { %v843_v27 = vunpack.c.l.s8.bf16 %v355_v17 }
 0x21e   :  { %1468 = vmatpush1.bf16.msra.mxu0 %v659_v20  ;;  %v851_v20 = vunpack.c.h.s8.bf16 %v355_v17 }
 0x21f   :  { %1509 = vmatpush1.bf16.msra.mxu1 %v787_v21  ;;  %1469 = vmatprep.subr.bf16.mxu0 %v652_v36  ;;  %v3549_v21 = vld [vmem:[#allocation8] sm:$0xff]  ;;  %v716_v36 = vunpack.c.l.s8.bf16 %v292_v6  ;;  %v1746_v6 = vld [vmem:[#allocation10 + $0x288] sm:$0xff] }
 0x220   :  { %1510 = vmatprep.subr.bf16.mxu1 %v780_v37  ;;  %v844_v37 = vunpack.c.l.s8.bf16 %v356_v7  ;;  %v1600_v22 = vrot.slane %v3549_v21, %v3535_v62 }
 0x222   :  { %1470 = vmatpush1.bf16.msra.mxu0 %v651_v23  ;;  %v284_v23 = vld [vmem:[#allocation5 + $0x538] sm:$0xff]  ;;  %v1634_v14 = vadd.f32 %v1600_v22, %v1584_v13 }
 0x223   :  { %1511 = vmatpush1.bf16.msra.mxu1 %v779_v24  ;;  %1471 = vmatprep.subr.bf16.mxu0 %v644_v25  ;;  %v1586_v24 = vmul.f32 %v1558_v61, %v1209_v8  ;;  %v1608_v25 = vrot.slane %v3549_v21, %v3540_v11  ;;  %v708_v30 = vunpack.c.h.s8.bf16 %v284_v23  ;;  %v1674_v13 = vld [vmem:[#allocation10 + $0x48] sm:$0xff] }
 0x224   :  { %1512 = vmatprep.subr.bf16.mxu1 %v772_v26  ;;  %v715_v26 = vunpack.c.l.s8.bf16 %v291_v57  ;;  %v1681_v57 = vld [vmem:[#allocation10 + $0x80] sm:$0xff]  ;;  %v1738_v22 = vld [vmem:[#allocation10 + $0x248] sm:$0xff] }
 0x225   :  { %v1961_v8 = vunpack.c.h.s8.bf16 %v1681_v57 }
 0x226   :  { %1472 = vmatpush1.bf16.msra.mxu0 %v643_v31  ;;  %v836_v31 = vunpack.c.h.s8.bf16 %v348_v63 }
 0x227   :  { %1513 = vmatpush1.bf16.msra.mxu1 %v771_v32  ;;  %1473 = vmatprep.subr.bf16.mxu0 %v636_v33  ;;  %v283_v32 = vld [vmem:[#allocation5 + $0x530] sm:$0xff] }
 0x228   :  { %1514 = vmatprep.subr.bf16.mxu1 %v764_v34  ;;  %v347_v33 = vld [vmem:[#allocation5 + $0x730] sm:$0xff]  ;;  %v1636_v34 = vadd.f32 %v1608_v25, %v1586_v24  ;;  %v707_v35 = vunpack.c.h.s8.bf16 %v283_v32  ;;  %v1946_v24 = vunpack.c.h.s8.bf16 %v1674_v13 }
 0x229   :  { %v835_v38 = vunpack.c.h.s8.bf16 %v347_v33  ;;  %v1673_v25 = vld [vmem:[#allocation10 + $0x40] sm:$0xff] }
 0x22a   :  { %1474 = vmatpush1.bf16.msra.mxu0 %v635_v39  ;;  %v700_v39 = vunpack.c.l.s8.bf16 %v284_v23  ;;  %v1644_v44 = vmax.f32 %v1636_v34, 0.0  ;;  %v1953_v23 = vunpack.c.l.s8.bf16 %v1681_v57  ;;  %v1730_v34 = vld [vmem:[#allocation10 + $0x208] sm:$0xff]  ;;  %v1713_v57 = vld [vmem:[#allocation10 + $0x180] sm:$0xff] }
 0x22b   :  { %1515 = vmatpush1.bf16.msra.mxu1 %v763_v40  ;;  %1475 = vmatprep.subr.bf16.mxu0 %v756_v41  ;;  %v828_v40 = vunpack.c.l.s8.bf16 %v348_v63  ;;  %v1642_v41 = vmax.f32 %v1634_v14, 0.0  ;;  %v1666_v14 = vld [vmem:[#allocation10 + $0x8] sm:$0xff] }
 0x22c   :  { %1516 = vmatprep.subr.bf16.mxu1 %v884_v42  ;;  %v1690_v42 = vld [vmem:[#allocation10 + $0xc8] sm:$0xff] }
 0x22d   :  { %v1650_v52 = vmul.f32 %v1642_v41, %v1642_v41  ;;  %v1970_v60 = vunpack.c.l.s8.bf16 %v1690_v42  ;;  %v2058_v41 = vunpack.c.h.s8.bf16 %v1730_v34 }
 0x22e   :  { %1476 = vmatpush2.bf16.msra.mxu0 %v755_v45  ;;  %v699_v45 = vunpack.c.l.s8.bf16 %v283_v32  ;;  %v1938_v32 = vunpack.c.l.s8.bf16 %v1674_v13  ;;  %v2017_v13 = vunpack.c.l.s8.bf16 %v1713_v57 }
 0x22f   :  { %1517 = vmatpush2.bf16.msra.mxu1 %v883_v48  ;;  %1477 = vmatprep.subr.bf16.mxu0 %v748_v49  ;;  %v827_v48 = vunpack.c.l.s8.bf16 %v347_v33  ;;  %v1978_v49 = vunpack.c.h.s8.bf16 %v1690_v42  ;;  %v2066_v33 = vunpack.c.l.s8.bf16 %v1738_v22  ;;  %v1729_v42 = vld [vmem:[#allocation10 + $0x200] sm:$0xff] }
 0x230   :  { %1518 = vmatprep.subr.bf16.mxu1 %v876_v50  ;;  %v2106_v50 = vunpack.c.h.s8.bf16 %v1754_v43 }
 0x232   :  { %1478 = vmatpush2.bf16.msra.mxu0 %v747_v54  ;;  %v1652_v54 = vmul.f32 %v1644_v44, %v1644_v44  ;;  %v2057_v44 = vunpack.c.h.s8.bf16 %v1729_v42 }
 0x233   :  { %1519 = vmatpush2.bf16.msra.mxu1 %v875_v55  ;;  %1479 = vmatprep.subr.bf16.mxu0 %v740_v58  ;;  %v1977_v55 = vunpack.c.h.s8.bf16 %v1689_v51  ;;  %v2105_v58 = vunpack.c.h.s8.bf16 %v1753_v53 }
 0x234   :  { %1520 = vmatprep.subr.bf16.mxu1 %v868_v59  ;;  %v3556_v59 = vpack.c.bf16 %v1650_v52, %v1650_v52  ;;  %v2049_v52 = vunpack.c.l.s8.bf16 %v1729_v42 }
 0x236   :  { %1480 = vmatpush2.bf16.msra.mxu0 %v739_v2  ;;  %v1682_v2 = vld [vmem:[#allocation10 + $0x88] sm:$0xff] }
 0x237   :  { %1521 = vmatpush2.bf16.msra.mxu1 %v867_v3  ;;  %1481 = vmatprep.subr.bf16.mxu0 %v732_v46  ;;  %v3558_v3 = vpack.c.bf16 %v1652_v54, %v1652_v54  ;;  %v1721_v54 = vld [vmem:[#allocation10 + $0x1c0] sm:$0xff] }
 0x238   :  { %1522 = vmatprep.subr.bf16.mxu1 %v860_v47 }
 0x23a   :  { %1482 = vmatpush2.bf16.msra.mxu0 %v731_v4 }
 0x23b   :  { %1523 = vmatpush2.bf16.msra.mxu1 %v859_v12  ;;  %1483 = vmatprep.subr.bf16.mxu0 %v724_v16  ;;  %v2097_v16 = vunpack.c.l.s8.bf16 %v1753_v53 }
 0x23c   :  { %1524 = vmatprep.subr.bf16.mxu1 %v852_v56  ;;  %v1962_v56 = vunpack.c.h.s8.bf16 %v1682_v2 }
 0x23e   :  { %1484 = vmatpush2.bf16.msra.mxu0 %v723_v19 }
 0x23f   :  { %1525 = vmatpush2.bf16.msra.mxu1 %v851_v20  ;;  %1485 = vmatprep.subr.bf16.mxu0 %v716_v36  ;;  %v1954_v36 = vunpack.c.l.s8.bf16 %v1682_v2 }
 0x240   :  { %1526 = vmatprep.subr.bf16.mxu1 %v844_v37  ;;  %v2082_v37 = vunpack.c.l.s8.bf16 %v1746_v6 }
 0x242   :  { %1486 = vmatpush2.bf16.msra.mxu0 %v715_v26  ;;  %v2074_v26 = vunpack.c.h.s8.bf16 %v1738_v22 }
 0x243   :  { %1527 = vmatpush2.bf16.msra.mxu1 %v843_v27  ;;  %1487 = vmatprep.subr.bf16.mxu0 %v708_v30  ;;  %v1737_v27 = vld [vmem:[#allocation10 + $0x240] sm:$0xff]  ;;  %v1945_v30 = vunpack.c.h.s8.bf16 %v1673_v25 }
 0x244   :  { %1528 = vmatprep.subr.bf16.mxu1 %v836_v31  ;;  %v2073_v31 = vunpack.c.h.s8.bf16 %v1737_v27 }
 0x246   :  { %1488 = vmatpush2.bf16.msra.mxu0 %v707_v35  ;;  %v1937_v35 = vunpack.c.l.s8.bf16 %v1673_v25 }
 0x247   :  { %1529 = vmatpush2.bf16.msra.mxu1 %v835_v38  ;;  %1489 = vmatprep.subr.bf16.mxu0 %v700_v39  ;;  %v2065_v38 = vunpack.c.l.s8.bf16 %v1737_v27  ;;  %v1930_v39 = vunpack.c.h.s8.bf16 %v1666_v14  ;;  %v1769_v27 = vld [vmem:[#allocation10 + $0x340] sm:$0xff] }
 0x248   :  { %1530 = vmatprep.subr.bf16.mxu1 %v828_v40  ;;  %v1665_v40 = vld [vmem:[#allocation10] sm:$0xff] }
 0x249   :  { %v1929_v43 = vunpack.c.h.s8.bf16 %v1665_v40  ;;  %v1921_v51 = vunpack.c.l.s8.bf16 %v1665_v40  ;;  %v1762_v40 = vld [vmem:[#allocation10 + $0x308] sm:$0xff] }
 0x24a   :  { %1490 = vmatpush2.bf16.msra.mxu0 %v699_v45  ;;  %v1922_v45 = vunpack.c.l.s8.bf16 %v1666_v14 }
 0x24b   :  { %1531 = vmatpush2.bf16.msra.mxu1 %v827_v48  ;;  %2433 = vmatprep.subr.bf16.mxu0 %v1978_v49  ;;  %v2050_v48 = vunpack.c.l.s8.bf16 %v1730_v34  ;;  %v1722_v49 = vld [vmem:[#allocation10 + $0x1c8] sm:$0xff] }
 0x24c   :  { %2474 = vmatprep.subr.bf16.mxu1 %v2106_v50  ;;  %v1786_v50 = vld [vmem:[#allocation10 + $0x3c8] sm:$0xff]  ;;  %v2042_v53 = vunpack.c.h.s8.bf16 %v1722_v49  ;;  %v2034_v2 = vunpack.c.l.s8.bf16 %v1722_v49  ;;  %v1761_v49 = vld [vmem:[#allocation10 + $0x300] sm:$0xff] }
 0x24d   :  { %v1247_v46 = vpop.f32.mrf.mxu0  ;;  %1492 = vmatmul.mubr.bf16.vlgmr.msra.gmra.mxu0 %v3483_v28  ;;  %v2090_v28 = vunpack.c.h.s8.bf16 %v1746_v6  ;;  %v1778_v6 = vld [vmem:[#allocation10 + $0x388] sm:$0xff] }
 0x24e   :  { %v1288_v47 = vpop.f32.mrf.mxu1  ;;  %1533 = vmatmul.mubr.bf16.vlgmr.msra.gmra.mxu1 %v3485_v29  ;;  %2434 = vmatpush1.bf16.msra.mxu0 %v1977_v55  ;;  %v1745_v29 = vld [vmem:[#allocation10 + $0x280] sm:$0xff]  ;;  %v2170_v55 = vunpack.c.h.s8.bf16 %v1786_v50 }
 0x24f   :  { %v3562_v7 = vadd.f32 %v1288_v47, %v1247_v46  ;;  %2465 = vmatprep.mubr.bf16.mxu0 %v3556_v59  ;;  %2475 = vmatpush1.bf16.msra.mxu1 %v2105_v58  ;;  %v3566_v4 = vpop.f32.mrf.mxu0  ;;  %v2089_v20 = vunpack.c.h.s8.bf16 %v1745_v29  ;;  %v2081_v63 = vunpack.c.l.s8.bf16 %v1745_v29  ;;  %v1785_v58 = vld [vmem:[#allocation10 + $0x3c0] sm:$0xff]  ;;  %v2162_v46 = vunpack.c.l.s8.bf16 %v1786_v50  ;;  %v1714_v47 = vld [vmem:[#allocation10 + $0x188] sm:$0xff] }
 0x250   :  { %2506 = vmatprep.mubr.bf16.mxu1 %v3558_v3  ;;  %v3568_v12 = vpop.f32.mrf.mxu1  ;;  %2435 = vmatprep.subr.bf16.mxu0 %v1970_v60  ;;  %v2041_v60 = vunpack.c.h.s8.bf16 %v1721_v54  ;;  %v1777_v29 = vld [vmem:[#allocation10 + $0x380] sm:$0xff] }
 0x251   :  { %2476 = vmatprep.subr.bf16.mxu1 %v2098_v0  ;;  %v1251_v17 = vpop.f32.mrf.mxu0  ;;  %v2169_v0 = vunpack.c.h.s8.bf16 %v1785_v58 }
 0x252   :  { %v1292_v18 = vpop.f32.mrf.mxu1  ;;  %2436 = vmatpush1.bf16.msra.mxu0 %v1969_v9  ;;  %v2033_v9 = vunpack.c.l.s8.bf16 %v1721_v54  ;;  %v2025_v17 = vunpack.c.h.s8.bf16 %v1713_v57  ;;  %v2114_v54 = vunpack.c.l.s8.bf16 %v1762_v40 }
 0x253   :  { %2477 = vmatpush1.bf16.msra.mxu1 %v2097_v16  ;;  %v1252_v61 = vpop.f32.mrf.mxu0  ;;  %2437 = vmatprep.subr.bf16.mxu0 %v1962_v56  ;;  %v2161_v16 = vunpack.c.l.s8.bf16 %v1785_v58  ;;  %v2026_v56 = vunpack.c.h.s8.bf16 %v1714_v47  ;;  %v3571_v18 = vsub.s32 0, %v3532_v1  ;;  %v1882_v58 = vld [vmem:[#allocation10 + $0x6c8] sm:$0xff] }
 0x254   :  { %v1293_v19 = vpop.f32.mrf.mxu1  ;;  %2478 = vmatprep.subr.bf16.mxu1 %v2090_v28  ;;  %v2154_v28 = vunpack.c.h.s8.bf16 %v1778_v6  ;;  %v2018_v61 = vunpack.c.l.s8.bf16 %v1714_v47  ;;  %v1817_v47 = vld [vmem:[#allocation10 + $0x4c0] sm:$0xff] }
 0x255   :  { %v3574_v19 = vsub.s32 2, %v3532_v1  ;;  %v1546_v22 = vrot.slane %v3542_v15, %v3571_v18 }
 0x256   :  { %2438 = vmatpush1.bf16.msra.mxu0 %v1961_v8  ;;  %v2153_v8 = vunpack.c.h.s8.bf16 %v1777_v29 }
 0x257   :  { %2479 = vmatpush1.bf16.msra.mxu1 %v2089_v20  ;;  %2439 = vmatprep.subr.bf16.mxu0 %v1954_v36  ;;  %v2146_v20 = vunpack.c.l.s8.bf16 %v1778_v6  ;;  %v1706_v36 = vld [vmem:[#allocation10 + $0x148] sm:$0xff]  ;;  %v1554_v25 = vrot.slane %v3542_v15, %v3574_v19 }
 0x258   :  { %2480 = vmatprep.subr.bf16.mxu1 %v2082_v37  ;;  %v1770_v37 = vld [vmem:[#allocation10 + $0x348] sm:$0xff]  ;;  %v2002_v14 = vunpack.c.l.s8.bf16 %v1706_v36 }
 0x259   :  { %v1585_v34 = vmul.f32 %v1554_v25, %v3528_v5 }
 0x25a   :  { %2440 = vmatpush1.bf16.msra.mxu0 %v1953_v23  ;;  %v2145_v23 = vunpack.c.l.s8.bf16 %v1777_v29 }
 0x25b   :  { %2481 = vmatpush1.bf16.msra.mxu1 %v2081_v63  ;;  %2441 = vmatprep.subr.bf16.mxu0 %v1946_v24  ;;  %v2010_v63 = vunpack.c.h.s8.bf16 %v1706_v36  ;;  %v1705_v24 = vld [vmem:[#allocation10 + $0x140] sm:$0xff] }
 0x25c   :  { %2482 = vmatprep.subr.bf16.mxu1 %v2074_v26  ;;  %v2138_v26 = vunpack.c.h.s8.bf16 %v1770_v37 }
 0x25e   :  { %2442 = vmatpush1.bf16.msra.mxu0 %v1945_v30  ;;  %v2009_v30 = vunpack.c.h.s8.bf16 %v1705_v24 }
 0x25f   :  { %2483 = vmatpush1.bf16.msra.mxu1 %v2073_v31  ;;  %2443 = vmatprep.subr.bf16.mxu0 %v1938_v32  ;;  %v1583_v31 = vmul.f32 %v1546_v22, %v3506_v10  ;;  %v1596_v32 = vrot.slane %v3549_v21, %v3571_v18  ;;  %v2129_v10 = vunpack.c.l.s8.bf16 %v1769_v27  ;;  %v1291_v22 = vadd.f32 %v3568_v12, %v3566_v4 }
 0x260   :  { %2484 = vmatprep.subr.bf16.mxu1 %v2066_v33  ;;  %v2137_v33 = vunpack.c.h.s8.bf16 %v1769_v27 }
 0x261   :  { %v1633_v42 = vadd.f32 %v1596_v32, %v1583_v31 }
 0x262   :  { %2444 = vmatpush1.bf16.msra.mxu0 %v1937_v35  ;;  %v1604_v35 = vrot.slane %v3549_v21, %v3574_v19 }
 0x263   :  { %2485 = vmatpush1.bf16.msra.mxu1 %v2065_v38  ;;  %2445 = vmatprep.subr.bf16.mxu0 %v1930_v39  ;;  %v2130_v38 = vunpack.c.l.s8.bf16 %v1770_v37  ;;  %v1698_v39 = vld [vmem:[#allocation10 + $0x108] sm:$0xff]  ;;  %v1641_v50 = vmax.f32 %v1633_v42, 0.0 }
 0x264   :  { %2486 = vmatprep.subr.bf16.mxu1 %v2058_v41  ;;  %v2001_v41 = vunpack.c.l.s8.bf16 %v1705_v24 }
 0x266   :  { %2446 = vmatpush1.bf16.msra.mxu0 %v1929_v43  ;;  %v1994_v43 = vunpack.c.h.s8.bf16 %v1698_v39 }
 0x267   :  { %2487 = vmatpush1.bf16.msra.mxu1 %v2057_v44  ;;  %2447 = vmatprep.subr.bf16.mxu0 %v1922_v45  ;;  %v1697_v44 = vld [vmem:[#allocation10 + $0x100] sm:$0xff]  ;;  %v1635_v45 = vadd.f32 %v1604_v35, %v1585_v34 }
 0x268   :  { %2488 = vmatprep.subr.bf16.mxu1 %v2050_v48  ;;  %v2122_v48 = vunpack.c.h.s8.bf16 %v1762_v40  ;;  %v1993_v5 = vunpack.c.h.s8.bf16 %v1697_v44 }
 0x26a   :  { %2448 = vmatpush1.bf16.msra.mxu0 %v1921_v51  ;;  %v2121_v51 = vunpack.c.h.s8.bf16 %v1761_v49 }
 0x26b   :  { %2489 = vmatpush1.bf16.msra.mxu1 %v2049_v52  ;;  %2449 = vmatprep.subr.bf16.mxu0 %v2042_v53  ;;  %v1986_v52 = vunpack.c.l.s8.bf16 %v1698_v39  ;;  %v1643_v53 = vmax.f32 %v1635_v45, 0.0 }
 0x26c   :  { %2490 = vmatprep.subr.bf16.mxu1 %v2170_v55  ;;  %v1818_v55 = vld [vmem:[#allocation10 + $0x4c8] sm:$0xff] }
 0x26d   :  { %v1651_v6 = vmul.f32 %v1643_v53, %v1643_v53  ;;  %v1865_v53 = vld [vmem:[#allocation10 + $0x640] sm:$0xff] }
 0x26e   :  { %2450 = vmatpush2.bf16.msra.mxu0 %v2041_v60  ;;  %v1985_v60 = vunpack.c.l.s8.bf16 %v1697_v44  ;;  %v1866_v44 = vld [vmem:[#allocation10 + $0x648] sm:$0xff] }
 0x26f   :  { %2491 = vmatpush2.bf16.msra.mxu1 %v2169_v0  ;;  %2451 = vmatprep.subr.bf16.mxu0 %v2034_v2  ;;  %v1649_v0 = vmul.f32 %v1641_v50, %v1641_v50  ;;  %v2113_v2 = vunpack.c.l.s8.bf16 %v1761_v49 }
 0x270   :  { %2492 = vmatprep.subr.bf16.mxu1 %v2162_v46  ;;  %v2234_v46 = vunpack.c.h.s8.bf16 %v1818_v55 }
 0x271   :  { %v3586_v57 = vpack.c.bf16 %v1649_v0, %v1649_v0 }
 0x272   :  { %2452 = vmatpush2.bf16.msra.mxu0 %v2033_v9  ;;  %v2362_v9 = vunpack.c.h.s8.bf16 %v1882_v58 }
 0x273   :  { %2493 = vmatpush2.bf16.msra.mxu1 %v2161_v16  ;;  %2453 = vmatprep.subr.bf16.mxu0 %v2026_v56  ;;  %v1881_v16 = vld [vmem:[#allocation10 + $0x6c0] sm:$0xff]  ;;  %v2233_v56 = vunpack.c.h.s8.bf16 %v1817_v47 }
 0x274   :  { %2494 = vmatprep.subr.bf16.mxu1 %v2154_v28  ;;  %v2226_v28 = vunpack.c.l.s8.bf16 %v1818_v55  ;;  %v2361_v29 = vunpack.c.h.s8.bf16 %v1881_v16  ;;  %v2353_v27 = vunpack.c.l.s8.bf16 %v1881_v16  ;;  %v1793_v16 = vld [vmem:[#allocation10 + $0x400] sm:$0xff] }
 0x276   :  { %2454 = vmatpush2.bf16.msra.mxu0 %v2025_v17  ;;  %v3588_v17 = vpack.c.bf16 %v1651_v6, %v1651_v6 }
 0x277   :  { %2495 = vmatpush2.bf16.msra.mxu1 %v2153_v8  ;;  %2455 = vmatprep.subr.bf16.mxu0 %v2018_v61  ;;  %v3591_v8 = vsub.s32 5, %v3532_v1  ;;  %v1810_v61 = vld [vmem:[#allocation10 + $0x488] sm:$0xff] }
 0x278   :  { %2496 = vmatprep.subr.bf16.mxu1 %v2146_v20  ;;  %v2354_v20 = vunpack.c.l.s8.bf16 %v1882_v58  ;;  %v2218_v25 = vunpack.c.h.s8.bf16 %v1810_v61  ;;  %v2210_v40 = vunpack.c.l.s8.bf16 %v1810_v61  ;;  %v2185_v61 = vunpack.c.h.s8.bf16 %v1793_v16 }
 0x279   :  { %v1566_v31 = vrot.slane %v3542_v15, %v3591_v8  ;;  %v1616_v34 = vrot.slane %v3549_v21, %v3591_v8 }
 0x27a   :  { %2456 = vmatpush2.bf16.msra.mxu0 %v2017_v13  ;;  %v1874_v13 = vld [vmem:[#allocation10 + $0x688] sm:$0xff] }
 0x27b   :  { %2497 = vmatpush2.bf16.msra.mxu1 %v2145_v23  ;;  %2457 = vmatprep.subr.bf16.mxu0 %v2010_v63  ;;  %v2225_v23 = vunpack.c.l.s8.bf16 %v1817_v47  ;;  %v2346_v32 = vunpack.c.h.s8.bf16 %v1874_v13  ;;  %v1858_v47 = vld [vmem:[#allocation10 + $0x608] sm:$0xff] }
 0x27c   :  { %2498 = vmatprep.subr.bf16.mxu1 %v2138_v26  ;;  %v1809_v26 = vld [vmem:[#allocation10 + $0x480] sm:$0xff] }
 0x27d   :  { %v2217_v35 = vunpack.c.h.s8.bf16 %v1809_v26 }
 0x27e   :  { %2458 = vmatpush2.bf16.msra.mxu0 %v2009_v30 }
 0x27f   :  { %2499 = vmatpush2.bf16.msra.mxu1 %v2137_v33  ;;  %2459 = vmatprep.subr.bf16.mxu0 %v2002_v14  ;;  %v1873_v33 = vld [vmem:[#allocation10 + $0x680] sm:$0xff] }
 0x280   :  { %2500 = vmatprep.subr.bf16.mxu1 %v2130_v38  ;;  %v2337_v50 = vunpack.c.l.s8.bf16 %v1873_v33 }
 0x282   :  { %2460 = vmatpush2.bf16.msra.mxu0 %v2001_v41  ;;  %v2345_v41 = vunpack.c.h.s8.bf16 %v1873_v33 }
 0x283   :  { %2501 = vmatpush2.bf16.msra.mxu1 %v2129_v10  ;;  %2461 = vmatprep.subr.bf16.mxu0 %v1994_v43  ;;  %v1802_v10 = vld [vmem:[#allocation10 + $0x448] sm:$0xff]  ;;  %v2338_v43 = vunpack.c.l.s8.bf16 %v1874_v13 }
 0x284   :  { %2502 = vmatprep.subr.bf16.mxu1 %v2122_v48  ;;  %v2209_v48 = vunpack.c.l.s8.bf16 %v1809_v26  ;;  %v2202_v49 = vunpack.c.h.s8.bf16 %v1802_v10  ;;  %v2194_v58 = vunpack.c.l.s8.bf16 %v1802_v10  ;;  %v1849_v26 = vld [vmem:[#allocation10 + $0x5c0] sm:$0xff] }
 0x286   :  { %2462 = vmatpush2.bf16.msra.mxu0 %v1993_v5  ;;  %v1801_v5 = vld [vmem:[#allocation10 + $0x440] sm:$0xff] }
 0x287   :  { %2503 = vmatpush2.bf16.msra.mxu1 %v2121_v51  ;;  %2463 = vmatprep.subr.bf16.mxu0 %v1986_v52  ;;  %v2330_v52 = vunpack.c.h.s8.bf16 %v1866_v44  ;;  %v2201_v55 = vunpack.c.h.s8.bf16 %v1801_v5  ;;  %v2193_v6 = vunpack.c.l.s8.bf16 %v1801_v5 }
 0x288   :  { %2504 = vmatprep.subr.bf16.mxu1 %v2114_v54 }
 0x28a   :  { %2464 = vmatpush2.bf16.msra.mxu0 %v1985_v60  ;;  %v2329_v60 = vunpack.c.h.s8.bf16 %v1865_v53 }
 0x28b   :  { %2505 = vmatpush2.bf16.msra.mxu1 %v2113_v2  ;;  %2515 = vmatprep.subr.bf16.mxu0 %v2234_v46  ;;  %v1794_v2 = vld [vmem:[#allocation10 + $0x408] sm:$0xff]  ;;  %v2322_v46 = vunpack.c.l.s8.bf16 %v1866_v44  ;;  %v3611_v44 = vsub.s32 4, %v3532_v1 }
 0x28c   :  { %2556 = vmatprep.subr.bf16.mxu1 %v2362_v9  ;;  %v2186_v9 = vunpack.c.h.s8.bf16 %v1794_v2 }
 0x28d   :  { %v3593_v36 = vpop.f32.mrf.mxu0  ;;  %2466 = vmatmul.mubr.bf16.vlgmr.msra.gmra.mxu0 %v3586_v57 }
 0x28e   :  { %v3595_v37 = vpop.f32.mrf.mxu1  ;;  %2507 = vmatmul.mubr.bf16.vlgmr.msra.gmra.mxu1 %v3588_v17  ;;  %2516 = vmatpush1.bf16.msra.mxu0 %v2233_v56  ;;  %v2321_v56 = vunpack.c.l.s8.bf16 %v1865_v53  ;;  %v1562_v53 = vrot.slane %v3542_v15, %v3611_v44 }
 0x28f   :  { %v1331_v63 = vpop.f32.mrf.mxu0  ;;  %2517 = vmatprep.subr.bf16.mxu0 %v2226_v28  ;;  %2557 = vmatpush1.bf16.msra.mxu1 %v2361_v29  ;;  %v2314_v28 = vunpack.c.h.s8.bf16 %v1858_v47  ;;  %v1857_v29 = vld [vmem:[#allocation10 + $0x600] sm:$0xff] }
 0x290   :  { %v1372_v24 = vpop.f32.mrf.mxu1  ;;  %v1332_v30 = vadd.f32 %v1331_v63, %v1291_v22  ;;  %2558 = vmatprep.subr.bf16.mxu1 %v2354_v20  ;;  %v2178_v20 = vunpack.c.l.s8.bf16 %v1794_v2  ;;  %v2313_v13 = vunpack.c.h.s8.bf16 %v1857_v29  ;;  %v1850_v22 = vld [vmem:[#allocation10 + $0x5c8] sm:$0xff] }
 0x291   :  { %v1333_v14 = vpop.f32.mrf.mxu0  ;;  %v1914_v63 = vld [vmem:[#allocation10 + $0x7c8] sm:$0xff]  ;;  %v2290_v33 = vunpack.c.l.s8.bf16 %v1850_v22 }
 0x292   :  { %v1374_v4 = vpop.f32.mrf.mxu1  ;;  %v1373_v12 = vadd.f32 %v1372_v24, %v1332_v30  ;;  %2518 = vmatpush1.bf16.msra.mxu0 %v2225_v23  ;;  %v2306_v23 = vunpack.c.l.s8.bf16 %v1858_v47  ;;  %v2177_v24 = vunpack.c.l.s8.bf16 %v1793_v16  ;;  %v2426_v30 = vunpack.c.h.s8.bf16 %v1914_v63 }
 0x293   :  { %v1334_v38 = vpop.f32.mrf.mxu0  ;;  %2519 = vmatprep.subr.bf16.mxu0 %v2218_v25  ;;  %2559 = vmatpush1.bf16.msra.mxu1 %v2353_v27  ;;  %v2298_v25 = vunpack.c.h.s8.bf16 %v1850_v22  ;;  %v2305_v27 = vunpack.c.l.s8.bf16 %v1857_v29  ;;  %v1842_v4 = vld [vmem:[#allocation10 + $0x588] sm:$0xff]  ;;  %v1825_v29 = vld [vmem:[#allocation10 + $0x500] sm:$0xff] }
 0x294   :  { %v1375_v39 = vpop.f32.mrf.mxu1  ;;  %v1588_v42 = vmul.f32 %v1566_v31, %v1373_v12  ;;  %2560 = vmatprep.subr.bf16.mxu1 %v2346_v32  ;;  %v1913_v31 = vld [vmem:[#allocation10 + $0x7c0] sm:$0xff]  ;;  %v2297_v32 = vunpack.c.h.s8.bf16 %v1849_v26  ;;  %v2418_v12 = vunpack.c.l.s8.bf16 %v1914_v63  ;;  %v2282_v38 = vunpack.c.h.s8.bf16 %v1842_v4 }
 0x295   :  { %v2425_v14 = vunpack.c.h.s8.bf16 %v1913_v31  ;;  %v1841_v39 = vld [vmem:[#allocation10 + $0x580] sm:$0xff] }
 0x296   :  { %v1638_v45 = vadd.f32 %v1616_v34, %v1588_v42  ;;  %2520 = vmatpush1.bf16.msra.mxu0 %v2217_v35  ;;  %v1906_v34 = vld [vmem:[#allocation10 + $0x788] sm:$0xff]  ;;  %v2289_v35 = vunpack.c.l.s8.bf16 %v1849_v26  ;;  %v1905_v42 = vld [vmem:[#allocation10 + $0x780] sm:$0xff]  ;;  %v2281_v10 = vunpack.c.h.s8.bf16 %v1841_v39  ;;  %v3618_v26 = vld [vmem:[#allocation10 + $0x2d8] sm:$0xff] }
 0x297   :  { %2521 = vmatprep.subr.bf16.mxu0 %v2210_v40  ;;  %2561 = vmatpush1.bf16.msra.mxu1 %v2345_v41  ;;  %v2417_v40 = vunpack.c.l.s8.bf16 %v1913_v31  ;;  %v2410_v41 = vunpack.c.h.s8.bf16 %v1906_v34  ;;  %v2402_v5 = vunpack.c.l.s8.bf16 %v1906_v34 }
 0x298   :  { %v1646_v51 = vmax.f32 %v1638_v45, 0.0  ;;  %2562 = vmatprep.subr.bf16.mxu1 %v2338_v43  ;;  %v1330_v43 = vadd.f32 %v3593_v36, %v3562_v7  ;;  %v2274_v45 = vunpack.c.l.s8.bf16 %v1842_v4  ;;  %v1833_v36 = vld [vmem:[#allocation10 + $0x540] sm:$0xff] }
 0x299   :  { %v2257_v16 = vunpack.c.l.s8.bf16 %v1833_v36 }
 0x29a   :  { %v1654_v54 = vmul.f32 %v1646_v51, %v1646_v51  ;;  %2522 = vmatpush1.bf16.msra.mxu0 %v2209_v48  ;;  %v2409_v48 = vunpack.c.h.s8.bf16 %v1905_v42  ;;  %v2273_v51 = vunpack.c.l.s8.bf16 %v1841_v39 }
 0x29b   :  { %2523 = vmatprep.subr.bf16.mxu0 %v2202_v49  ;;  %2563 = vmatpush1.bf16.msra.mxu1 %v2337_v50  ;;  %v1834_v49 = vld [vmem:[#allocation10 + $0x548] sm:$0xff] }
 0x29c   :  { %v3605_v0 = vpack.c.bf16 %v1654_v54, %v1654_v54  ;;  %2564 = vmatprep.subr.bf16.mxu1 %v2330_v52  ;;  %v1898_v50 = vld [vmem:[#allocation10 + $0x748] sm:$0xff]  ;;  %v1371_v52 = vadd.f32 %v3595_v37, %v1330_v43  ;;  %v2266_v7 = vunpack.c.h.s8.bf16 %v1834_v49  ;;  %v2401_v54 = vunpack.c.l.s8.bf16 %v1905_v42 }
 0x29d   :  { %v2258_v47 = vunpack.c.l.s8.bf16 %v1834_v49  ;;  %v2386_v15 = vunpack.c.l.s8.bf16 %v1898_v50 }
 0x29e   :  { %2524 = vmatpush1.bf16.msra.mxu0 %v2201_v55  ;;  %2547 = vmatprep.mubr.bf16.mxu0 %v3605_v0  ;;  %v2394_v55 = vunpack.c.h.s8.bf16 %v1898_v50  ;;  %v1587_v2 = vmul.f32 %v1562_v53, %v1371_v52  ;;  %v1676_v53 = vld [vmem:[#allocation10 + $0x58] sm:$0xff] }
 0x29f   :  { %2525 = vmatprep.subr.bf16.mxu0 %v2194_v58  ;;  %2565 = vmatpush1.bf16.msra.mxu1 %v2329_v60  ;;  %v1897_v58 = vld [vmem:[#allocation10 + $0x740] sm:$0xff]  ;;  %v2265_v60 = vunpack.c.h.s8.bf16 %v1833_v36  ;;  %v1948_v36 = vunpack.c.h.s8.bf16 %v1676_v53 }
 0x2a0   :  { %2566 = vmatprep.subr.bf16.mxu1 %v2322_v46  ;;  %v1612_v46 = vrot.slane %v3549_v21, %v3611_v44  ;;  %v2393_v37 = vunpack.c.h.s8.bf16 %v1897_v58  ;;  %v2249_v21 = vunpack.c.h.s8.bf16 %v1825_v29 }
 0x2a2   :  { %2526 = vmatpush1.bf16.msra.mxu0 %v2193_v6  ;;  %v1826_v6 = vld [vmem:[#allocation10 + $0x508] sm:$0xff] }
 0x2a3   :  { %2527 = vmatprep.subr.bf16.mxu0 %v2186_v9  ;;  %2567 = vmatpush1.bf16.msra.mxu1 %v2321_v56  ;;  %v1890_v9 = vld [vmem:[#allocation10 + $0x708] sm:$0xff]  ;;  %v1637_v56 = vadd.f32 %v1612_v46, %v1587_v2 }
 0x2a4   :  { %2568 = vmatprep.subr.bf16.mxu1 %v2314_v28  ;;  %v2250_v28 = vunpack.c.h.s8.bf16 %v1826_v6 }
 0x2a5   :  { %v1645_v22 = vmax.f32 %v1637_v56, 0.0  ;;  %v1723_v56 = vld [vmem:[#allocation10 + $0x1d0] sm:$0xff] }
 0x2a6   :  { %2528 = vmatpush1.bf16.msra.mxu0 %v2185_v61  ;;  %v2385_v61 = vunpack.c.l.s8.bf16 %v1897_v58  ;;  %v1940_v58 = vunpack.c.l.s8.bf16 %v1676_v53 }
 0x2a7   :  { %2529 = vmatprep.subr.bf16.mxu0 %v2178_v20  ;;  %2569 = vmatpush1.bf16.msra.mxu1 %v2313_v13  ;;  %v2378_v20 = vunpack.c.h.s8.bf16 %v1890_v9  ;;  %v1889_v13 = vld [vmem:[#allocation10 + $0x700] sm:$0xff] }
 0x2a8   :  { %2570 = vmatprep.subr.bf16.mxu1 %v2306_v23  ;;  %v2242_v23 = vunpack.c.l.s8.bf16 %v1826_v6  ;;  %v2377_v63 = vunpack.c.h.s8.bf16 %v1889_v13 }
 0x2aa   :  { %2530 = vmatpush1.bf16.msra.mxu0 %v2177_v24  ;;  %v1692_v24 = vld [vmem:[#allocation10 + $0xd8] sm:$0xff] }
 0x2ab   :  { %2531 = vmatprep.subr.bf16.mxu0 %v2298_v25  ;;  %2571 = vmatpush1.bf16.msra.mxu1 %v2305_v27  ;;  %v2370_v25 = vunpack.c.l.s8.bf16 %v1890_v9  ;;  %v2241_v27 = vunpack.c.l.s8.bf16 %v1825_v29  ;;  %v1980_v31 = vunpack.c.h.s8.bf16 %v1692_v24  ;;  %v1972_v34 = vunpack.c.l.s8.bf16 %v1692_v24 }
 0x2ac   :  { %2572 = vmatprep.subr.bf16.mxu1 %v2426_v30  ;;  %v1653_v30 = vmul.f32 %v1645_v22, %v1645_v22 }
 0x2ae   :  { %2532 = vmatpush2.bf16.msra.mxu0 %v2297_v32  ;;  %v1691_v32 = vld [vmem:[#allocation10 + $0xd0] sm:$0xff] }
 0x2af   :  { %2533 = vmatprep.subr.bf16.mxu0 %v2290_v33  ;;  %2573 = vmatpush2.bf16.msra.mxu1 %v2425_v14  ;;  %v2369_v33 = vunpack.c.l.s8.bf16 %v1889_v13  ;;  %v2108_v14 = vunpack.c.h.s8.bf16 %v3618_v26  ;;  %v1979_v4 = vunpack.c.h.s8.bf16 %v1691_v32 }
 0x2b0   :  { %2574 = vmatprep.subr.bf16.mxu1 %v2418_v12  ;;  %v3621_v12 = vpack.c.bf16 %v1653_v30, %v1653_v30 }
 0x2b2   :  { %2534 = vmatpush2.bf16.msra.mxu0 %v2289_v35  ;;  %v1684_v35 = vld [vmem:[#allocation10 + $0x98] sm:$0xff] }
 0x2b3   :  { %2535 = vmatprep.subr.bf16.mxu0 %v2282_v38  ;;  %2575 = vmatpush2.bf16.msra.mxu1 %v2417_v40  ;;  %v1964_v43 = vunpack.c.h.s8.bf16 %v1684_v35  ;;  %v1956_v52 = vunpack.c.l.s8.bf16 %v1684_v35 }
 0x2b4   :  { %2576 = vmatprep.subr.bf16.mxu1 %v2410_v41  ;;  %v1971_v41 = vunpack.c.l.s8.bf16 %v1691_v32  ;;  %v1700_v32 = vld [vmem:[#allocation10 + $0x118] sm:$0xff] }
 0x2b5   :  { %v1988_v35 = vunpack.c.l.s8.bf16 %v1700_v32 }
 0x2b6   :  { %2536 = vmatpush2.bf16.msra.mxu0 %v2281_v10 }
 0x2b7   :  { %2537 = vmatprep.subr.bf16.mxu0 %v2274_v45  ;;  %2577 = vmatpush2.bf16.msra.mxu1 %v2409_v48  ;;  %v1683_v45 = vld [vmem:[#allocation10 + $0x90] sm:$0xff] }
 0x2b8   :  { %2578 = vmatprep.subr.bf16.mxu1 %v2402_v5  ;;  %v1963_v5 = vunpack.c.h.s8.bf16 %v1683_v45 }
 0x2ba   :  { %2538 = vmatpush2.bf16.msra.mxu0 %v2273_v51 }
 0x2bb   :  { %2539 = vmatprep.subr.bf16.mxu0 %v2266_v7  ;;  %2579 = vmatpush2.bf16.msra.mxu1 %v2401_v54  ;;  %v1955_v7 = vunpack.c.l.s8.bf16 %v1683_v45  ;;  %v1675_v54 = vld [vmem:[#allocation10 + $0x50] sm:$0xff]  ;;  %v3632_v45 = vsub.s32 6, %v3532_v1 }
 0x2bc   :  { %2580 = vmatprep.subr.bf16.mxu1 %v2394_v55  ;;  %v1947_v55 = vunpack.c.h.s8.bf16 %v1675_v54  ;;  %v1939_v2 = vunpack.c.l.s8.bf16 %v1675_v54 }
 0x2be   :  { %2540 = vmatpush2.bf16.msra.mxu0 %v2265_v60  ;;  %v1668_v60 = vld [vmem:[#allocation10 + $0x18] sm:$0xff] }
 0x2bf   :  { %2541 = vmatprep.subr.bf16.mxu0 %v2258_v47  ;;  %2581 = vmatpush2.bf16.msra.mxu1 %v2393_v37  ;;  %v1932_v46 = vunpack.c.h.s8.bf16 %v1668_v60  ;;  %v1667_v47 = vld [vmem:[#allocation10 + $0x10] sm:$0xff]  ;;  %v1924_v6 = vunpack.c.l.s8.bf16 %v1668_v60 }
 0x2c0   :  { %2582 = vmatprep.subr.bf16.mxu1 %v2386_v15  ;;  %v1931_v37 = vunpack.c.h.s8.bf16 %v1667_v47  ;;  %v1724_v15 = vld [vmem:[#allocation10 + $0x1d8] sm:$0xff]  ;;  %v1923_v9 = vunpack.c.l.s8.bf16 %v1667_v47 }
 0x2c1   :  { %v2036_v29 = vunpack.c.l.s8.bf16 %v1724_v15  ;;  %v3241_v47 = vld [vmem:[#allocation8] sm:$0xff] }
 0x2c2   :  { %2542 = vmatpush2.bf16.msra.mxu0 %v2257_v16  ;;  %v2044_v16 = vunpack.c.h.s8.bf16 %v1724_v15 }
 0x2c3   :  { %2543 = vmatprep.subr.bf16.mxu0 %v2250_v28  ;;  %2583 = vmatpush2.bf16.msra.mxu1 %v2385_v61  ;;  %v2043_v28 = vunpack.c.h.s8.bf16 %v1723_v56  ;;  %v1716_v61 = vld [vmem:[#allocation10 + $0x198] sm:$0xff] }
 0x2c4   :  { %2584 = vmatprep.subr.bf16.mxu1 %v2378_v20  ;;  %v2035_v20 = vunpack.c.l.s8.bf16 %v1723_v56  ;;  %v2028_v13 = vunpack.c.h.s8.bf16 %v1716_v61 }
 0x2c6   :  { %2544 = vmatpush2.bf16.msra.mxu0 %v2249_v21  ;;  %v1715_v21 = vld [vmem:[#allocation10 + $0x190] sm:$0xff] }
 0x2c7   :  { %2545 = vmatprep.subr.bf16.mxu0 %v2242_v23  ;;  %2585 = vmatpush2.bf16.msra.mxu1 %v2377_v63  ;;  %v2027_v22 = vunpack.c.h.s8.bf16 %v1715_v21  ;;  %v2020_v23 = vunpack.c.l.s8.bf16 %v1716_v61  ;;  %v1708_v63 = vld [vmem:[#allocation10 + $0x158] sm:$0xff]  ;;  %v2019_v24 = vunpack.c.l.s8.bf16 %v1715_v21 }
 0x2c8   :  { %2586 = vmatprep.subr.bf16.mxu1 %v2370_v25  ;;  %v2012_v25 = vunpack.c.h.s8.bf16 %v1708_v63  ;;  %v1804_v21 = vld [vmem:[#allocation10 + $0x458] sm:$0xff] }
 0x2ca   :  { %2546 = vmatpush2.bf16.msra.mxu0 %v2241_v27  ;;  %v1707_v27 = vld [vmem:[#allocation10 + $0x150] sm:$0xff] }
 0x2cb   :  { %2597 = vmatprep.subr.bf16.mxu0 %v1980_v31  ;;  %2587 = vmatpush2.bf16.msra.mxu1 %v2369_v33  ;;  %v2011_v30 = vunpack.c.h.s8.bf16 %v1707_v27  ;;  %v2004_v31 = vunpack.c.l.s8.bf16 %v1708_v63  ;;  %v2003_v33 = vunpack.c.l.s8.bf16 %v1707_v27 }
 0x2cc   :  { %2638 = vmatprep.subr.bf16.mxu1 %v2108_v14  ;;  %v1996_v14 = vunpack.c.h.s8.bf16 %v1700_v32 }
 0x2cd   :  { %v1411_v38 = vpop.f32.mrf.mxu0  ;;  %2548 = vmatmul.mubr.bf16.vlgmr.msra.gmra.mxu0 %v3621_v12 }
 0x2ce   :  { %v1452_v39 = vpop.f32.mrf.mxu1  ;;  %2598 = vmatpush1.bf16.msra.mxu0 %v1979_v4  ;;  %2629 = vmatprep.mubr.bf16.mxu0 %v3556_v59  ;;  %v1699_v4 = vld [vmem:[#allocation10 + $0x110] sm:$0xff] }
 0x2cf   :  { %v3624_v40 = vadd.f32 %v1452_v39, %v1411_v38  ;;  %v3627_v42 = vpop.f32.mrf.mxu0  ;;  %2599 = vmatprep.subr.bf16.mxu0 %v1972_v34  ;;  %v1995_v34 = vunpack.c.h.s8.bf16 %v1699_v4  ;;  %v1820_v38 = vld [vmem:[#allocation10 + $0x4d8] sm:$0xff]  ;;  %v1987_v39 = vunpack.c.l.s8.bf16 %v1699_v4 }
 0x2d0   :  { %v3629_v10 = vpop.f32.mrf.mxu1 }
 0x2d1   :  { %v1415_v48 = vpop.f32.mrf.mxu0  ;;  %v1455_v53 = vadd.f32 %v3629_v10, %v3627_v42 }
 0x2d2   :  { %v1456_v49 = vpop.f32.mrf.mxu1  ;;  %2600 = vmatpush1.bf16.msra.mxu0 %v1971_v41  ;;  %v2236_v41 = vunpack.c.h.s8.bf16 %v1820_v38 }
 0x2d3   :  { %v1416_v50 = vpop.f32.mrf.mxu0  ;;  %2601 = vmatprep.subr.bf16.mxu0 %v1964_v43  ;;  %v1819_v43 = vld [vmem:[#allocation10 + $0x4d0] sm:$0xff]  ;;  %v2228_v49 = vunpack.c.l.s8.bf16 %v1820_v38 }
 0x2d4   :  { %v1457_v51 = vpop.f32.mrf.mxu1  ;;  %v2235_v48 = vunpack.c.h.s8.bf16 %v1819_v43  ;;  %v1812_v50 = vld [vmem:[#allocation10 + $0x498] sm:$0xff] }
 0x2d5   :  { %v2220_v60 = vunpack.c.h.s8.bf16 %v1812_v50  ;;  %v2212_v61 = vunpack.c.l.s8.bf16 %v1812_v50 }
 0x2d6   :  { %2602 = vmatpush1.bf16.msra.mxu0 %v1963_v5  ;;  %v3635_v5 = vsub.s32 7, %v3532_v1 }
 0x2d7   :  { %2603 = vmatprep.subr.bf16.mxu0 %v1956_v52 }
 0x2da   :  { %2604 = vmatpush1.bf16.msra.mxu0 %v1955_v7 }
 0x2db   :  { %2605 = vmatprep.subr.bf16.mxu0 %v1948_v36  ;;  %v3240_v36 = vld [vmem:[#allocation7] sm:$0xff] }
 0x2dc   :  { %v1570_v54 = vrot.slane %v3240_v36, %v3632_v45  ;;  %v1574_v42 = vrot.slane %v3240_v36, %v3635_v5  ;;  %v1852_v36 = vld [vmem:[#allocation10 + $0x5d8] sm:$0xff] }
 0x2de   :  { %2606 = vmatpush1.bf16.msra.mxu0 %v1947_v55  ;;  %v2227_v55 = vunpack.c.l.s8.bf16 %v1819_v43  ;;  %v1748_v43 = vld [vmem:[#allocation10 + $0x298] sm:$0xff] }
 0x2df   :  { %2607 = vmatprep.subr.bf16.mxu0 %v1940_v58 }
 0x2e2   :  { %2608 = vmatpush1.bf16.msra.mxu0 %v1939_v2  ;;  %v1811_v2 = vld [vmem:[#allocation10 + $0x490] sm:$0xff] }
 0x2e3   :  { %2609 = vmatprep.subr.bf16.mxu0 %v1932_v46  ;;  %v2219_v56 = vunpack.c.h.s8.bf16 %v1811_v2  ;;  %v2211_v63 = vunpack.c.l.s8.bf16 %v1811_v2 }
 0x2e6   :  { %2610 = vmatpush1.bf16.msra.mxu0 %v1931_v37  ;;  %v1620_v37 = vrot.slane %v3241_v47, %v3632_v45 }
 0x2e7   :  { %2611 = vmatprep.subr.bf16.mxu0 %v1924_v6 }
 0x2ea   :  { %2612 = vmatpush1.bf16.msra.mxu0 %v1923_v9 }
 0x2eb   :  { %2613 = vmatprep.subr.bf16.mxu0 %v2044_v16  ;;  %v1624_v16 = vrot.slane %v3241_v47, %v3635_v5  ;;  %v1739_v47 = vld [vmem:[#allocation10 + $0x250] sm:$0xff] }
 0x2ee   :  { %2614 = vmatpush2.bf16.msra.mxu0 %v2043_v28 }
 0x2ef   :  { %2615 = vmatprep.subr.bf16.mxu0 %v2036_v29 }
 0x2f2   :  { %2616 = vmatpush2.bf16.msra.mxu0 %v2035_v20 }
 0x2f3   :  { %2617 = vmatprep.subr.bf16.mxu0 %v2028_v13 }
 0x2f6   :  { %2618 = vmatpush2.bf16.msra.mxu0 %v2027_v22 }
 0x2f7   :  { %2619 = vmatprep.subr.bf16.mxu0 %v2020_v23 }
 0x2fa   :  { %2620 = vmatpush2.bf16.msra.mxu0 %v2019_v24  ;;  %v2204_v24 = vunpack.c.h.s8.bf16 %v1804_v21 }
 0x2fb   :  { %2621 = vmatprep.subr.bf16.mxu0 %v2012_v25  ;;  %v1803_v25 = vld [vmem:[#allocation10 + $0x450] sm:$0xff] }
 0x2fe   :  { %2622 = vmatpush2.bf16.msra.mxu0 %v2011_v30 }
 0x2ff   :  { %2623 = vmatprep.subr.bf16.mxu0 %v2004_v31  ;;  %v1755_v31 = vld [vmem:[#allocation10 + $0x2d0] sm:$0xff] }
 0x300   :  { %v2099_v50 = vunpack.c.l.s8.bf16 %v1755_v31 }
 0x302   :  { %2624 = vmatpush2.bf16.msra.mxu0 %v2003_v33  ;;  %v2203_v33 = vunpack.c.h.s8.bf16 %v1803_v25 }
 0x303   :  { %2625 = vmatprep.subr.bf16.mxu0 %v1996_v14  ;;  %v2196_v14 = vunpack.c.l.s8.bf16 %v1804_v21 }
 0x306   :  { %2626 = vmatpush2.bf16.msra.mxu0 %v1995_v34  ;;  %v2107_v34 = vunpack.c.h.s8.bf16 %v1755_v31 }
 0x307   :  { %2627 = vmatprep.subr.bf16.mxu0 %v1988_v35  ;;  %v1796_v35 = vld [vmem:[#allocation10 + $0x418] sm:$0xff] }
 0x30a   :  { %2628 = vmatpush2.bf16.msra.mxu0 %v1987_v39  ;;  %v2100_v39 = vunpack.c.l.s8.bf16 %v3618_v26  ;;  %v2180_v26 = vunpack.c.l.s8.bf16 %v1796_v35 }
 0x30b   :  { %2679 = vmatprep.subr.bf16.mxu0 %v2236_v41  ;;  %v2195_v41 = vunpack.c.l.s8.bf16 %v1803_v25 }
 0x30d   :  { %v1493_v51 = vpop.f32.mrf.mxu0  ;;  %2630 = vmatmul.mubr.bf16.vlgmr.msra.gmra.mxu0 %v3586_v57 }
 0x30e   :  { %v1534_v52 = vpop.f32.mrf.mxu1  ;;  %v1494_v7 = vadd.f32 %v1493_v51, %v3624_v40  ;;  %2680 = vmatpush1.bf16.msra.mxu0 %v2235_v48  ;;  %2711 = vmatprep.mubr.bf16.mxu0 %v3605_v0  ;;  %v2188_v48 = vunpack.c.h.s8.bf16 %v1796_v35  ;;  %v2092_v51 = vunpack.c.h.s8.bf16 %v1748_v43  ;;  %v1828_v35 = vld [vmem:[#allocation10 + $0x518] sm:$0xff] }
 0x30f   :  { %v1495_v58 = vpop.f32.mrf.mxu0  ;;  %2681 = vmatprep.subr.bf16.mxu0 %v2228_v49  ;;  %v1795_v49 = vld [vmem:[#allocation10 + $0x410] sm:$0xff] }
 0x310   :  { %v1536_v1 = vpop.f32.mrf.mxu1  ;;  %v1535_v46 = vadd.f32 %v1534_v52, %v1494_v7  ;;  %v1496_v6 = vadd.f32 %v1495_v58, %v1455_v53  ;;  %v1747_v52 = vld [vmem:[#allocation10 + $0x290] sm:$0xff]  ;;  %v2187_v53 = vunpack.c.h.s8.bf16 %v1795_v49  ;;  %v1740_v58 = vld [vmem:[#allocation10 + $0x258] sm:$0xff] }
 0x311   :  { %v1497_v40 = vpop.f32.mrf.mxu0  ;;  %v2091_v7 = vunpack.c.h.s8.bf16 %v1747_v52  ;;  %v2083_v2 = vunpack.c.l.s8.bf16 %v1747_v52  ;;  %v1779_v52 = vld [vmem:[#allocation10 + $0x390] sm:$0xff] }
 0x312   :  { %v1538_v10 = vpop.f32.mrf.mxu1  ;;  %v1589_v15 = vmul.f32 %v1570_v54, %v1535_v46  ;;  %v1537_v9 = vadd.f32 %v1536_v1, %v1496_v6  ;;  %2682 = vmatpush1.bf16.msra.mxu0 %v2227_v55  ;;  %v2084_v54 = vunpack.c.l.s8.bf16 %v1748_v43  ;;  %v2179_v55 = vunpack.c.l.s8.bf16 %v1795_v49  ;;  %v1844_v40 = vld [vmem:[#allocation10 + $0x598] sm:$0xff]  ;;  %v1827_v49 = vld [vmem:[#allocation10 + $0x510] sm:$0xff] }
 0x313   :  { %v1498_v28 = vpop.f32.mrf.mxu0  ;;  %2683 = vmatprep.subr.bf16.mxu0 %v2220_v60  ;;  %v2300_v1 = vunpack.c.h.s8.bf16 %v1852_v36  ;;  %v1851_v60 = vld [vmem:[#allocation10 + $0x5d0] sm:$0xff]  ;;  %v2076_v46 = vunpack.c.h.s8.bf16 %v1740_v58  ;;  %v2292_v6 = vunpack.c.l.s8.bf16 %v1852_v36  ;;  %v2068_v10 = vunpack.c.l.s8.bf16 %v1740_v58  ;;  %v1780_v43 = vld [vmem:[#allocation10 + $0x398] sm:$0xff]  ;;  %v1694_v36 = vld [vmem:[#allocation10 + $0xe8] sm:$0xff] }
 0x314   :  { %v1539_v29 = vpop.f32.mrf.mxu1  ;;  %v1639_v20 = vadd.f32 %v1620_v37, %v1589_v15  ;;  %v1590_v13 = vmul.f32 %v1574_v42, %v1537_v9  ;;  %v2299_v37 = vunpack.c.h.s8.bf16 %v1851_v60  ;;  %v2075_v42 = vunpack.c.h.s8.bf16 %v1739_v47  ;;  %v1732_v9 = vld [vmem:[#allocation10 + $0x218] sm:$0xff] }
 0x315   :  { %v2291_v15 = vunpack.c.l.s8.bf16 %v1851_v60  ;;  %v2067_v28 = vunpack.c.l.s8.bf16 %v1739_v47  ;;  %v2060_v29 = vunpack.c.h.s8.bf16 %v1732_v9  ;;  %v1772_v58 = vld [vmem:[#allocation10 + $0x358] sm:$0xff]  ;;  %v1693_v60 = vld [vmem:[#allocation10 + $0xe0] sm:$0xff]  ;;  %v1771_v47 = vld [vmem:[#allocation10 + $0x350] sm:$0xff] }
 0x316   :  { %v1647_v22 = vmax.f32 %v1639_v20, 0.0  ;;  %v1640_v23 = vadd.f32 %v1624_v16, %v1590_v13  ;;  %2684 = vmatpush1.bf16.msra.mxu0 %v2219_v56  ;;  %v2284_v16 = vunpack.c.h.s8.bf16 %v1844_v40  ;;  %v1843_v56 = vld [vmem:[#allocation10 + $0x590] sm:$0xff]  ;;  %v2276_v13 = vunpack.c.l.s8.bf16 %v1844_v40  ;;  %v1686_v40 = vld [vmem:[#allocation10 + $0xa8] sm:$0xff] }
 0x317   :  { %2685 = vmatprep.subr.bf16.mxu0 %v2212_v61  ;;  %v1731_v61 = vld [vmem:[#allocation10 + $0x210] sm:$0xff]  ;;  %v2283_v20 = vunpack.c.h.s8.bf16 %v1843_v56 }
 0x318   :  { %v1648_v27 = vmax.f32 %v1640_v23, 0.0  ;;  %v1655_v30 = vmul.f32 %v1647_v22, %v1647_v22  ;;  %v2059_v21 = vunpack.c.h.s8.bf16 %v1731_v61  ;;  %v1836_v22 = vld [vmem:[#allocation10 + $0x558] sm:$0xff]  ;;  %v2052_v23 = vunpack.c.l.s8.bf16 %v1732_v9 }
 0x319   :  { %v2268_v25 = vunpack.c.h.s8.bf16 %v1836_v22 }
 0x31a   :  { %v1656_v32 = vmul.f32 %v1648_v27, %v1648_v27  ;;  %2686 = vmatpush1.bf16.msra.mxu0 %v2211_v63  ;;  %v3648_v38 = vpack.c.bf16 %v1655_v30, %v1655_v30  ;;  %v2275_v63 = vunpack.c.l.s8.bf16 %v1843_v56  ;;  %v1835_v27 = vld [vmem:[#allocation10 + $0x550] sm:$0xff]  ;;  %v2051_v30 = vunpack.c.l.s8.bf16 %v1731_v61  ;;  %v1764_v56 = vld [vmem:[#allocation10 + $0x318] sm:$0xff] }
 0x31b   :  { %2687 = vmatprep.subr.bf16.mxu0 %v2204_v24  ;;  %v1788_v24 = vld [vmem:[#allocation10 + $0x3d8] sm:$0xff]  ;;  %v1966_v61 = vunpack.c.h.s8.bf16 %v1686_v40 }
 0x31c   :  { %v3646_v4 = vpack.c.bf16 %v1656_v32, %v1656_v32  ;;  %v2172_v31 = vunpack.c.h.s8.bf16 %v1788_v24  ;;  %v1787_v32 = vld [vmem:[#allocation10 + $0x3d0] sm:$0xff] }
 0x31e   :  { %2588 = vmatprep.mubr.bf16.mxu1 %v3646_v4  ;;  %2688 = vmatpush1.bf16.msra.mxu0 %v2203_v33  ;;  %v2267_v33 = vunpack.c.h.s8.bf16 %v1835_v27 }
 0x31f   :  { %2589 = vmatmul.mubr.bf16.vlgmr.msra.gmra.mxu1 %v3648_v38  ;;  %2689 = vmatprep.subr.bf16.mxu0 %v2196_v14  ;;  %v2260_v14 = vunpack.c.l.s8.bf16 %v1836_v22 }
 0x320   :  { %2639 = vmatpush1.bf16.msra.mxu1 %v2107_v34  ;;  %2670 = vmatprep.mubr.bf16.mxu1 %v3558_v3  ;;  %v2171_v34 = vunpack.c.h.s8.bf16 %v1787_v32 }
 0x321   :  { %2640 = vmatprep.subr.bf16.mxu1 %v2100_v39  ;;  %v2164_v39 = vunpack.c.l.s8.bf16 %v1788_v24  ;;  %v1763_v24 = vld [vmem:[#allocation10 + $0x310] sm:$0xff] }
 0x322   :  { %2690 = vmatpush1.bf16.msra.mxu0 %v2195_v41  ;;  %v2259_v41 = vunpack.c.l.s8.bf16 %v1835_v27 }
 0x323   :  { %2691 = vmatprep.subr.bf16.mxu0 %v2188_v48  ;;  %v2252_v48 = vunpack.c.h.s8.bf16 %v1828_v35 }
 0x324   :  { %2641 = vmatpush1.bf16.msra.mxu1 %v2099_v50  ;;  %v2163_v50 = vunpack.c.l.s8.bf16 %v1787_v32 }
 0x325   :  { %2642 = vmatprep.subr.bf16.mxu1 %v2092_v51  ;;  %v2156_v51 = vunpack.c.h.s8.bf16 %v1780_v43 }
 0x326   :  { %2692 = vmatpush1.bf16.msra.mxu0 %v2187_v53  ;;  %v2251_v53 = vunpack.c.h.s8.bf16 %v1827_v49 }
 0x327   :  { %2693 = vmatprep.subr.bf16.mxu0 %v2180_v26  ;;  %v2244_v26 = vunpack.c.l.s8.bf16 %v1828_v35 }
 0x328   :  { %2643 = vmatpush1.bf16.msra.mxu1 %v2091_v7  ;;  %v2155_v7 = vunpack.c.h.s8.bf16 %v1779_v52 }
 0x329   :  { %2644 = vmatprep.subr.bf16.mxu1 %v2084_v54  ;;  %v2148_v54 = vunpack.c.l.s8.bf16 %v1780_v43  ;;  %v1677_v43 = vld [vmem:[#allocation10 + $0x60] sm:$0xff] }
 0x32a   :  { %2694 = vmatpush1.bf16.msra.mxu0 %v2179_v55  ;;  %v2243_v55 = vunpack.c.l.s8.bf16 %v1827_v49 }
 0x32b   :  { %2695 = vmatprep.subr.bf16.mxu0 %v2300_v1  ;;  %v1982_v1 = vunpack.c.h.s8.bf16 %v1694_v36 }
 0x32c   :  { %2645 = vmatpush1.bf16.msra.mxu1 %v2083_v2  ;;  %v2147_v2 = vunpack.c.l.s8.bf16 %v1779_v52 }
 0x32d   :  { %2646 = vmatprep.subr.bf16.mxu1 %v2076_v46  ;;  %v2140_v46 = vunpack.c.h.s8.bf16 %v1772_v58 }
 0x32e   :  { %2696 = vmatpush2.bf16.msra.mxu0 %v2299_v37  ;;  %v1981_v37 = vunpack.c.h.s8.bf16 %v1693_v60 }
 0x32f   :  { %2697 = vmatprep.subr.bf16.mxu0 %v2292_v6  ;;  %v1974_v6 = vunpack.c.l.s8.bf16 %v1694_v36  ;;  %v1941_v36 = vunpack.c.l.s8.bf16 %v1677_v43 }
 0x330   :  { %2647 = vmatpush1.bf16.msra.mxu1 %v2075_v42  ;;  %v2139_v42 = vunpack.c.h.s8.bf16 %v1771_v47 }
 0x331   :  { %2648 = vmatprep.subr.bf16.mxu1 %v2068_v10 }
 0x332   :  { %2698 = vmatpush2.bf16.msra.mxu0 %v2291_v15  ;;  %v2132_v15 = vunpack.c.l.s8.bf16 %v1772_v58  ;;  %v1669_v58 = vld [vmem:[#allocation10 + $0x20] sm:$0xff] }
 0x333   :  { %2699 = vmatprep.subr.bf16.mxu0 %v2284_v16  ;;  %v1973_v16 = vunpack.c.l.s8.bf16 %v1693_v60 }
 0x334   :  { %2649 = vmatpush1.bf16.msra.mxu1 %v2067_v28 }
 0x335   :  { %2650 = vmatprep.subr.bf16.mxu1 %v2060_v29 }
 0x336   :  { %2700 = vmatpush2.bf16.msra.mxu0 %v2283_v20  ;;  %v1685_v20 = vld [vmem:[#allocation10 + $0xa0] sm:$0xff] }
 0x337   :  { %2701 = vmatprep.subr.bf16.mxu0 %v2276_v13  ;;  %v1965_v27 = vunpack.c.h.s8.bf16 %v1685_v20  ;;  %v1957_v35 = vunpack.c.l.s8.bf16 %v1685_v20 }
 0x338   :  { %2651 = vmatpush1.bf16.msra.mxu1 %v2059_v21  ;;  %v2131_v21 = vunpack.c.l.s8.bf16 %v1771_v47 }
 0x339   :  { %2652 = vmatprep.subr.bf16.mxu1 %v2052_v23 }
 0x33a   :  { %2702 = vmatpush2.bf16.msra.mxu0 %v2275_v63  ;;  %v2124_v63 = vunpack.c.h.s8.bf16 %v1764_v56 }
 0x33b   :  { %2703 = vmatprep.subr.bf16.mxu0 %v2268_v25 }
 0x33c   :  { %2653 = vmatpush1.bf16.msra.mxu1 %v2051_v30 }
 0x33d   :  { %2654 = vmatprep.subr.bf16.mxu1 %v2172_v31  ;;  %v1958_v31 = vunpack.c.l.s8.bf16 %v1686_v40  ;;  %v1925_v40 = vunpack.c.l.s8.bf16 %v1669_v58 }
 0x33e   :  { %2704 = vmatpush2.bf16.msra.mxu0 %v2267_v33  ;;  %v2123_v33 = vunpack.c.h.s8.bf16 %v1763_v24 }
 0x33f   :  { %2705 = vmatprep.subr.bf16.mxu0 %v2260_v14  ;;  %v1678_v14 = vld [vmem:[#allocation10 + $0x68] sm:$0xff] }
 0x340   :  { %2655 = vmatpush2.bf16.msra.mxu1 %v2171_v34  ;;  %v2116_v34 = vunpack.c.l.s8.bf16 %v1764_v56  ;;  %v1942_v52 = vunpack.c.l.s8.bf16 %v1678_v14 }
 0x341   :  { %2656 = vmatprep.subr.bf16.mxu1 %v2164_v39  ;;  %v1884_v39 = vld [vmem:[#allocation10 + $0x6d8] sm:$0xff] }
 0x342   :  { %2706 = vmatpush2.bf16.msra.mxu0 %v2259_v41  ;;  %v1950_v41 = vunpack.c.h.s8.bf16 %v1678_v14  ;;  %v2364_v49 = vunpack.c.h.s8.bf16 %v1884_v39 }
 0x343   :  { %2707 = vmatprep.subr.bf16.mxu0 %v2252_v48  ;;  %v2115_v48 = vunpack.c.l.s8.bf16 %v1763_v24  ;;  %v1860_v24 = vld [vmem:[#allocation10 + $0x618] sm:$0xff] }
 0x344   :  { %2657 = vmatpush2.bf16.msra.mxu1 %v2163_v50  ;;  %v1883_v50 = vld [vmem:[#allocation10 + $0x6d0] sm:$0xff] }
 0x345   :  { %2658 = vmatprep.subr.bf16.mxu1 %v2156_v51  ;;  %v1949_v51 = vunpack.c.h.s8.bf16 %v1677_v43  ;;  %v1916_v43 = vld [vmem:[#allocation10 + $0x7d8] sm:$0xff] }
 0x346   :  { %2708 = vmatpush2.bf16.msra.mxu0 %v2251_v53  ;;  %v2363_v53 = vunpack.c.h.s8.bf16 %v1883_v50 }
 0x347   :  { %2709 = vmatprep.subr.bf16.mxu0 %v2244_v26  ;;  %v1670_v26 = vld [vmem:[#allocation10 + $0x28] sm:$0xff] }
 0x348   :  { %2659 = vmatpush2.bf16.msra.mxu1 %v2155_v7  ;;  %v2356_v7 = vunpack.c.l.s8.bf16 %v1884_v39  ;;  %v1926_v47 = vunpack.c.l.s8.bf16 %v1670_v26  ;;  %v2308_v39 = vunpack.c.l.s8.bf16 %v1860_v24 }
 0x349   :  { %2660 = vmatprep.subr.bf16.mxu1 %v2148_v54  ;;  %v1876_v54 = vld [vmem:[#allocation10 + $0x698] sm:$0xff] }
 0x34a   :  { %2710 = vmatpush2.bf16.msra.mxu0 %v2243_v55  ;;  %v1934_v55 = vunpack.c.h.s8.bf16 %v1670_v26  ;;  %v2348_v60 = vunpack.c.h.s8.bf16 %v1876_v54 }
 0x34b   :  { %2761 = vmatprep.subr.bf16.mxu0 %v1982_v1  ;;  %v2355_v1 = vunpack.c.l.s8.bf16 %v1883_v50 }
 0x34c   :  { %2661 = vmatpush2.bf16.msra.mxu1 %v2147_v2  ;;  %v1875_v2 = vld [vmem:[#allocation10 + $0x690] sm:$0xff] }
 0x34d   :  { %v2467_v10 = vpop.f32.mrf.mxu0  ;;  %2712 = vmatmul.mubr.bf16.vlgmr.msra.gmra.mxu0 %v3621_v12  ;;  %2662 = vmatprep.subr.bf16.mxu1 %v2140_v46  ;;  %v1933_v46 = vunpack.c.h.s8.bf16 %v1669_v58  ;;  %v1908_v58 = vld [vmem:[#allocation10 + $0x798] sm:$0xff] }
 0x34e   :  { %v2508_v9 = vpop.f32.mrf.mxu1  ;;  %2762 = vmatpush1.bf16.msra.mxu0 %v1981_v37  ;;  %2793 = vmatprep.mubr.bf16.mxu0 %v3556_v59  ;;  %v2347_v37 = vunpack.c.h.s8.bf16 %v1875_v2 }
 0x34f   :  { %v3656_v28 = vadd.f32 %v2508_v9, %v2467_v10  ;;  %v2469_v29 = vpop.f32.mrf.mxu0  ;;  %2763 = vmatprep.subr.bf16.mxu0 %v1974_v6  ;;  %v1726_v6 = vld [vmem:[#allocation10 + $0x1e8] sm:$0xff]  ;;  %v1868_v10 = vld [vmem:[#allocation10 + $0x658] sm:$0xff]  ;;  %v1725_v9 = vld [vmem:[#allocation10 + $0x1e0] sm:$0xff] }
 0x350   :  { %v2510_v13 = vpop.f32.mrf.mxu1  ;;  %2663 = vmatpush2.bf16.msra.mxu1 %v2139_v42  ;;  %v2340_v42 = vunpack.c.l.s8.bf16 %v1876_v54  ;;  %v2332_v56 = vunpack.c.h.s8.bf16 %v1868_v10  ;;  %v2038_v20 = vunpack.c.l.s8.bf16 %v1726_v6  ;;  %v2420_v54 = vunpack.c.l.s8.bf16 %v1916_v43 }
 0x351   :  { %v3658_v22 = vadd.f32 %v2510_v13, %v2469_v29  ;;  %v2471_v23 = vpop.f32.mrf.mxu0  ;;  %2664 = vmatprep.subr.bf16.mxu1 %v2132_v15  ;;  %v2046_v15 = vunpack.c.h.s8.bf16 %v1726_v6  ;;  %v1867_v29 = vld [vmem:[#allocation10 + $0x650] sm:$0xff] }
 0x352   :  { %v2512_v25 = vpop.f32.mrf.mxu1  ;;  %2764 = vmatpush1.bf16.msra.mxu0 %v1973_v16  ;;  %v2339_v16 = vunpack.c.l.s8.bf16 %v1875_v2  ;;  %v2331_v13 = vunpack.c.h.s8.bf16 %v1867_v29  ;;  %v2324_v23 = vunpack.c.l.s8.bf16 %v1868_v10  ;;  %v2404_v10 = vunpack.c.l.s8.bf16 %v1908_v58 }
 0x353   :  { %v2472_v30 = vpop.f32.mrf.mxu0  ;;  %2765 = vmatprep.subr.bf16.mxu0 %v1966_v61  ;;  %v2045_v61 = vunpack.c.h.s8.bf16 %v1725_v9 }
 0x354   :  { %v2513_v32 = vpop.f32.mrf.mxu1  ;;  %2665 = vmatpush2.bf16.msra.mxu1 %v2131_v21  ;;  %v1718_v21 = vld [vmem:[#allocation10 + $0x1a8] sm:$0xff]  ;;  %v2323_v30 = vunpack.c.l.s8.bf16 %v1867_v29 }
 0x355   :  { %2666 = vmatprep.subr.bf16.mxu1 %v2124_v63  ;;  %v2037_v63 = vunpack.c.l.s8.bf16 %v1725_v9  ;;  %v2030_v25 = vunpack.c.h.s8.bf16 %v1718_v21  ;;  %v1859_v32 = vld [vmem:[#allocation10 + $0x610] sm:$0xff]  ;;  %v2022_v14 = vunpack.c.l.s8.bf16 %v1718_v21  ;;  %v1900_v9 = vld [vmem:[#allocation10 + $0x758] sm:$0xff] }
 0x356   :  { %2766 = vmatpush1.bf16.msra.mxu0 %v1965_v27  ;;  %v1717_v27 = vld [vmem:[#allocation10 + $0x1a0] sm:$0xff]  ;;  %v2307_v50 = vunpack.c.l.s8.bf16 %v1859_v32 }
 0x357   :  { %2767 = vmatprep.subr.bf16.mxu0 %v1958_v31  ;;  %v2316_v31 = vunpack.c.h.s8.bf16 %v1860_v24 }
 0x358   :  { %2667 = vmatpush2.bf16.msra.mxu1 %v2123_v33  ;;  %v2029_v33 = vunpack.c.h.s8.bf16 %v1717_v27 }
 0x359   :  { %2668 = vmatprep.subr.bf16.mxu1 %v2116_v34  ;;  %v2315_v34 = vunpack.c.h.s8.bf16 %v1859_v32 }
 0x35a   :  { %2768 = vmatpush1.bf16.msra.mxu0 %v1957_v35  ;;  %v1710_v35 = vld [vmem:[#allocation10 + $0x168] sm:$0xff] }
 0x35b   :  { %2769 = vmatprep.subr.bf16.mxu0 %v1950_v41  ;;  %v2021_v41 = vunpack.c.l.s8.bf16 %v1717_v27  ;;  %v2006_v26 = vunpack.c.l.s8.bf16 %v1710_v35 }
 0x35c   :  { %2669 = vmatpush2.bf16.msra.mxu1 %v2115_v48  ;;  %v2014_v48 = vunpack.c.h.s8.bf16 %v1710_v35 }
 0x35d   :  { %2720 = vmatprep.subr.bf16.mxu1 %v2364_v49  ;;  %v1709_v49 = vld [vmem:[#allocation10 + $0x160] sm:$0xff] }
 0x35e   :  { %2770 = vmatpush1.bf16.msra.mxu0 %v1949_v51  ;;  %v2428_v51 = vunpack.c.h.s8.bf16 %v1916_v43  ;;  %v1891_v43 = vld [vmem:[#allocation10 + $0x710] sm:$0xff] }
 0x35f   :  { %2671 = vmatmul.mubr.bf16.vlgmr.msra.gmra.mxu1 %v3588_v17  ;;  %2771 = vmatprep.subr.bf16.mxu0 %v1942_v52  ;;  %v1915_v52 = vld [vmem:[#allocation10 + $0x7d0] sm:$0xff] }
 0x360   :  { %2721 = vmatpush1.bf16.msra.mxu1 %v2363_v53  ;;  %2752 = vmatprep.mubr.bf16.mxu1 %v3646_v4  ;;  %v2013_v53 = vunpack.c.h.s8.bf16 %v1709_v49  ;;  %v2419_v2 = vunpack.c.l.s8.bf16 %v1915_v52 }
 0x361   :  { %2722 = vmatprep.subr.bf16.mxu1 %v2356_v7  ;;  %v2427_v7 = vunpack.c.h.s8.bf16 %v1915_v52 }
 0x362   :  { %2772 = vmatpush1.bf16.msra.mxu0 %v1941_v36  ;;  %v1702_v36 = vld [vmem:[#allocation10 + $0x128] sm:$0xff] }
 0x363   :  { %2773 = vmatprep.subr.bf16.mxu0 %v1934_v55  ;;  %v2005_v55 = vunpack.c.l.s8.bf16 %v1709_v49  ;;  %v1990_v6 = vunpack.c.l.s8.bf16 %v1702_v36 }
 0x364   :  { %2723 = vmatpush1.bf16.msra.mxu1 %v2355_v1  ;;  %v1998_v1 = vunpack.c.h.s8.bf16 %v1702_v36  ;;  %v2371_v36 = vunpack.c.l.s8.bf16 %v1891_v43 }
 0x365   :  { %2724 = vmatprep.subr.bf16.mxu1 %v2348_v60  ;;  %v1701_v60 = vld [vmem:[#allocation10 + $0x120] sm:$0xff] }
 0x366   :  { %2774 = vmatpush1.bf16.msra.mxu0 %v1933_v46  ;;  %v2412_v46 = vunpack.c.h.s8.bf16 %v1908_v58 }
 0x367   :  { %2775 = vmatprep.subr.bf16.mxu0 %v1926_v47  ;;  %v1907_v47 = vld [vmem:[#allocation10 + $0x790] sm:$0xff] }
 0x368   :  { %2725 = vmatpush1.bf16.msra.mxu1 %v2347_v37  ;;  %v1997_v37 = vunpack.c.h.s8.bf16 %v1701_v60  ;;  %v2403_v29 = vunpack.c.l.s8.bf16 %v1907_v47 }
 0x369   :  { %2726 = vmatprep.subr.bf16.mxu1 %v2340_v42  ;;  %v2411_v42 = vunpack.c.h.s8.bf16 %v1907_v47 }
 0x36a   :  { %2776 = vmatpush1.bf16.msra.mxu0 %v1925_v40  ;;  %v1822_v40 = vld [vmem:[#allocation10 + $0x4e8] sm:$0xff] }
 0x36b   :  { %2777 = vmatprep.subr.bf16.mxu0 %v2046_v15  ;;  %v1989_v15 = vunpack.c.l.s8.bf16 %v1701_v60  ;;  %v2230_v21 = vunpack.c.l.s8.bf16 %v1822_v40 }
 0x36c   :  { %2727 = vmatpush1.bf16.msra.mxu1 %v2339_v16  ;;  %v2238_v16 = vunpack.c.h.s8.bf16 %v1822_v40 }
 0x36d   :  { %2728 = vmatprep.subr.bf16.mxu1 %v2332_v56  ;;  %v1821_v56 = vld [vmem:[#allocation10 + $0x4e0] sm:$0xff] }
 0x36e   :  { %2778 = vmatpush2.bf16.msra.mxu0 %v2045_v61  ;;  %v2396_v61 = vunpack.c.h.s8.bf16 %v1900_v9 }
 0x36f   :  { %2779 = vmatprep.subr.bf16.mxu0 %v2038_v20  ;;  %v1899_v20 = vld [vmem:[#allocation10 + $0x750] sm:$0xff] }
 0x370   :  { %2729 = vmatpush1.bf16.msra.mxu1 %v2331_v13  ;;  %v2237_v13 = vunpack.c.h.s8.bf16 %v1821_v56  ;;  %v2387_v35 = vunpack.c.l.s8.bf16 %v1899_v20 }
 0x371   :  { %2730 = vmatprep.subr.bf16.mxu1 %v2324_v23  ;;  %v2395_v23 = vunpack.c.h.s8.bf16 %v1899_v20 }
 0x372   :  { %2780 = vmatpush2.bf16.msra.mxu0 %v2037_v63  ;;  %v1814_v63 = vld [vmem:[#allocation10 + $0x4a8] sm:$0xff] }
 0x373   :  { %2781 = vmatprep.subr.bf16.mxu0 %v2030_v25  ;;  %v2388_v25 = vunpack.c.l.s8.bf16 %v1900_v9  ;;  %v2214_v49 = vunpack.c.l.s8.bf16 %v1814_v63 }
 0x374   :  { %2731 = vmatpush1.bf16.msra.mxu1 %v2323_v30  ;;  %v2229_v30 = vunpack.c.l.s8.bf16 %v1821_v56 }
 0x375   :  { %2732 = vmatprep.subr.bf16.mxu1 %v2316_v31  ;;  %v1892_v31 = vld [vmem:[#allocation10 + $0x718] sm:$0xff] }
 0x376   :  { %2782 = vmatpush2.bf16.msra.mxu0 %v2029_v33  ;;  %v2222_v33 = vunpack.c.h.s8.bf16 %v1814_v63  ;;  %v2372_v52 = vunpack.c.l.s8.bf16 %v1892_v31 }
 0x377   :  { %2783 = vmatprep.subr.bf16.mxu0 %v2022_v14  ;;  %v1813_v14 = vld [vmem:[#allocation10 + $0x4a0] sm:$0xff] }
 0x378   :  { %2733 = vmatpush1.bf16.msra.mxu1 %v2315_v34 }
 0x379   :  { %2734 = vmatprep.subr.bf16.mxu1 %v2308_v39 }
 0x37a   :  { %2784 = vmatpush2.bf16.msra.mxu0 %v2021_v41  ;;  %v2380_v41 = vunpack.c.h.s8.bf16 %v1892_v31 }
 0x37b   :  { %2785 = vmatprep.subr.bf16.mxu0 %v2014_v48 }
 0x37c   :  { %2735 = vmatpush1.bf16.msra.mxu1 %v2307_v50  ;;  %v2379_v50 = vunpack.c.h.s8.bf16 %v1891_v43  ;;  %v1845_v43 = vld [vmem:[#allocation10 + $0x5a0] sm:$0xff] }
 0x37d   :  { %2736 = vmatprep.subr.bf16.mxu1 %v2428_v51  ;;  %v1806_v51 = vld [vmem:[#allocation10 + $0x468] sm:$0xff] }
 0x37e   :  { %2786 = vmatpush2.bf16.msra.mxu0 %v2013_v53  ;;  %v2213_v53 = vunpack.c.l.s8.bf16 %v1813_v14 }
 0x37f   :  { %2787 = vmatprep.subr.bf16.mxu0 %v2006_v26  ;;  %v2206_v26 = vunpack.c.h.s8.bf16 %v1806_v51 }
 0x380   :  { %2737 = vmatpush2.bf16.msra.mxu1 %v2427_v7  ;;  %v1805_v7 = vld [vmem:[#allocation10 + $0x460] sm:$0xff] }
 0x381   :  { %2738 = vmatprep.subr.bf16.mxu1 %v2420_v54  ;;  %v2205_v58 = vunpack.c.h.s8.bf16 %v1805_v7  ;;  %v2197_v47 = vunpack.c.l.s8.bf16 %v1805_v7  ;;  %v1790_v7 = vld [vmem:[#allocation10 + $0x3e8] sm:$0xff] }
 0x382   :  { %2788 = vmatpush2.bf16.msra.mxu0 %v2005_v55  ;;  %v1757_v55 = vld [vmem:[#allocation10 + $0x2e0] sm:$0xff] }
 0x383   :  { %2789 = vmatprep.subr.bf16.mxu0 %v1998_v1  ;;  %v2198_v1 = vunpack.c.l.s8.bf16 %v1806_v51  ;;  %v2109_v60 = vunpack.c.h.s8.bf16 %v1757_v55  ;;  %v2101_v40 = vunpack.c.l.s8.bf16 %v1757_v55 }
 0x384   :  { %2739 = vmatpush2.bf16.msra.mxu1 %v2419_v2  ;;  %v1798_v2 = vld [vmem:[#allocation10 + $0x428] sm:$0xff] }
 0x385   :  { %2740 = vmatprep.subr.bf16.mxu1 %v2412_v46 }
 0x386   :  { %2790 = vmatpush2.bf16.msra.mxu0 %v1997_v37  ;;  %v1750_v37 = vld [vmem:[#allocation10 + $0x2a8] sm:$0xff] }
 0x387   :  { %2791 = vmatprep.subr.bf16.mxu0 %v1990_v6  ;;  %v2190_v6 = vunpack.c.h.s8.bf16 %v1798_v2 }
 0x388   :  { %2741 = vmatpush2.bf16.msra.mxu1 %v2411_v42  ;;  %v1797_v42 = vld [vmem:[#allocation10 + $0x420] sm:$0xff] }
 0x389   :  { %2742 = vmatprep.subr.bf16.mxu1 %v2404_v10  ;;  %v2094_v10 = vunpack.c.h.s8.bf16 %v1750_v37  ;;  %v2189_v9 = vunpack.c.h.s8.bf16 %v1797_v42  ;;  %v2181_v20 = vunpack.c.l.s8.bf16 %v1797_v42  ;;  %v1782_v42 = vld [vmem:[#allocation10 + $0x3a8] sm:$0xff] }
 0x38a   :  { %2792 = vmatpush2.bf16.msra.mxu0 %v1989_v15  ;;  %v1749_v15 = vld [vmem:[#allocation10 + $0x2a0] sm:$0xff] }
 0x38b   :  { %2843 = vmatprep.subr.bf16.mxu0 %v2238_v16  ;;  %v2182_v16 = vunpack.c.l.s8.bf16 %v1798_v2  ;;  %v2093_v56 = vunpack.c.h.s8.bf16 %v1749_v15  ;;  %v2085_v63 = vunpack.c.l.s8.bf16 %v1749_v15 }
 0x38c   :  { %2743 = vmatpush2.bf16.msra.mxu1 %v2403_v29  ;;  %v1854_v29 = vld [vmem:[#allocation10 + $0x5e8] sm:$0xff] }
 0x38d   :  { %v2549_v24 = vpop.f32.mrf.mxu0  ;;  %2794 = vmatmul.mubr.bf16.vlgmr.msra.gmra.mxu0 %v3586_v57  ;;  %2744 = vmatprep.subr.bf16.mxu1 %v2396_v61  ;;  %v2086_v61 = vunpack.c.l.s8.bf16 %v1750_v37  ;;  %v2294_v31 = vunpack.c.l.s8.bf16 %v1854_v29  ;;  %v2166_v37 = vunpack.c.l.s8.bf16 %v1790_v7 }
 0x38e   :  { %v3664_v27 = vadd.f32 %v2549_v24, %v3656_v28  ;;  %2844 = vmatpush1.bf16.msra.mxu0 %v2237_v13  ;;  %2875 = vmatprep.mubr.bf16.mxu0 %v3605_v0  ;;  %v2221_v28 = vunpack.c.h.s8.bf16 %v1813_v14  ;;  %v1742_v13 = vld [vmem:[#allocation10 + $0x268] sm:$0xff] }
 0x38f   :  { %v2551_v32 = vpop.f32.mrf.mxu0  ;;  %2845 = vmatprep.subr.bf16.mxu0 %v2230_v21  ;;  %v2302_v21 = vunpack.c.h.s8.bf16 %v1854_v29  ;;  %v2078_v24 = vunpack.c.h.s8.bf16 %v1742_v13  ;;  %v2070_v14 = vunpack.c.l.s8.bf16 %v1742_v13  ;;  %v2150_v13 = vunpack.c.l.s8.bf16 %v1782_v42 }
 0x390   :  { %v3668_v34 = vadd.f32 %v2551_v32, %v3658_v22  ;;  %2745 = vmatpush2.bf16.msra.mxu1 %v2395_v23  ;;  %v1758_v22 = vld [vmem:[#allocation10 + $0x2e8] sm:$0xff]  ;;  %v1853_v23 = vld [vmem:[#allocation10 + $0x5e0] sm:$0xff] }
 0x391   :  { %v2553_v39 = vpop.f32.mrf.mxu0  ;;  %2746 = vmatprep.subr.bf16.mxu1 %v2388_v25  ;;  %v2110_v54 = vunpack.c.h.s8.bf16 %v1758_v22  ;;  %v2102_v46 = vunpack.c.l.s8.bf16 %v1758_v22  ;;  %v1741_v25 = vld [vmem:[#allocation10 + $0x260] sm:$0xff] }
 0x392   :  { %2846 = vmatpush1.bf16.msra.mxu0 %v2229_v30  ;;  %v2301_v30 = vunpack.c.h.s8.bf16 %v1853_v23  ;;  %v2077_v32 = vunpack.c.h.s8.bf16 %v1741_v25  ;;  %v1734_v39 = vld [vmem:[#allocation10 + $0x228] sm:$0xff] }
 0x393   :  { %v2554_v48 = vpop.f32.mrf.mxu0  ;;  %2847 = vmatprep.subr.bf16.mxu0 %v2222_v33  ;;  %v1846_v33 = vld [vmem:[#allocation10 + $0x5a8] sm:$0xff]  ;;  %v2054_v22 = vunpack.c.l.s8.bf16 %v1734_v39 }
 0x394   :  { %2747 = vmatpush2.bf16.msra.mxu1 %v2387_v35  ;;  %v2293_v35 = vunpack.c.l.s8.bf16 %v1853_v23  ;;  %v2062_v48 = vunpack.c.h.s8.bf16 %v1734_v39  ;;  %v2278_v51 = vunpack.c.l.s8.bf16 %v1846_v33  ;;  %v1774_v23 = vld [vmem:[#allocation10 + $0x368] sm:$0xff] }
 0x395   :  { %2748 = vmatprep.subr.bf16.mxu1 %v2380_v41  ;;  %v2286_v41 = vunpack.c.h.s8.bf16 %v1846_v33 }
 0x396   :  { %2848 = vmatpush1.bf16.msra.mxu0 %v2221_v28  ;;  %v2069_v28 = vunpack.c.l.s8.bf16 %v1741_v25 }
 0x397   :  { %2849 = vmatprep.subr.bf16.mxu0 %v2214_v49  ;;  %v1733_v49 = vld [vmem:[#allocation10 + $0x220] sm:$0xff] }
 0x398   :  { %2749 = vmatpush2.bf16.msra.mxu1 %v2379_v50  ;;  %v2285_v50 = vunpack.c.h.s8.bf16 %v1845_v43  ;;  %v2053_v55 = vunpack.c.l.s8.bf16 %v1733_v49 }
 0x399   :  { %2750 = vmatprep.subr.bf16.mxu1 %v2372_v52  ;;  %v2061_v52 = vunpack.c.h.s8.bf16 %v1733_v49 }
 0x39a   :  { %2850 = vmatpush1.bf16.msra.mxu0 %v2213_v53  ;;  %v1838_v53 = vld [vmem:[#allocation10 + $0x568] sm:$0xff] }
 0x39b   :  { %2851 = vmatprep.subr.bf16.mxu0 %v2206_v26  ;;  %v2277_v26 = vunpack.c.l.s8.bf16 %v1845_v43  ;;  %v2262_v2 = vunpack.c.l.s8.bf16 %v1838_v53 }
 0x39c   :  { %2751 = vmatpush2.bf16.msra.mxu1 %v2371_v36  ;;  %v2270_v36 = vunpack.c.h.s8.bf16 %v1838_v53 }
 0x39d   :  { %2802 = vmatprep.subr.bf16.mxu1 %v2110_v54  ;;  %v1837_v54 = vld [vmem:[#allocation10 + $0x560] sm:$0xff] }
 0x39e   :  { %2852 = vmatpush1.bf16.msra.mxu0 %v2205_v58  ;;  %v2174_v58 = vunpack.c.h.s8.bf16 %v1790_v7 }
 0x39f   :  { %2753 = vmatmul.mubr.bf16.vlgmr.msra.gmra.mxu1 %v3648_v38  ;;  %2853 = vmatprep.subr.bf16.mxu0 %v2198_v1  ;;  %v1789_v1 = vld [vmem:[#allocation10 + $0x3e0] sm:$0xff] }
 0x3a0   :  { %2803 = vmatpush1.bf16.msra.mxu1 %v2109_v60  ;;  %2834 = vmatprep.mubr.bf16.mxu1 %v3558_v3  ;;  %v2269_v60 = vunpack.c.h.s8.bf16 %v1837_v54  ;;  %v2165_v15 = vunpack.c.l.s8.bf16 %v1789_v1 }
 0x3a1   :  { %2804 = vmatprep.subr.bf16.mxu1 %v2102_v46  ;;  %v2173_v46 = vunpack.c.h.s8.bf16 %v1789_v1  ;;  %v1886_v1 = vld [vmem:[#allocation10 + $0x6e8] sm:$0xff] }
 0x3a2   :  { %2854 = vmatpush1.bf16.msra.mxu0 %v2197_v47  ;;  %v1830_v47 = vld [vmem:[#allocation10 + $0x528] sm:$0xff] }
 0x3a3   :  { %2855 = vmatprep.subr.bf16.mxu0 %v2190_v6  ;;  %v2261_v6 = vunpack.c.l.s8.bf16 %v1837_v54  ;;  %v2246_v29 = vunpack.c.l.s8.bf16 %v1830_v47  ;;  %v1680_v54 = vld [vmem:[#allocation10 + $0x78] sm:$0xff] }
 0x3a4   :  { %2805 = vmatpush1.bf16.msra.mxu1 %v2101_v40  ;;  %v2254_v40 = vunpack.c.h.s8.bf16 %v1830_v47  ;;  %v2366_v47 = vunpack.c.h.s8.bf16 %v1886_v1 }
 0x3a5   :  { %2806 = vmatprep.subr.bf16.mxu1 %v2094_v10  ;;  %v1829_v10 = vld [vmem:[#allocation10 + $0x520] sm:$0xff] }
 0x3a6   :  { %2856 = vmatpush1.bf16.msra.mxu0 %v2189_v9  ;;  %v2158_v9 = vunpack.c.h.s8.bf16 %v1782_v42  ;;  %v3681_v42 = vld [vmem:[%s3757_s5] sm:$0xff]  ;;  %s3400_s5 = smov [#allocation13]  }
 0x3a7   :  { %2857 = vmatprep.subr.bf16.mxu0 %v2182_v16  ;;  %v1781_v16 = vld [vmem:[#allocation10 + $0x3a0] sm:$0xff]  ;;  %s3219_s27 = sshll.u32 %s3400_s5, 4  ;;  %s3220_s27 = int_to_ptr.vmem [resolvable:$true] %s3219_s27 }
 0x3a8   :  { %2807 = vmatpush1.bf16.msra.mxu1 %v2093_v56  ;;  %v2253_v56 = vunpack.c.h.s8.bf16 %v1829_v10  ;;  %v2149_v25 = vunpack.c.l.s8.bf16 %v1781_v16  ;;  %s3362_s28 = scalar_lea.vmem %s3220_s27, 1024  ;;  %p3367_p3 = scmp.lt.s32.totalorder %s3220_s27, %s3220_s27 }
 0x3a9   :  { %2808 = vmatprep.subr.bf16.mxu1 %v2086_v61  ;;  %v2157_v61 = vunpack.c.h.s8.bf16 %v1781_v16  ;;  %v2358_v16 = vunpack.c.l.s8.bf16 %v1886_v1  ;;  %p3363_p2 = scmp.ne.s32.totalorder %s3220_s27, %s3362_s28  ;;  %p3368_p4 = scmp.lt.s32.totalorder %s3362_s28, %s3362_s28 }
 0x3aa   :  { %2858 = vmatpush1.bf16.msra.mxu0 %v2181_v20  ;;  %v1696_v20 = vld [vmem:[#allocation10 + $0xf8] sm:$0xff] }
 0x3ab   :  { %2859 = vmatprep.subr.bf16.mxu0 %v2302_v21  ;;  %v2245_v21 = vunpack.c.l.s8.bf16 %v1829_v10  ;;  %v1976_v33 = vunpack.c.l.s8.bf16 %v1696_v20  ;;  %p3369_p5 = por %p3368_p4, %p3367_p3 }
 0x3ac   :  { %2809 = vmatpush1.bf16.msra.mxu1 %v2085_v63  ;;  %v1984_v63 = vunpack.c.h.s8.bf16 %v1696_v20 }
 0x3ad   :  { %2810 = vmatprep.subr.bf16.mxu1 %v2078_v24  ;;  %v1695_v24 = vld [vmem:[#allocation10 + $0xf0] sm:$0xff]  ;;  %p3370_p6 = pnand %p3369_p5, %p3363_p2 }
 0x3ae   :  { %2860 = vmatpush2.bf16.msra.mxu0 %v2301_v30  ;;  %v2142_v30 = vunpack.c.h.s8.bf16 %v1774_v23  ;;  %v1975_v43 = vunpack.c.l.s8.bf16 %v1695_v24 }
 0x3af   :  { %2861 = vmatprep.subr.bf16.mxu0 %v2294_v31  ;;  %v1773_v31 = vld [vmem:[#allocation10 + $0x360] sm:$0xff] }
 0x3b0   :  { %2811 = vmatpush1.bf16.msra.mxu1 %v2077_v32  ;;  %v1983_v32 = vunpack.c.h.s8.bf16 %v1695_v24  ;;  %v3098_v24 = vrot.slane %v3681_v42, %v3535_v62 }
 0x3b1   :  { %2812 = vmatprep.subr.bf16.mxu1 %v2070_v14  ;;  %v2141_v14 = vunpack.c.h.s8.bf16 %v1773_v31 }
 0x3b2   :  { %2862 = vmatpush2.bf16.msra.mxu0 %v2293_v35  ;;  %v1688_v35 = vld [vmem:[#allocation10 + $0xb8] sm:$0xff] }
 0x3b3   :  { %2863 = vmatprep.subr.bf16.mxu0 %v2286_v41  ;;  %v2134_v41 = vunpack.c.l.s8.bf16 %v1774_v23  ;;  %v1968_v49 = vunpack.c.h.s8.bf16 %v1688_v35 }
 0x3b4   :  { %2813 = vmatpush1.bf16.msra.mxu1 %v2069_v28  ;;  %v1766_v28 = vld [vmem:[#allocation10 + $0x328] sm:$0xff] }
 0x3b5   :  { %2814 = vmatprep.subr.bf16.mxu1 %v2062_v48  ;;  %v2126_v53 = vunpack.c.h.s8.bf16 %v1766_v28 }
 0x3b6   :  { %2864 = vmatpush2.bf16.msra.mxu0 %v2285_v50  ;;  %v1687_v50 = vld [vmem:[#allocation10 + $0xb0] sm:$0xff] }
 0x3b7   :  { %2865 = vmatprep.subr.bf16.mxu0 %v2278_v51  ;;  %v2133_v51 = vunpack.c.l.s8.bf16 %v1773_v31 }
 0x3b8   :  { %2815 = vmatpush1.bf16.msra.mxu1 %v2061_v52 }
 0x3b9   :  { %2816 = vmatprep.subr.bf16.mxu1 %v2054_v22  ;;  %v1765_v22 = vld [vmem:[#allocation10 + $0x320] sm:$0xff] }
 0x3ba   :  { %2866 = vmatpush2.bf16.msra.mxu0 %v2277_v26  ;;  %v1967_v26 = vunpack.c.h.s8.bf16 %v1687_v50 }
 0x3bb   :  { %2867 = vmatprep.subr.bf16.mxu0 %v2270_v36  ;;  %v1960_v36 = vunpack.c.l.s8.bf16 %v1688_v35 }
 0x3bc   :  { %2817 = vmatpush1.bf16.msra.mxu1 %v2053_v55  ;;  %v2118_v55 = vunpack.c.l.s8.bf16 %v1766_v28 }
 0x3bd   :  { %2818 = vmatprep.subr.bf16.mxu1 %v2174_v58  ;;  %v1959_v58 = vunpack.c.l.s8.bf16 %v1687_v50  ;;  %v1728_v50 = vld [vmem:[#allocation10 + $0x1f8] sm:$0xff] }
 0x3be   :  { %2868 = vmatpush2.bf16.msra.mxu0 %v2269_v60  ;;  %v1952_v60 = vunpack.c.h.s8.bf16 %v1680_v54 }
 0x3bf   :  { %2869 = vmatprep.subr.bf16.mxu0 %v2262_v2  ;;  %v1679_v2 = vld [vmem:[#allocation10 + $0x70] sm:$0xff] }
 0x3c0   :  { %2819 = vmatpush2.bf16.msra.mxu1 %v2173_v46  ;;  %v2117_v46 = vunpack.c.l.s8.bf16 %v1765_v22 }
 0x3c1   :  { %2820 = vmatprep.subr.bf16.mxu1 %v2166_v37  ;;  %v1885_v37 = vld [vmem:[#allocation10 + $0x6e0] sm:$0xff] }
 0x3c2   :  { %2870 = vmatpush2.bf16.msra.mxu0 %v2261_v6  ;;  %v1951_v6 = vunpack.c.h.s8.bf16 %v1679_v2  ;;  %v2365_v10 = vunpack.c.h.s8.bf16 %v1885_v37 }
 0x3c3   :  { %2871 = vmatprep.subr.bf16.mxu0 %v2254_v40  ;;  %v1944_v40 = vunpack.c.l.s8.bf16 %v1680_v54 }
 0x3c4   :  { %2821 = vmatpush2.bf16.msra.mxu1 %v2165_v15  ;;  %v1672_v15 = vld [vmem:[#allocation10 + $0x38] sm:$0xff] }
 0x3c5   :  { %2822 = vmatprep.subr.bf16.mxu1 %v2158_v9  ;;  %v3683_v9 = vld [vmem:[#allocation11] sm:$0xff] }
 0x3c6   :  { %2872 = vmatpush2.bf16.msra.mxu0 %v2253_v56  ;;  %v3094_v56 = vrot.slane %v3681_v42, %v3571_v18 }
 0x3c7   :  { %2873 = vmatprep.subr.bf16.mxu0 %v2246_v29  ;;  %v1943_v29 = vunpack.c.l.s8.bf16 %v1679_v2  ;;  %v2040_v2 = vunpack.c.l.s8.bf16 %v1728_v50 }
 0x3c8   :  { %2823 = vmatpush2.bf16.msra.mxu1 %v2157_v61  ;;  %v1878_v61 = vld [vmem:[#allocation10 + $0x6a8] sm:$0xff] }
 0x3c9   :  { %2824 = vmatprep.subr.bf16.mxu1 %v2150_v13  ;;  %v1936_v13 = vunpack.c.h.s8.bf16 %v1672_v15  ;;  %v2350_v31 = vunpack.c.h.s8.bf16 %v1878_v61 }
 0x3ca   :  { %2874 = vmatpush2.bf16.msra.mxu0 %v2245_v21  ;;  %v1671_v21 = vld [vmem:[#allocation10 + $0x30] sm:$0xff] }
 0x3cb   :  { %2925 = vmatprep.subr.bf16.mxu0 %v1984_v63  ;;  %v3144_v63 = vrot.slane %v3683_v9, %v3571_v18  ;;  %v1935_v35 = vunpack.c.h.s8.bf16 %v1671_v21 }
 0x3cc   :  { %2825 = vmatpush2.bf16.msra.mxu1 %v2149_v25  ;;  %v2357_v25 = vunpack.c.l.s8.bf16 %v1885_v37 }
 0x3cd   :  { %v3672_v39 = vpop.f32.mrf.mxu0  ;;  %2876 = vmatmul.mubr.bf16.vlgmr.msra.gmra.mxu0 %v3621_v12  ;;  %2826 = vmatprep.subr.bf16.mxu1 %v2142_v30 }
 0x3ce   :  { %2926 = vmatpush1.bf16.msra.mxu0 %v1983_v32  ;;  %2957 = vmatprep.mubr.bf16.mxu0 %v3556_v59  ;;  %v2125_v59 = vunpack.c.h.s8.bf16 %v1765_v22  ;;  %v1877_v32 = vld [vmem:[#allocation10 + $0x6a0] sm:$0xff] }
 0x3cf   :  { %v3676_v48 = vpop.f32.mrf.mxu0  ;;  %2927 = vmatprep.subr.bf16.mxu0 %v1976_v33  ;;  %v2341_v54 = vunpack.c.l.s8.bf16 %v1877_v32 }
 0x3d0   :  { %2827 = vmatpush2.bf16.msra.mxu1 %v2141_v14 }
 0x3d1   :  { %v2635_v52 = vpop.f32.mrf.mxu0  ;;  %2828 = vmatprep.subr.bf16.mxu1 %v2134_v41  ;;  %v1928_v41 = vunpack.c.l.s8.bf16 %v1672_v15  ;;  %v1719_v15 = vld [vmem:[#allocation10 + $0x1b0] sm:$0xff] }
 0x3d2   :  { %2928 = vmatpush1.bf16.msra.mxu0 %v1975_v43  ;;  %v2342_v52 = vunpack.c.l.s8.bf16 %v1878_v61  ;;  %v2031_v61 = vunpack.c.h.s8.bf16 %v1719_v15 }
 0x3d3   :  { %v2636_v7 = vpop.f32.mrf.mxu0  ;;  %2929 = vmatprep.subr.bf16.mxu0 %v1968_v49  ;;  %v2349_v49 = vunpack.c.h.s8.bf16 %v1877_v32 }
 0x3d4   :  { %2829 = vmatpush2.bf16.msra.mxu1 %v2133_v51  ;;  %v1727_v7 = vld [vmem:[#allocation10 + $0x1f0] sm:$0xff] }
 0x3d5   :  { %2830 = vmatprep.subr.bf16.mxu1 %v2126_v53 }
 0x3d6   :  { %2930 = vmatpush1.bf16.msra.mxu0 %v1967_v26  ;;  %v1870_v26 = vld [vmem:[#allocation10 + $0x668] sm:$0xff] }
 0x3d7   :  { %2931 = vmatprep.subr.bf16.mxu0 %v1960_v36  ;;  %v2326_v37 = vunpack.c.l.s8.bf16 %v1870_v26 }
 0x3d8   :  { %2831 = vmatpush2.bf16.msra.mxu1 %v2125_v59 }
 0x3d9   :  { %2832 = vmatprep.subr.bf16.mxu1 %v2118_v55  ;;  %v2334_v55 = vunpack.c.h.s8.bf16 %v1870_v26 }
 0x3da   :  { %2932 = vmatpush1.bf16.msra.mxu0 %v1959_v58  ;;  %v1869_v58 = vld [vmem:[#allocation10 + $0x660] sm:$0xff] }
 0x3db   :  { %2933 = vmatprep.subr.bf16.mxu0 %v1952_v60  ;;  %v2047_v60 = vunpack.c.h.s8.bf16 %v1727_v7 }
 0x3dc   :  { %2833 = vmatpush2.bf16.msra.mxu1 %v2117_v46  ;;  %v2333_v46 = vunpack.c.h.s8.bf16 %v1869_v58 }
 0x3dd   :  { %2884 = vmatprep.subr.bf16.mxu1 %v2366_v47  ;;  %v1720_v47 = vld [vmem:[#allocation10 + $0x1b8] sm:$0xff] }
 0x3de   :  { %2934 = vmatpush1.bf16.msra.mxu0 %v1951_v6  ;;  %v2039_v6 = vunpack.c.l.s8.bf16 %v1727_v7 }
 0x3df   :  { %2835 = vmatmul.mubr.bf16.vlgmr.msra.gmra.mxu1 %v3588_v17  ;;  %v2590_v20 = vpop.f32.mrf.mxu1  ;;  %2935 = vmatprep.subr.bf16.mxu0 %v1944_v40  ;;  %v1862_v40 = vld [vmem:[#allocation10 + $0x628] sm:$0xff] }
 0x3e0   :  { %v2591_v23 = vadd.f32 %v2590_v20, %v3664_v27  ;;  %2885 = vmatpush1.bf16.msra.mxu1 %v2365_v10  ;;  %2916 = vmatprep.mubr.bf16.mxu1 %v3646_v4  ;;  %v3148_v27 = vrot.slane %v3683_v9, %v3535_v62  ;;  %v2048_v62 = vunpack.c.h.s8.bf16 %v1728_v50  ;;  %v2032_v10 = vunpack.c.h.s8.bf16 %v1720_v47  ;;  %v1703_v50 = vld [vmem:[#allocation10 + $0x130] sm:$0xff] }
 0x3e1   :  { %v2592_v30 = vpop.f32.mrf.mxu1  ;;  %2886 = vmatprep.subr.bf16.mxu1 %v2358_v16  ;;  %v2325_v16 = vunpack.c.l.s8.bf16 %v1869_v58  ;;  %v2024_v20 = vunpack.c.l.s8.bf16 %v1720_v47 }
 0x3e2   :  { %v3131_v33 = vmul.f32 %v3094_v56, %v2591_v23  ;;  %v2593_v14 = vadd.f32 %v2592_v30, %v3668_v34  ;;  %2936 = vmatpush1.bf16.msra.mxu0 %v1943_v29  ;;  %v1927_v34 = vunpack.c.l.s8.bf16 %v1671_v21  ;;  %v2318_v56 = vunpack.c.h.s8.bf16 %v1862_v40  ;;  %v1861_v29 = vld [vmem:[#allocation10 + $0x620] sm:$0xff]  ;;  %v1712_v21 = vld [vmem:[#allocation10 + $0x178] sm:$0xff]  ;;  %v1711_v30 = vld [vmem:[#allocation10 + $0x170] sm:$0xff] }
 0x3e3   :  { %v2594_v18 = vpop.f32.mrf.mxu1  ;;  %2937 = vmatprep.subr.bf16.mxu0 %v1936_v13  ;;  %v2317_v13 = vunpack.c.h.s8.bf16 %v1861_v29  ;;  %v2310_v23 = vunpack.c.l.s8.bf16 %v1862_v40 }
 0x3e4   :  { %v3181_v43 = vadd.f32 %v3144_v63, %v3131_v33  ;;  %v3132_v28 = vmul.f32 %v3098_v24, %v2593_v14  ;;  %2887 = vmatpush1.bf16.msra.mxu1 %v2357_v25  ;;  %v2023_v63 = vunpack.c.l.s8.bf16 %v1719_v15  ;;  %v1918_v24 = vld [vmem:[#allocation10 + $0x7e8] sm:$0xff]  ;;  %v2016_v25 = vunpack.c.h.s8.bf16 %v1712_v21  ;;  %v1917_v33 = vld [vmem:[#allocation10 + $0x7e0] sm:$0xff]  ;;  %v1704_v18 = vld [vmem:[#allocation10 + $0x138] sm:$0xff] }
 0x3e5   :  { %v2595_v51 = vpop.f32.mrf.mxu1  ;;  %2888 = vmatprep.subr.bf16.mxu1 %v2350_v31  ;;  %v2309_v31 = vunpack.c.l.s8.bf16 %v1861_v29  ;;  %v2430_v32 = vunpack.c.h.s8.bf16 %v1918_v24  ;;  %v2015_v14 = vunpack.c.h.s8.bf16 %v1711_v30  ;;  %v1894_v15 = vld [vmem:[#allocation10 + $0x728] sm:$0xff]  ;;  %v1815_v29 = vld [vmem:[#allocation10 + $0x4b0] sm:$0xff] }
 0x3e6   :  { %v3189_v53 = vmax.f32 %v3181_v43, 0.0  ;;  %v3182_v22 = vadd.f32 %v3148_v27, %v3132_v28  ;;  %2938 = vmatpush1.bf16.msra.mxu0 %v1935_v35  ;;  %v2008_v27 = vunpack.c.l.s8.bf16 %v1712_v21  ;;  %v2429_v35 = vunpack.c.h.s8.bf16 %v1917_v33  ;;  %v1910_v28 = vld [vmem:[#allocation10 + $0x7a8] sm:$0xff]  ;;  %v1893_v21 = vld [vmem:[#allocation10 + $0x720] sm:$0xff] }
 0x3e7   :  { %2939 = vmatprep.subr.bf16.mxu0 %v1928_v41  ;;  %v2422_v41 = vunpack.c.l.s8.bf16 %v1918_v24  ;;  %v2007_v43 = vunpack.c.l.s8.bf16 %v1711_v30  ;;  %v2421_v51 = vunpack.c.l.s8.bf16 %v1917_v33  ;;  %v2406_v7 = vunpack.c.l.s8.bf16 %v1910_v28  ;;  %v1808_v24 = vld [vmem:[#allocation10 + $0x478] sm:$0xff]  ;;  %v1807_v33 = vld [vmem:[#allocation10 + $0x470] sm:$0xff] }
 0x3e8   :  { %v3197_v36 = vmul.f32 %v3189_v53, %v3189_v53  ;;  %v3190_v59 = vmax.f32 %v3182_v22, 0.0  ;;  %2889 = vmatpush1.bf16.msra.mxu1 %v2349_v49  ;;  %v2000_v49 = vunpack.c.h.s8.bf16 %v1704_v18  ;;  %v1909_v53 = vld [vmem:[#allocation10 + $0x7a0] sm:$0xff]  ;;  %v1999_v22 = vunpack.c.h.s8.bf16 %v1703_v50 }
 0x3e9   :  { %2890 = vmatprep.subr.bf16.mxu1 %v2342_v52  ;;  %v2414_v52 = vunpack.c.h.s8.bf16 %v1910_v28  ;;  %v2413_v26 = vunpack.c.h.s8.bf16 %v1909_v53  ;;  %v2405_v58 = vunpack.c.l.s8.bf16 %v1909_v53  ;;  %v2215_v30 = vunpack.c.l.s8.bf16 %v1815_v29  ;;  %v1800_v28 = vld [vmem:[#allocation10 + $0x438] sm:$0xff] }
 0x3ea   :  { %3205 = vst [vmem:[#allocation13] sm:$0xff] %v3197_v36  ;;  %v3198_v1 = vmul.f32 %v3190_v59, %v3190_v59  ;;  %2940 = vmatpush1.bf16.msra.mxu0 %v1927_v34  ;;  %v1992_v34 = vunpack.c.l.s8.bf16 %v1704_v18  ;;  %v1991_v36 = vunpack.c.l.s8.bf16 %v1703_v50  ;;  %v1902_v59 = vld [vmem:[#allocation10 + $0x768] sm:$0xff]  ;;  %v2207_v18 = vunpack.c.h.s8.bf16 %v1807_v33 }
 0x3eb   :  { %2941 = vmatprep.subr.bf16.mxu0 %v2048_v62  ;;  %v1824_v62 = vld [vmem:[#allocation10 + $0x4f8] sm:$0xff]  ;;  %v2390_v40 = vunpack.c.l.s8.bf16 %v1902_v59  ;;  %v2199_v50 = vunpack.c.l.s8.bf16 %v1807_v33  ;;  %v2192_v53 = vunpack.c.h.s8.bf16 %v1800_v28 }
 0x3ec   :  { %3206 = vst [vmem:[#allocation13 + $0x8] sm:$0xff] %v3198_v1  ;;  %2891 = vmatpush1.bf16.msra.mxu1 %v2341_v54  ;;  %v2240_v54 = vunpack.c.h.s8.bf16 %v1824_v62  ;;  %v2398_v1 = vunpack.c.h.s8.bf16 %v1902_v59 }
 0x3ed   :  { %2892 = vmatprep.subr.bf16.mxu1 %v2334_v55  ;;  %v1823_v55 = vld [vmem:[#allocation10 + $0x4f0] sm:$0xff] }
 0x3ee   :  { %2942 = vmatpush2.bf16.msra.mxu0 %v2047_v60  ;;  %v1901_v60 = vld [vmem:[#allocation10 + $0x760] sm:$0xff] }
 0x3ef   :  { %2943 = vmatprep.subr.bf16.mxu0 %v2040_v2  ;;  %v2239_v2 = vunpack.c.h.s8.bf16 %v1823_v55  ;;  %v2397_v47 = vunpack.c.h.s8.bf16 %v1901_v60 }
 0x3f0   :  { %2893 = vmatpush1.bf16.msra.mxu1 %v2333_v46  ;;  %v2232_v46 = vunpack.c.l.s8.bf16 %v1824_v62 }
 0x3f1   :  { %2894 = vmatprep.subr.bf16.mxu1 %v2326_v37  ;;  %v1816_v37 = vld [vmem:[#allocation10 + $0x4b8] sm:$0xff] }
 0x3f2   :  { %2944 = vmatpush2.bf16.msra.mxu0 %v2039_v6 }
 0x3f3   :  { %2945 = vmatprep.subr.bf16.mxu0 %v2032_v10  ;;  %v2231_v10 = vunpack.c.l.s8.bf16 %v1823_v55 }
 0x3f4   :  { %2895 = vmatpush1.bf16.msra.mxu1 %v2325_v16 }
 0x3f5   :  { %2896 = vmatprep.subr.bf16.mxu1 %v2318_v56  ;;  %v2224_v56 = vunpack.c.h.s8.bf16 %v1816_v37 }
 0x3f6   :  { %2946 = vmatpush2.bf16.msra.mxu0 %v2031_v61  ;;  %v2389_v61 = vunpack.c.l.s8.bf16 %v1901_v60 }
 0x3f7   :  { %2947 = vmatprep.subr.bf16.mxu0 %v2024_v20 }
 0x3f8   :  { %2897 = vmatpush1.bf16.msra.mxu1 %v2317_v13  ;;  %v2382_v13 = vunpack.c.h.s8.bf16 %v1894_v15 }
 0x3f9   :  { %2898 = vmatprep.subr.bf16.mxu1 %v2310_v23 }
 0x3fa   :  { %2948 = vmatpush2.bf16.msra.mxu0 %v2023_v63  ;;  %v2216_v63 = vunpack.c.l.s8.bf16 %v1816_v37 }
 0x3fb   :  { %2949 = vmatprep.subr.bf16.mxu0 %v2016_v25  ;;  %v2374_v25 = vunpack.c.l.s8.bf16 %v1894_v15 }
 0x3fc   :  { %2899 = vmatpush1.bf16.msra.mxu1 %v2309_v31  ;;  %v1760_v31 = vld [vmem:[#allocation10 + $0x2f8] sm:$0xff] }
 0x3fd   :  { %2900 = vmatprep.subr.bf16.mxu1 %v2430_v32  ;;  %v2208_v32 = vunpack.c.h.s8.bf16 %v1808_v24 }
 0x3fe   :  { %2950 = vmatpush2.bf16.msra.mxu0 %v2015_v14  ;;  %v2373_v14 = vunpack.c.l.s8.bf16 %v1893_v21 }
 0x3ff   :  { %2951 = vmatprep.subr.bf16.mxu0 %v2008_v27  ;;  %v2112_v27 = vunpack.c.h.s8.bf16 %v1760_v31 }
 0x400   :  { %2901 = vmatpush2.bf16.msra.mxu1 %v2429_v35  ;;  %v1759_v35 = vld [vmem:[#allocation10 + $0x2f0] sm:$0xff] }
 0x401   :  { %2902 = vmatprep.subr.bf16.mxu1 %v2422_v41  ;;  %v2200_v41 = vunpack.c.l.s8.bf16 %v1808_v24  ;;  %v1735_v24 = vld [vmem:[#allocation10 + $0x230] sm:$0xff] }
 0x402   :  { %2952 = vmatpush2.bf16.msra.mxu0 %v2007_v43  ;;  %v2111_v43 = vunpack.c.h.s8.bf16 %v1759_v35 }
 0x403   :  { %2953 = vmatprep.subr.bf16.mxu0 %v2000_v49  ;;  %v2104_v49 = vunpack.c.l.s8.bf16 %v1760_v31  ;;  %v2063_v31 = vunpack.c.h.s8.bf16 %v1735_v24 }
 0x404   :  { %2903 = vmatpush2.bf16.msra.mxu1 %v2421_v51  ;;  %v1752_v51 = vld [vmem:[#allocation10 + $0x2b8] sm:$0xff] }
 0x405   :  { %2904 = vmatprep.subr.bf16.mxu1 %v2414_v52  ;;  %v2096_v62 = vunpack.c.h.s8.bf16 %v1752_v51  ;;  %v2088_v60 = vunpack.c.l.s8.bf16 %v1752_v51 }
 0x406   :  { %2954 = vmatpush2.bf16.msra.mxu0 %v1999_v22  ;;  %v1799_v22 = vld [vmem:[#allocation10 + $0x430] sm:$0xff] }
 0x407   :  { %2955 = vmatprep.subr.bf16.mxu0 %v1992_v34  ;;  %v2103_v34 = vunpack.c.l.s8.bf16 %v1759_v35 }
 0x408   :  { %2905 = vmatpush2.bf16.msra.mxu1 %v2413_v26 }
 0x409   :  { %2906 = vmatprep.subr.bf16.mxu1 %v2406_v7  ;;  %v1751_v7 = vld [vmem:[#allocation10 + $0x2b0] sm:$0xff] }
 0x40a   :  { %2956 = vmatpush2.bf16.msra.mxu0 %v1991_v36  ;;  %v2191_v36 = vunpack.c.h.s8.bf16 %v1799_v22  ;;  %v2095_v55 = vunpack.c.h.s8.bf16 %v1751_v7  ;;  %v2087_v37 = vunpack.c.l.s8.bf16 %v1751_v7 }
 0x40b   :  { %3007 = vmatprep.subr.bf16.mxu0 %v2240_v54  ;;  %v2184_v54 = vunpack.c.l.s8.bf16 %v1800_v28  ;;  %v1791_v28 = vld [vmem:[#allocation10 + $0x3f0] sm:$0xff] }
 0x40c   :  { %2907 = vmatpush2.bf16.msra.mxu1 %v2405_v58  ;;  %v1856_v58 = vld [vmem:[#allocation10 + $0x5f8] sm:$0xff]  ;;  %v2175_v51 = vunpack.c.h.s8.bf16 %v1791_v28 }
 0x40d   :  { %v3697_v6 = vpop.f32.mrf.mxu0  ;;  %2958 = vmatmul.mubr.bf16.vlgmr.msra.gmra.mxu0 %v3586_v57  ;;  %2908 = vmatprep.subr.bf16.mxu1 %v2398_v1  ;;  %v2223_v57 = vunpack.c.h.s8.bf16 %v1815_v29 }
 0x40e   :  { %3008 = vmatpush1.bf16.msra.mxu0 %v2239_v2  ;;  %3039 = vmatprep.mubr.bf16.mxu0 %v3605_v0  ;;  %v2381_v0 = vunpack.c.h.s8.bf16 %v1893_v21  ;;  %v2183_v2 = vunpack.c.l.s8.bf16 %v1799_v22  ;;  %v1736_v21 = vld [vmem:[#allocation10 + $0x238] sm:$0xff] }
 0x40f   :  { %v3701_v16 = vpop.f32.mrf.mxu0  ;;  %3009 = vmatprep.subr.bf16.mxu0 %v2232_v46  ;;  %v2304_v46 = vunpack.c.h.s8.bf16 %v1856_v58  ;;  %v2056_v33 = vunpack.c.l.s8.bf16 %v1736_v21 }
 0x410   :  { %2909 = vmatpush2.bf16.msra.mxu1 %v2397_v47  ;;  %v1855_v47 = vld [vmem:[#allocation10 + $0x5f0] sm:$0xff] }
 0x411   :  { %v2717_v20 = vpop.f32.mrf.mxu0  ;;  %2910 = vmatprep.subr.bf16.mxu1 %v2390_v40  ;;  %v2303_v15 = vunpack.c.h.s8.bf16 %v1855_v47 }
 0x412   :  { %3010 = vmatpush1.bf16.msra.mxu0 %v2231_v10  ;;  %v1743_v10 = vld [vmem:[#allocation10 + $0x270] sm:$0xff] }
 0x413   :  { %v2718_v23 = vpop.f32.mrf.mxu0  ;;  %3011 = vmatprep.subr.bf16.mxu0 %v2224_v56  ;;  %v2296_v56 = vunpack.c.l.s8.bf16 %v1856_v58  ;;  %v2079_v29 = vunpack.c.h.s8.bf16 %v1743_v10 }
 0x414   :  { %2911 = vmatpush2.bf16.msra.mxu1 %v2389_v61  ;;  %v1848_v61 = vld [vmem:[#allocation10 + $0x5b8] sm:$0xff]  ;;  %v1847_v23 = vld [vmem:[#allocation10 + $0x5b0] sm:$0xff] }
 0x415   :  { %2912 = vmatprep.subr.bf16.mxu1 %v2382_v13  ;;  %v2295_v13 = vunpack.c.l.s8.bf16 %v1855_v47 }
 0x416   :  { %3012 = vmatpush1.bf16.msra.mxu0 %v2223_v57  ;;  %v2288_v57 = vunpack.c.h.s8.bf16 %v1848_v61 }
 0x417   :  { %3013 = vmatprep.subr.bf16.mxu0 %v2216_v63  ;;  %v2071_v63 = vunpack.c.l.s8.bf16 %v1743_v10 }
 0x418   :  { %2913 = vmatpush2.bf16.msra.mxu1 %v2381_v0  ;;  %v2064_v0 = vunpack.c.h.s8.bf16 %v1736_v21 }
 0x419   :  { %2914 = vmatprep.subr.bf16.mxu1 %v2374_v25  ;;  %v2287_v25 = vunpack.c.h.s8.bf16 %v1847_v23 }
 0x41a   :  { %3014 = vmatpush1.bf16.msra.mxu0 %v2215_v30  ;;  %v2280_v30 = vunpack.c.l.s8.bf16 %v1848_v61 }
 0x41b   :  { %3015 = vmatprep.subr.bf16.mxu0 %v2208_v32  ;;  %v1840_v32 = vld [vmem:[#allocation10 + $0x578] sm:$0xff] }
 0x41c   :  { %2915 = vmatpush2.bf16.msra.mxu1 %v2373_v14  ;;  %v2279_v14 = vunpack.c.l.s8.bf16 %v1847_v23  ;;  %v2272_v35 = vunpack.c.h.s8.bf16 %v1840_v32 }
 0x41d   :  { %2966 = vmatprep.subr.bf16.mxu1 %v2112_v27  ;;  %v1792_v27 = vld [vmem:[#allocation10 + $0x3f8] sm:$0xff] }
 0x41e   :  { %3016 = vmatpush1.bf16.msra.mxu0 %v2207_v18  ;;  %v1839_v18 = vld [vmem:[#allocation10 + $0x570] sm:$0xff]  ;;  %v2168_v22 = vunpack.c.l.s8.bf16 %v1792_v27 }
 0x41f   :  { %v3703_v52 = vpop.f32.mrf.mxu1  ;;  %2917 = vmatmul.mubr.bf16.vlgmr.msra.gmra.mxu1 %v3648_v38  ;;  %3017 = vmatprep.subr.bf16.mxu0 %v2200_v41  ;;  %v2055_v41 = vunpack.c.l.s8.bf16 %v1735_v24  ;;  %v1888_v24 = vld [vmem:[#allocation10 + $0x6f8] sm:$0xff] }
 0x420   :  { %2967 = vmatpush1.bf16.msra.mxu1 %v2111_v43  ;;  %2998 = vmatprep.mubr.bf16.mxu1 %v3558_v3  ;;  %v1744_v3 = vld [vmem:[#allocation10 + $0x278] sm:$0xff]  ;;  %v2176_v43 = vunpack.c.h.s8.bf16 %v1792_v27 }
 0x421   :  { %v3707_v26 = vpop.f32.mrf.mxu1  ;;  %2968 = vmatprep.subr.bf16.mxu1 %v2104_v49  ;;  %v2080_v40 = vunpack.c.h.s8.bf16 %v1744_v3  ;;  %v2072_v20 = vunpack.c.l.s8.bf16 %v1744_v3  ;;  %v2271_v49 = vunpack.c.h.s8.bf16 %v1839_v18 }
 0x422   :  { %3018 = vmatpush1.bf16.msra.mxu0 %v2199_v50  ;;  %v2264_v50 = vunpack.c.l.s8.bf16 %v1840_v32  ;;  %v2675_v32 = vadd.f32 %v3707_v26, %v3676_v48 }
 0x423   :  { %v2676_v59 = vpop.f32.mrf.mxu1  ;;  %3019 = vmatprep.subr.bf16.mxu0 %v2192_v53  ;;  %v1832_v53 = vld [vmem:[#allocation10 + $0x538] sm:$0xff] }
 0x424   :  { %2969 = vmatpush1.bf16.msra.mxu1 %v2103_v34  ;;  %v2263_v34 = vunpack.c.l.s8.bf16 %v1839_v18  ;;  %v2256_v7 = vunpack.c.h.s8.bf16 %v1832_v53  ;;  %v2167_v59 = vunpack.c.l.s8.bf16 %v1791_v28  ;;  %v1880_v18 = vld [vmem:[#allocation10 + $0x6b8] sm:$0xff]  ;;  %v2716_v48 = vadd.f32 %v3701_v16, %v2675_v32 }
 0x425   :  { %v2677_v1 = vpop.f32.mrf.mxu1  ;;  %2970 = vmatprep.subr.bf16.mxu1 %v2096_v62  ;;  %v1784_v62 = vld [vmem:[#allocation10 + $0x3b8] sm:$0xff]  ;;  %v2352_v28 = vunpack.c.h.s8.bf16 %v1880_v18  ;;  %v2344_v16 = vunpack.c.l.s8.bf16 %v1880_v18 }
 0x426   :  { %3020 = vmatpush1.bf16.msra.mxu0 %v2191_v36  ;;  %v1831_v36 = vld [vmem:[#allocation10 + $0x530] sm:$0xff]  ;;  %v2248_v1 = vunpack.c.l.s8.bf16 %v1832_v53  ;;  %v1896_v18 = vld [vmem:[#allocation10 + $0x738] sm:$0xff] }
 0x427   :  { %3021 = vmatprep.subr.bf16.mxu0 %v2184_v54  ;;  %v2160_v54 = vunpack.c.h.s8.bf16 %v1784_v62  ;;  %v2255_v58 = vunpack.c.h.s8.bf16 %v1831_v36  ;;  %v2247_v3 = vunpack.c.l.s8.bf16 %v1831_v36  ;;  %v1872_v36 = vld [vmem:[#allocation10 + $0x678] sm:$0xff] }
 0x428   :  { %2971 = vmatpush1.bf16.msra.mxu1 %v2095_v55  ;;  %v1783_v55 = vld [vmem:[#allocation10 + $0x3b0] sm:$0xff] }
 0x429   :  { %2972 = vmatprep.subr.bf16.mxu1 %v2088_v60  ;;  %v2159_v60 = vunpack.c.h.s8.bf16 %v1783_v55  ;;  %v2151_v47 = vunpack.c.l.s8.bf16 %v1783_v55 }
 0x42a   :  { %3022 = vmatpush1.bf16.msra.mxu0 %v2183_v2  ;;  %v2152_v2 = vunpack.c.l.s8.bf16 %v1784_v62 }
 0x42b   :  { %3023 = vmatprep.subr.bf16.mxu0 %v2304_v46  ;;  %v1776_v46 = vld [vmem:[#allocation10 + $0x378] sm:$0xff] }
 0x42c   :  { %2973 = vmatpush1.bf16.msra.mxu1 %v2087_v37  ;;  %v2144_v37 = vunpack.c.h.s8.bf16 %v1776_v46 }
 0x42d   :  { %2974 = vmatprep.subr.bf16.mxu1 %v2080_v40  ;;  %v1775_v40 = vld [vmem:[#allocation10 + $0x370] sm:$0xff] }
 0x42e   :  { %3024 = vmatpush2.bf16.msra.mxu0 %v2303_v15  ;;  %v2143_v10 = vunpack.c.h.s8.bf16 %v1775_v40 }
 0x42f   :  { %3025 = vmatprep.subr.bf16.mxu0 %v2296_v56  ;;  %v2136_v56 = vunpack.c.l.s8.bf16 %v1776_v46 }
 0x430   :  { %2975 = vmatpush1.bf16.msra.mxu1 %v2079_v29  ;;  %v1768_v29 = vld [vmem:[#allocation10 + $0x338] sm:$0xff] }
 0x431   :  { %2976 = vmatprep.subr.bf16.mxu1 %v2072_v20  ;;  %v2135_v20 = vunpack.c.l.s8.bf16 %v1775_v40  ;;  %v2128_v21 = vunpack.c.h.s8.bf16 %v1768_v29 }
 0x432   :  { %3026 = vmatpush2.bf16.msra.mxu0 %v2295_v13 }
 0x433   :  { %3027 = vmatprep.subr.bf16.mxu0 %v2288_v57  ;;  %v1767_v57 = vld [vmem:[#allocation10 + $0x330] sm:$0xff] }
 0x434   :  { %2977 = vmatpush1.bf16.msra.mxu1 %v2071_v63  ;;  %v2127_v63 = vunpack.c.h.s8.bf16 %v1767_v57 }
 0x435   :  { %2978 = vmatprep.subr.bf16.mxu1 %v2064_v0  ;;  %v2120_v0 = vunpack.c.l.s8.bf16 %v1768_v29 }
 0x436   :  { %3028 = vmatpush2.bf16.msra.mxu0 %v2287_v25  ;;  %v2119_v25 = vunpack.c.l.s8.bf16 %v1767_v57 }
 0x437   :  { %3029 = vmatprep.subr.bf16.mxu0 %v2280_v30  ;;  %v1887_v30 = vld [vmem:[#allocation10 + $0x6f0] sm:$0xff] }
 0x438   :  { %2979 = vmatpush1.bf16.msra.mxu1 %v2063_v31  ;;  %v2673_v31 = vadd.f32 %v3703_v52, %v3672_v39  ;;  %v3106_v52 = vrot.slane %v3681_v42, %v3540_v11 }
 0x439   :  { %2980 = vmatprep.subr.bf16.mxu1 %v2056_v33  ;;  %v2367_v33 = vunpack.c.h.s8.bf16 %v1887_v30 }
 0x43a   :  { %3030 = vmatpush2.bf16.msra.mxu0 %v2279_v14  ;;  %v2360_v14 = vunpack.c.l.s8.bf16 %v1888_v24  ;;  %v2714_v27 = vadd.f32 %v3697_v6, %v2673_v31  ;;  %v2359_v6 = vunpack.c.l.s8.bf16 %v1887_v30  ;;  %v1904_v30 = vld [vmem:[#allocation10 + $0x778] sm:$0xff] }
 0x43b   :  { %3031 = vmatprep.subr.bf16.mxu0 %v2272_v35  ;;  %v3102_v35 = vrot.slane %v3681_v42, %v3574_v19  ;;  %v2400_v32 = vunpack.c.h.s8.bf16 %v1904_v30 }
 0x43c   :  { %2981 = vmatpush1.bf16.msra.mxu1 %v2055_v41 }
 0x43d   :  { %2982 = vmatprep.subr.bf16.mxu1 %v2176_v43  ;;  %v3152_v43 = vrot.slane %v3683_v9, %v3574_v19  ;;  %v3156_v19 = vrot.slane %v3683_v9, %v3540_v11 }
 0x43e   :  { %3032 = vmatpush2.bf16.msra.mxu0 %v2271_v49  ;;  %v1879_v49 = vld [vmem:[#allocation10 + $0x6b0] sm:$0xff] }
 0x43f   :  { %3033 = vmatprep.subr.bf16.mxu0 %v2264_v50  ;;  %v2343_v55 = vunpack.c.l.s8.bf16 %v1879_v49 }
 0x440   :  { %2983 = vmatpush2.bf16.msra.mxu1 %v2175_v51 }
 0x441   :  { %2984 = vmatprep.subr.bf16.mxu1 %v2168_v22 }
 0x442   :  { %3034 = vmatpush2.bf16.msra.mxu0 %v2263_v34 }
 0x443   :  { %3035 = vmatprep.subr.bf16.mxu0 %v2256_v7 }
 0x444   :  { %2985 = vmatpush2.bf16.msra.mxu1 %v2167_v59 }
 0x445   :  { %2986 = vmatprep.subr.bf16.mxu1 %v2160_v54 }
 0x446   :  { %3036 = vmatpush2.bf16.msra.mxu0 %v2255_v58  ;;  %v2336_v58 = vunpack.c.h.s8.bf16 %v1872_v36 }
 0x447   :  { %3037 = vmatprep.subr.bf16.mxu0 %v2248_v1  ;;  %v1871_v1 = vld [vmem:[#allocation10 + $0x670] sm:$0xff] }
 0x448   :  { %2987 = vmatpush2.bf16.msra.mxu1 %v2159_v60  ;;  %v2335_v60 = vunpack.c.h.s8.bf16 %v1871_v1  ;;  %v2327_v46 = vunpack.c.l.s8.bf16 %v1871_v1 }
 0x449   :  { %2988 = vmatprep.subr.bf16.mxu1 %v2152_v2  ;;  %v2328_v2 = vunpack.c.l.s8.bf16 %v1872_v36  ;;  %v3110_v36 = vrot.slane %v3681_v42, %v3611_v44 }
 0x44a   :  { %3038 = vmatpush2.bf16.msra.mxu0 %v2247_v3  ;;  %v1864_v3 = vld [vmem:[#allocation10 + $0x638] sm:$0xff] }
 0x44c   :  { %2989 = vmatpush2.bf16.msra.mxu1 %v2151_v47  ;;  %v2320_v47 = vunpack.c.h.s8.bf16 %v1864_v3 }
 0x44d   :  { %v3709_v15 = vpop.f32.mrf.mxu0  ;;  %3040 = vmatmul.mubr.bf16.vlgmr.msra.gmra.mxu0 %v3621_v12  ;;  %2990 = vmatprep.subr.bf16.mxu1 %v2144_v37  ;;  %v2368_v12 = vunpack.c.h.s8.bf16 %v1888_v24  ;;  %v1863_v37 = vld [vmem:[#allocation10 + $0x630] sm:$0xff] }
 0x44e   :  { %v2319_v40 = vunpack.c.h.s8.bf16 %v1863_v37  ;;  %v2311_v29 = vunpack.c.l.s8.bf16 %v1863_v37  ;;  %v1911_v24 = vld [vmem:[#allocation10 + $0x7b0] sm:$0xff] }
 0x44f   :  { %v3712_v61 = vpop.f32.mrf.mxu0  ;;  %v2407_v31 = vunpack.c.l.s8.bf16 %v1911_v24 }
 0x450   :  { %2991 = vmatpush2.bf16.msra.mxu1 %v2143_v10  ;;  %v2312_v10 = vunpack.c.l.s8.bf16 %v1864_v3 }
 0x451   :  { %v2799_v13 = vpop.f32.mrf.mxu0  ;;  %2992 = vmatprep.subr.bf16.mxu1 %v2136_v56  ;;  %v1920_v56 = vld [vmem:[#allocation10 + $0x7f8] sm:$0xff] }
 0x452   :  { %v1919_v13 = vld [vmem:[#allocation10 + $0x7f0] sm:$0xff]  ;;  %v2424_v57 = vunpack.c.l.s8.bf16 %v1920_v56 }
 0x453   :  { %v2800_v23 = vpop.f32.mrf.mxu0 }
 0x454   :  { %2993 = vmatpush2.bf16.msra.mxu1 %v2135_v20  ;;  %v2432_v20 = vunpack.c.h.s8.bf16 %v1920_v56  ;;  %v1912_v23 = vld [vmem:[#allocation10 + $0x7b8] sm:$0xff] }
 0x455   :  { %2994 = vmatprep.subr.bf16.mxu1 %v2128_v21  ;;  %v2431_v21 = vunpack.c.h.s8.bf16 %v1919_v13 }
 0x458   :  { %2995 = vmatpush2.bf16.msra.mxu1 %v2127_v63  ;;  %v2423_v63 = vunpack.c.l.s8.bf16 %v1919_v13 }
 0x459   :  { %2996 = vmatprep.subr.bf16.mxu1 %v2120_v0  ;;  %v2416_v0 = vunpack.c.h.s8.bf16 %v1912_v23 }
 0x45c   :  { %2997 = vmatpush2.bf16.msra.mxu1 %v2119_v25  ;;  %v2415_v25 = vunpack.c.h.s8.bf16 %v1911_v24 }
 0x45d   :  { %3048 = vmatprep.subr.bf16.mxu1 %v2368_v12  ;;  %v2408_v12 = vunpack.c.l.s8.bf16 %v1912_v23 }
 0x45f   :  { %v2754_v41 = vpop.f32.mrf.mxu1  ;;  %2999 = vmatmul.mubr.bf16.vlgmr.msra.gmra.mxu1 %v3588_v17 }
 0x460   :  { %v2755_v39 = vadd.f32 %v2754_v41, %v2714_v27  ;;  %3049 = vmatpush1.bf16.msra.mxu1 %v2367_v33  ;;  %3080 = vmatprep.mubr.bf16.mxu1 %v3646_v4  ;;  %v2351_v4 = vunpack.c.h.s8.bf16 %v1879_v49  ;;  %v1903_v33 = vld [vmem:[#allocation10 + $0x770] sm:$0xff] }
 0x461   :  { %v2756_v26 = vpop.f32.mrf.mxu1  ;;  %3050 = vmatprep.subr.bf16.mxu1 %v2360_v14  ;;  %v2399_v14 = vunpack.c.h.s8.bf16 %v1903_v33 }
 0x462   :  { %v3133_v50 = vmul.f32 %v3102_v35, %v2755_v39  ;;  %v2757_v51 = vadd.f32 %v2756_v26, %v2716_v48  ;;  %v2392_v35 = vunpack.c.l.s8.bf16 %v1904_v30  ;;  %v2384_v48 = vunpack.c.h.s8.bf16 %v1896_v18 }
 0x463   :  { %v2758_v17 = vpop.f32.mrf.mxu1 }
 0x464   :  { %v3183_v53 = vadd.f32 %v3152_v43, %v3133_v50  ;;  %v3134_v22 = vmul.f32 %v3106_v52, %v2757_v51  ;;  %3051 = vmatpush1.bf16.msra.mxu1 %v2359_v6  ;;  %v2391_v43 = vunpack.c.l.s8.bf16 %v1903_v33  ;;  %v1895_v52 = vld [vmem:[#allocation10 + $0x730] sm:$0xff]  ;;  %v3122_v33 = vrot.slane %v3681_v42, %v3635_v5 }
 0x465   :  { %v2759_v34 = vpop.f32.mrf.mxu1  ;;  %3052 = vmatprep.subr.bf16.mxu1 %v2352_v28  ;;  %v2383_v26 = vunpack.c.h.s8.bf16 %v1895_v52  ;;  %v2376_v28 = vunpack.c.l.s8.bf16 %v1896_v18  ;;  %v2375_v49 = vunpack.c.l.s8.bf16 %v1895_v52  ;;  %v3172_v18 = vrot.slane %v3683_v9, %v3635_v5 }
 0x466   :  { %v3191_v62 = vmax.f32 %v3183_v53, 0.0  ;;  %v3184_v7 = vadd.f32 %v3156_v19, %v3134_v22 }
 0x468   :  { %v3199_v59 = vmul.f32 %v3191_v62, %v3191_v62  ;;  %v3192_v54 = vmax.f32 %v3184_v7, 0.0  ;;  %3053 = vmatpush1.bf16.msra.mxu1 %v2351_v4 }
 0x469   :  { %3054 = vmatprep.subr.bf16.mxu1 %v2344_v16 }
 0x46a   :  { %3207 = vst [vmem:[#allocation13 + $0x10] sm:$0xff] %v3199_v59  ;;  %v3200_v11 = vmul.f32 %v3192_v54, %v3192_v54 }
 0x46c   :  { %3208 = vst [vmem:[#allocation13 + $0x18] sm:$0xff] %v3200_v11  ;;  %3055 = vmatpush1.bf16.msra.mxu1 %v2343_v55 }
 0x46d   :  { %3056 = vmatprep.subr.bf16.mxu1 %v2336_v58  ;;  %v3114_v58 = vrot.slane %v3681_v42, %v3591_v8 }
 0x470   :  { %3057 = vmatpush1.bf16.msra.mxu1 %v2335_v60 }
 0x471   :  { %3058 = vmatprep.subr.bf16.mxu1 %v2328_v2 }
 0x474   :  { %3059 = vmatpush1.bf16.msra.mxu1 %v2327_v46 }
 0x475   :  { %3060 = vmatprep.subr.bf16.mxu1 %v2320_v47 }
 0x478   :  { %3061 = vmatpush1.bf16.msra.mxu1 %v2319_v40 }
 0x479   :  { %3062 = vmatprep.subr.bf16.mxu1 %v2312_v10 }
 0x47c   :  { %3063 = vmatpush1.bf16.msra.mxu1 %v2311_v29 }
 0x47d   :  { %3064 = vmatprep.subr.bf16.mxu1 %v2432_v20 }
 0x480   :  { %3065 = vmatpush2.bf16.msra.mxu1 %v2431_v21 }
 0x481   :  { %3066 = vmatprep.subr.bf16.mxu1 %v2424_v57 }
 0x484   :  { %3067 = vmatpush2.bf16.msra.mxu1 %v2423_v63 }
 0x485   :  { %3068 = vmatprep.subr.bf16.mxu1 %v2416_v0 }
 0x488   :  { %3069 = vmatpush2.bf16.msra.mxu1 %v2415_v25  ;;  %v3118_v25 = vrot.slane %v3681_v42, %v3632_v45 }
 0x489   :  { %3070 = vmatprep.subr.bf16.mxu1 %v2408_v12 }
 0x48c   :  { %3071 = vmatpush2.bf16.msra.mxu1 %v2407_v31  ;;  %v3168_v31 = vrot.slane %v3683_v9, %v3632_v45 }
 0x48d   :  { %v2877_v27 = vpop.f32.mrf.mxu0  ;;  %3072 = vmatprep.subr.bf16.mxu1 %v2400_v32 }
 0x48f   :  { %v2879_v41 = vpop.f32.mrf.mxu0 }
 0x490   :  { %3073 = vmatpush2.bf16.msra.mxu1 %v2399_v14 }
 0x491   :  { %v2881_v39 = vpop.f32.mrf.mxu0  ;;  %3074 = vmatprep.subr.bf16.mxu1 %v2392_v35 }
 0x493   :  { %v2882_v6 = vpop.f32.mrf.mxu0 }
 0x494   :  { %3075 = vmatpush2.bf16.msra.mxu1 %v2391_v43 }
 0x495   :  { %3076 = vmatprep.subr.bf16.mxu1 %v2384_v48 }
 0x498   :  { %3077 = vmatpush2.bf16.msra.mxu1 %v2383_v26 }
 0x499   :  { %3078 = vmatprep.subr.bf16.mxu1 %v2376_v28 }
 0x49c   :  { %3079 = vmatpush2.bf16.msra.mxu1 %v2375_v49 }
 0x49f   :  { %v2836_v50 = vpop.f32.mrf.mxu1  ;;  %3081 = vmatmul.mubr.bf16.vlgmr.msra.gmra.mxu1 %v3648_v38  ;;  %v3160_v38 = vrot.slane %v3683_v9, %v3611_v44 }
 0x4a0   :  { %v2837_v16 = vadd.f32 %v2836_v50, %v3709_v15  ;;  %v3164_v15 = vrot.slane %v3683_v9, %v3591_v8 }
 0x4a1   :  { %v2838_v51 = vpop.f32.mrf.mxu1 }
 0x4a2   :  { %v2839_v62 = vadd.f32 %v2838_v51, %v3712_v61  ;;  %v2878_v7 = vadd.f32 %v2877_v27, %v2837_v16 }
 0x4a3   :  { %v2840_v19 = vpop.f32.mrf.mxu1 }
 0x4a4   :  { %v2880_v55 = vadd.f32 %v2879_v41, %v2839_v62 }
 0x4a5   :  { %v2841_v17 = vpop.f32.mrf.mxu1 }
 0x4cd   :  { %v2959_v53 = vpop.f32.mrf.mxu0 }
 0x4cf   :  { %v2961_v22 = vpop.f32.mrf.mxu0 }
 0x4d1   :  { %v2963_v4 = vpop.f32.mrf.mxu0 }
 0x4d3   :  { %v2964_v34 = vpop.f32.mrf.mxu0 }
 0x4df   :  { %v2918_v59 = vpop.f32.mrf.mxu1 }
 0x4e0   :  { %v2919_v54 = vadd.f32 %v2918_v59, %v2878_v7 }
 0x4e1   :  { %v2920_v1 = vpop.f32.mrf.mxu1 }
 0x4e2   :  { %v3135_v11 = vmul.f32 %v3110_v36, %v2919_v54  ;;  %v2921_v60 = vadd.f32 %v2920_v1, %v2880_v55 }
 0x4e3   :  { %v2922_v61 = vpop.f32.mrf.mxu1 }
 0x4e4   :  { %v3185_v2 = vadd.f32 %v3160_v38, %v3135_v11  ;;  %v3136_v3 = vmul.f32 %v3114_v58, %v2921_v60 }
 0x4e5   :  { %v2923_v46 = vpop.f32.mrf.mxu1 }
 0x4e6   :  { %v3193_v47 = vmax.f32 %v3185_v2, 0.0  ;;  %v3186_v37 = vadd.f32 %v3164_v15, %v3136_v3 }
 0x4e8   :  { %v3201_v40 = vmul.f32 %v3193_v47, %v3193_v47  ;;  %v3194_v10 = vmax.f32 %v3186_v37, 0.0 }
 0x4ea   :  { %3209 = vst [vmem:[#allocation13 + $0x20] sm:$0xff] %v3201_v40  ;;  %v3202_v44 = vmul.f32 %v3194_v10, %v3194_v10 }
 0x4ec   :  { %3210 = vst [vmem:[#allocation13 + $0x28] sm:$0xff] %v3202_v44 }
 0x50d   :  { %v3041_v56 = vpop.f32.mrf.mxu0 }
 0x50f   :  { %v3043_v29 = vpop.f32.mrf.mxu0 }
 0x511   :  { %v3045_v20 = vpop.f32.mrf.mxu0 }
 0x513   :  { %v3046_v13 = vpop.f32.mrf.mxu0 }
 0x51f   :  { %v3000_v21 = vpop.f32.mrf.mxu1 }
 0x520   :  { %v3001_v8 = vadd.f32 %v3000_v21, %v2959_v53 }
 0x521   :  { %v3002_v57 = vpop.f32.mrf.mxu1 }
 0x522   :  { %v3003_v0 = vadd.f32 %v3002_v57, %v2961_v22  ;;  %v3042_v24 = vadd.f32 %v3041_v56, %v3001_v8 }
 0x523   :  { %v3004_v23 = vpop.f32.mrf.mxu1 }
 0x524   :  { %v3044_v32 = vadd.f32 %v3043_v29, %v3003_v0 }
 0x525   :  { %v3005_v63 = vpop.f32.mrf.mxu1 }
 0x55f   :  { %v3082_v12 = vpop.f32.mrf.mxu1 }
 0x560   :  { %v3083_v30 = vadd.f32 %v3082_v12, %v3042_v24 }
 0x561   :  { %v3084_v14 = vpop.f32.mrf.mxu1 }
 0x562   :  { %v3137_v27 = vmul.f32 %v3118_v25, %v3083_v30  ;;  %v3085_v35 = vadd.f32 %v3084_v14, %v3044_v32 }
 0x563   :  { %v3086_v41 = vpop.f32.mrf.mxu1 }
 0x564   :  { %v3187_v43 = vadd.f32 %v3168_v31, %v3137_v27  ;;  %v3138_v39 = vmul.f32 %v3122_v33, %v3085_v35 }
 0x565   :  { %v3087_v48 = vpop.f32.mrf.mxu1 }
 0x566   :  { %v3195_v52 = vmax.f32 %v3187_v43, 0.0  ;;  %v3188_v6 = vadd.f32 %v3172_v18, %v3138_v39 }
 0x568   :  { %v3203_v26 = vmul.f32 %v3195_v52, %v3195_v52  ;;  %v3196_v45 = vmax.f32 %v3188_v6, 0.0 }
 0x56a   :  { %3211 = vst [vmem:[#allocation13 + $0x30] sm:$0xff] %v3203_v26  ;;  %v3204_v28 = vmul.f32 %v3196_v45, %v3196_v45 }
 0x56c   :  { %3212 = vst [vmem:[#allocation13 + $0x38] sm:$0xff] %v3204_v28 }
 0x56d   :  { %3373 = shalt.err (!%p3370_p6)
}
 0x56e   :  { %3222 = dma.vmem_to_hbm [thread:$0]  %s3220_s27, 1024, %s3759_s7, [#allocation4]  }
 0x56f   :  { %3390 = dma.done.wait [#allocation4], 1024  }
 0x570   :  { %3391 = vsyncadd [#allocation4], 4294966272 }
 0x571   :  { %3226 = vsyncpa [#allocation3], 1 }
 0x572   :  { %3227 = vsyncpa [#allocation6], 1 }
 0x573   :  { %3228 = vsyncpa [#allocation9], 1 }
 0x574   :  { %3229 = vsyncpa [#allocation12], 1 }
 0x575   :  { %3230 = vsyncpa [#allocation4], 1 }

</bundles_post_ra>
